<compile_context>
chip_gen: v6e
topology: v6e:2x2x1
jax: 0.10.0
libtpu: 0.0.40
codegen_flags: <defaults>
</compile_context>

<pallas_src>
import math

import jax
import jax.numpy as jnp
from jax.experimental import pallas as pl
from jax.experimental.pallas import tpu as pltpu

# ---- small config consistent with the module --------------------------------
BS = 2
SEQ = 8
HIDDEN = 32
HEADS = 4
HEAD_DIM = HIDDEN // HEADS
INTER = 64
MAX_POS = 512                   # max_position_embeddings == att_span
NUM_REL = 2 * MAX_POS           # rows of relative_position_embeddings
ROWS = BS * SEQ                 # batch folded into sublanes
EPS = 1e-12
NEG = -1e9                      # cross-batch block mask (exp underflows to 0)

# DeBERTa-style disentangled-attention scales
S_SCALE = 1.0 / math.sqrt(3.0 * HEADS)      # content & p2c: 1/sqrt(3*num_heads)
C2P_SCALE = 1.0 / math.sqrt(3.0 * HIDDEN)   # c2p: 1/sqrt(3*all_head_size)


def _erf(x):
    # Abramowitz & Stegun 7.1.26 (|err| < 1.5e-7); exp goes to the EUP slot.
    a1, a2, a3, a4, a5 = 0.254829592, -0.284496736, 1.421413741, -1.453152027, 1.061405429
    p = 0.3275911
    s = jnp.where(x >= 0.0, 1.0, -1.0)
    ax = jnp.abs(x)
    t = 1.0 / (1.0 + p * ax)
    poly = ((((a5 * t + a4) * t + a3) * t + a2) * t + a1) * t
    return s * (1.0 - poly * jnp.exp(-ax * ax))


def _gelu_exact(x):
    # F.gelu default (erf-based, non-approximate) — keeps module semantics.
    return 0.5 * x * (1.0 + _erf(x * (1.0 / math.sqrt(2.0))))


# ------------------------------ Pallas kernel --------------------------------
def bert_layer_kernel(x_ref, mask_ref, gc_ref, gp_ref,
                      wqkv_ref, bqkv_ref, wad_ref, bad_ref, g1_ref, b1_ref,
                      wi_ref, bi_ref, wo_ref, bo_ref, g2_ref, b2_ref,
                      out_ref):
    rows, hidden = x_ref.shape                     # [bs*seq, hidden]
    d = HEAD_DIM

    x = x_ref[...]                                 # f32 residual stream
    mask = mask_ref[...]                           # [rows, rows] additive (block-diag)

    # fused Q|K|V projection: one MXU pass, bf16 operands, f32 accumulation.
    # (column slices at 32/64 are not lane-128-aligned; negligible at hidden=32,
    #  and at real sizes the boundaries are naturally multiples of 128.)
    qkv = jnp.dot(x.astype(jnp.bfloat16), wqkv_ref[...],
                  preferred_element_type=jnp.float32) + bqkv_ref[...]   # [rows, 3*hidden]
    qs = qkv[:, :hidden] * S_SCALE                 # content scale folded into q once
    k = qkv[:, hidden:2 * hidden]
    v = qkv[:, 2 * hidden:]

    gc = gc_ref[...]                               # [rows, rows, hidden], pre-scaled
    gp = gp_ref[...]

    ctx_parts = []
    for h in range(HEADS):                         # static, fully unrolled
        sl = slice(h * d, (h + 1) * d)
        qs_h, k_h, v_h = qs[:, sl], k[:, sl], v[:, sl]           # [rows, d]

        # content scores on the MXU
        s_c = jnp.einsum('id,jd->ij', qs_h, k_h,
                         preferred_element_type=jnp.float32)     # [rows, rows]
        # c2p / p2c: tiny d=8 contractions against the hoisted gathered rows.
        c2p = jnp.sum(qs_h[:, None, :] * gc[:, :, sl], axis=-1)  # [rows, rows]
        p2c = jnp.sum(gp[:, :, sl] * k_h[None, :, :], axis=-1)   # [rows, rows]

        score = s_c + c2p + p2c + mask
        m = jnp.max(score, axis=-1, keepdims=True)
        e = jnp.exp(score - m)
        probs = e * pl.reciprocal(jnp.sum(e, axis=-1, keepdims=True), approx=True)

        ctx_parts.append(jnp.dot(probs, v_h,
                                 preferred_element_type=jnp.float32))   # [rows, d]

    ctx = jnp.concatenate(ctx_parts, axis=-1)                    # [rows, hidden]

    dense1 = jnp.dot(ctx.astype(jnp.bfloat16), wad_ref[...],
                     preferred_element_type=jnp.float32) + bad_ref[...]

    def layer_norm(y, g_r, b_r):
        mu = jnp.mean(y, axis=-1, keepdims=True)
        var = jnp.mean((y - mu) ** 2, axis=-1, keepdims=True)
        return (y - mu) * jax.lax.rsqrt(var + EPS) * g_r[...] + b_r[...]

    # add & norm 1 (dropout == identity in eval mode)
    h1 = layer_norm(x + dense1, g1_ref, b1_ref)

    # feed-forward
    f = jnp.dot(h1.astype(jnp.bfloat16), wi_ref[...],
                preferred_element_type=jnp.float32) + bi_ref[...]
    f = _gelu_exact(f)
    d2 = jnp.dot(f.astype(jnp.bfloat16), wo_ref[...],
                 preferred_element_type=jnp.float32) + bo_ref[...]

    # add & norm 2
    out_ref[...] = layer_norm(h1 + d2, g2_ref, b2_ref)


def _full_spec(shape):
    nd = len(shape)
    return pl.BlockSpec(shape, lambda i, _nd=nd: (0,) * _nd)


def bert_layer_pallas(params, hidden_states, attention_mask_4d, relative_pos):
    """hidden_states [bs,seq,hidden] f32, attention_mask [bs,1,1,seq] additive,
    relative_pos [1,1,seq,seq] int32 -> [bs,seq,hidden] f32."""
    bs, seq, hidden = hidden_states.shape
    rows = bs * seq

    # ---- wrapper-side glue: layout plumbing + weight-only precompute ---------
    x2 = hidden_states.reshape(rows, hidden).astype(jnp.float32)

    # block-diagonal additive mask: own-batch keys get the attention mask,
    # cross-batch keys get NEG (exp underflows to exactly 0 in f32).
    base = attention_mask_4d[:, 0, 0, :].astype(jnp.float32)          # [bs, seq]
    blk = jnp.arange(rows) // seq
    same_b = blk[:, None] == blk[None, :]
    mask_full = jnp.where(same_b, base.reshape(-1)[None, :], jnp.float32(NEG))

    # hoisted batch-invariant rel-pos path: gather the needed embedding rows,
    # project once with pos_key, fold the c2p/p2c scales, tile per batch block.
    p_idx = jnp.clip(relative_pos[0, 0] + MAX_POS, 0, NUM_REL - 1)     # [seq, seq]
    g = params['rel_emb'][p_idx.reshape(-1)] @ params['wpk'] + params['bpk']  # [seq*seq, hidden]
    gc = (g * (C2P_SCALE / S_SCALE)).reshape(seq, seq, hidden)         # pairs with scaled q
    gp = (g * S_SCALE).reshape(seq, seq, hidden)                       # pairs with unscaled k
    gc_full = jnp.tile(gc, (bs, bs, 1))                                # [rows, rows, hidden]
    gp_full = jnp.tile(gp, (bs, bs, 1))

    # fused QKV weight/bias slabs; MXU-side weights in bf16 (f32 accumulation)
    wqkv = jnp.concatenate([params['wq'], params['wk'], params['wv']],
                           axis=1).astype(jnp.bfloat16)
    bqkv = jnp.concatenate([params['bq'], params['bk'], params['bv']], axis=1)
    wad = params['wad'].astype(jnp.bfloat16)
    wi = params['wi'].astype(jnp.bfloat16)
    wo = params['wo'].astype(jnp.bfloat16)

    inputs = [x2, mask_full, gc_full, gp_full,
              wqkv, bqkv, wad, params['bad'], params['g1'], params['b1'],
              wi, params['bi'], wo, params['bo'], params['g2'], params['b2']]

    flops = int(
        2 * rows * hidden * (3 * hidden)                  # fused qkv projection
        + HEADS * 4 * (2 * rows * rows * HEAD_DIM)        # content + c2p + p2c + probs@v
        + 2 * rows * hidden * hidden                      # attention output dense
        + 2 * rows * hidden * INTER                       # interm dense
        + 2 * rows * INTER * hidden)                      # out dense
    transcendentals = int(HEADS * rows * rows + rows * INTER + HEADS * rows)
    bytes_accessed = int(sum(int(a.size) * a.dtype.itemsize for a in inputs)
                         + rows * hidden * 4)

    out = pl.pallas_call(
        bert_layer_kernel,
        out_shape=jax.ShapeDtypeStruct((rows, hidden), jnp.float32),
        grid=(1,),
        in_specs=[_full_spec(a.shape) for a in inputs],
        out_specs=pl.BlockSpec((rows, hidden), lambda i: (0, 0)),
        compiler_params=pltpu.CompilerParams(
            dimension_semantics=("arbitrary",)),
        cost_estimate=pl.CostEstimate(flops=flops,
                                      transcendentals=transcendentals,
                                      bytes_accessed=bytes_accessed),
    )(*inputs)
    return out.reshape(bs, seq, hidden)


# ----------------------- pure-JAX reference (mirrors torch) ------------------
def bert_layer_ref(p, x, attn_mask, rel_pos):
    bs, seq, hidden = x.shape
    H, d = HEADS, HEAD_DIM

    def transform(t, w, b):
        pr = t @ w + b
        pr = pr.reshape(t.shape[0], t.shape[1], H, d)
        return jnp.transpose(pr, (0, 2, 1, 3))

    q = transform(x, p['wq'], p['bq'])
    k = transform(x, p['wk'], p['bk'])
    v = transform(x, p['wv'], p['bv'])

    s_content = (q @ jnp.swapaxes(k, -1, -2)) / math.sqrt(3 * H)

    att_span = MAX_POS
    pos_key = transform(p['rel_emb'][None], p['wpk'], p['bpk'])[0]    # [H, 2*att_span, d]
    pos_key = jnp.broadcast_to(pos_key[None], (bs, H, 2 * att_span, d))
    pos_query = pos_key                                               # pos_query reuses pos_key

    c2p = q @ (jnp.swapaxes(pos_key, -1, -2) / math.sqrt(hidden * 3))
    c2p_pos = jnp.clip(rel_pos + att_span, 0, 2 * att_span - 1)
    c2p_pos = jnp.broadcast_to(c2p_pos, (bs, H, seq, seq))
    c2p = jnp.take_along_axis(c2p, c2p_pos, axis=-1)
    p2c = (pos_query / math.sqrt(3 * H)) @ jnp.swapaxes(k, -1, -2)
    p2c = jnp.take_along_axis(p2c, c2p_pos, axis=-2)

    score = s_content + c2p + p2c + attn_mask
    probs = jax.nn.softmax(score, axis=-1)
    ctx = probs @ v
    ctx = jnp.transpose(ctx, (0, 2, 1, 3)).reshape(bs, seq, hidden)

    def add_norm(inp, out, w, b, g, beta):
        y = inp + (out @ w + b)
        mu = y.mean(-1, keepdims=True)
        var = ((y - mu) ** 2).mean(-1, keepdims=True)
        return (y - mu) / jnp.sqrt(var + EPS) * g + beta

    h1 = add_norm(x, ctx, p['wad'], p['bad'], p['g1'], p['b1'])
    ff = h1 @ p['wi'] + p['bi']
    ff = 0.5 * ff * (1.0 + jax.scipy.special.erf(ff / math.sqrt(2.0)))
    return add_norm(h1, ff, p['wo'], p['bo'], p['g2'], p['b2'])


# ----------------------------------- main ------------------------------------
if __name__ == "__main__":
    key = jax.random.PRNGKey(0)
    ks = jax.random.split(key, 24)

    def rnd(k, shape, scale):
        return jax.random.normal(k, shape, jnp.float32) * scale

    params = {
        'wq': rnd(ks[0], (HIDDEN, HIDDEN), 0.05), 'bq': rnd(ks[1], (1, HIDDEN), 0.02),
        'wk': rnd(ks[2], (HIDDEN, HIDDEN), 0.05), 'bk': rnd(ks[3], (1, HIDDEN), 0.02),
        'wv': rnd(ks[4], (HIDDEN, HIDDEN), 0.05), 'bv': rnd(ks[5], (1, HIDDEN), 0.02),
        'wpk': rnd(ks[6], (HIDDEN, HIDDEN), 0.05), 'bpk': rnd(ks[7], (1, HIDDEN), 0.02),
        'rel_emb': rnd(ks[8], (NUM_REL, HIDDEN), 0.05),
        'wad': rnd(ks[9], (HIDDEN, HIDDEN), 0.05), 'bad': rnd(ks[10], (1, HIDDEN), 0.02),
        'g1': 1.0 + rnd(ks[11], (1, HIDDEN), 0.05), 'b1': rnd(ks[12], (1, HIDDEN), 0.02),
        'wi': rnd(ks[13], (HIDDEN, INTER), 0.05), 'bi': rnd(ks[14], (1, INTER), 0.02),
        'wo': rnd(ks[15], (INTER, HIDDEN), 0.05), 'bo': rnd(ks[16], (1, HIDDEN), 0.02),
        'g2': 1.0 + rnd(ks[17], (1, HIDDEN), 0.05), 'b2': rnd(ks[18], (1, HIDDEN), 0.02),
    }

    x = jax.random.normal(ks[19], (BS, SEQ, HIDDEN), jnp.float32)

    # additive attention mask [bs, 1, 1, seq]: batch 1 has its last 3 keys masked
    attn_mask = jnp.zeros((BS, 1, 1, SEQ), jnp.float32)
    attn_mask = attn_mask.at[1, 0, 0, SEQ - 3:].set(-10000.0)

    # relative positions (query - key), [1, 1, seq, seq] int32
    qi = jnp.arange(SEQ)[:, None]
    kj = jnp.arange(SEQ)[None, :]
    rel_pos = (qi - kj).astype(jnp.int32)[None, None]

    out = jax.block_until_ready(bert_layer_pallas(params, x, attn_mask, rel_pos))
    ref = bert_layer_ref(params, x, attn_mask, rel_pos)

    assert out.shape == (BS, SEQ, HIDDEN), out.shape
    # bf16 MXU operands (f32 accumulation) vs the all-f32 reference introduce
    # ~1e-3-level error; tolerance still catches any structural/semantic bug.
    if not jnp.allclose(out, ref, atol=1e-2, rtol=1e-2):
        raise AssertionError(
            f"kernel/reference mismatch, max abs err = {float(jnp.max(jnp.abs(out - ref)))}")

    print("KERNEL_OK")
</pallas_src>

<mosaic_0001>
module attributes {stable_mosaic.version = 11 : i64} {
  func.func @bert_layer_kernel(%arg0: i32, %arg1: memref<16x32xf32, #tpu.memory_space<vmem>>, %arg2: memref<16x16xf32, #tpu.memory_space<vmem>>, %arg3: memref<16x16x32xf32, #tpu.memory_space<vmem>>, %arg4: memref<16x16x32xf32, #tpu.memory_space<vmem>>, %arg5: memref<32x96xbf16, #tpu.memory_space<vmem>>, %arg6: memref<1x96xf32, #tpu.memory_space<vmem>>, %arg7: memref<32x32xbf16, #tpu.memory_space<vmem>>, %arg8: memref<1x32xf32, #tpu.memory_space<vmem>>, %arg9: memref<1x32xf32, #tpu.memory_space<vmem>>, %arg10: memref<1x32xf32, #tpu.memory_space<vmem>>, %arg11: memref<32x64xbf16, #tpu.memory_space<vmem>>, %arg12: memref<1x64xf32, #tpu.memory_space<vmem>>, %arg13: memref<64x32xbf16, #tpu.memory_space<vmem>>, %arg14: memref<1x32xf32, #tpu.memory_space<vmem>>, %arg15: memref<1x32xf32, #tpu.memory_space<vmem>>, %arg16: memref<1x32xf32, #tpu.memory_space<vmem>>, %arg17: memref<16x32xf32, #tpu.memory_space<vmem>>) attributes {dimension_semantics = [#tpu.dimension_semantics<arbitrary>], iteration_bounds = array<i64: 1>, scalar_prefetch = 0 : i64, scratch_operands = 0 : i64, tpu.core_type = #tpu.core_type<tc>, window_params = [{pipeline_mode = #tpu.pipeline_mode<synchronous>, transform_indices = @transform_0, window_bounds = array<i64: 16, 32>}, {pipeline_mode = #tpu.pipeline_mode<synchronous>, transform_indices = @transform_1, window_bounds = array<i64: 16, 16>}, {pipeline_mode = #tpu.pipeline_mode<synchronous>, transform_indices = @transform_2, window_bounds = array<i64: 16, 16, 32>}, {pipeline_mode = #tpu.pipeline_mode<synchronous>, transform_indices = @transform_3, window_bounds = array<i64: 16, 16, 32>}, {pipeline_mode = #tpu.pipeline_mode<synchronous>, transform_indices = @transform_4, window_bounds = array<i64: 32, 96>}, {pipeline_mode = #tpu.pipeline_mode<synchronous>, transform_indices = @transform_5, window_bounds = array<i64: 1, 96>}, {pipeline_mode = #tpu.pipeline_mode<synchronous>, transform_indices = @transform_6, window_bounds = array<i64: 32, 32>}, {pipeline_mode = #tpu.pipeline_mode<synchronous>, transform_indices = @transform_7, window_bounds = array<i64: 1, 32>}, {pipeline_mode = #tpu.pipeline_mode<synchronous>, transform_indices = @transform_8, window_bounds = array<i64: 1, 32>}, {pipeline_mode = #tpu.pipeline_mode<synchronous>, transform_indices = @transform_9, window_bounds = array<i64: 1, 32>}, {pipeline_mode = #tpu.pipeline_mode<synchronous>, transform_indices = @transform_10, window_bounds = array<i64: 32, 64>}, {pipeline_mode = #tpu.pipeline_mode<synchronous>, transform_indices = @transform_11, window_bounds = array<i64: 1, 64>}, {pipeline_mode = #tpu.pipeline_mode<synchronous>, transform_indices = @transform_12, window_bounds = array<i64: 64, 32>}, {pipeline_mode = #tpu.pipeline_mode<synchronous>, transform_indices = @transform_13, window_bounds = array<i64: 1, 32>}, {pipeline_mode = #tpu.pipeline_mode<synchronous>, transform_indices = @transform_14, window_bounds = array<i64: 1, 32>}, {pipeline_mode = #tpu.pipeline_mode<synchronous>, transform_indices = @transform_15, window_bounds = array<i64: 1, 32>}, {pipeline_mode = #tpu.pipeline_mode<synchronous>, transform_indices = @transform_16, window_bounds = array<i64: 16, 32>}]} {
    %c0 = arith.constant 0 : index
    %c0_0 = arith.constant 0 : index
    %0 = vector.load %arg1[%c0, %c0_0] : memref<16x32xf32, #tpu.memory_space<vmem>>, vector<16x32xf32>
    %c0_1 = arith.constant 0 : index
    %c0_2 = arith.constant 0 : index
    %1 = vector.load %arg2[%c0_1, %c0_2] : memref<16x16xf32, #tpu.memory_space<vmem>>, vector<16x16xf32>
    %2 = arith.truncf %0 : vector<16x32xf32> to vector<16x32xbf16>
    %c0_3 = arith.constant 0 : index
    %c0_4 = arith.constant 0 : index
    %3 = vector.load %arg5[%c0_3, %c0_4] : memref<32x96xbf16, #tpu.memory_space<vmem>>, vector<32x96xbf16>
    %cst = arith.constant dense<0.000000e+00> : vector<16x96xf32>
    %4 = tpu.matmul %2, %3, %cst {dimension_numbers = #tpu.dot_dimension_numbers<[1], [0], [0], [1], [0, 0, 1, 1], [], []>} : vector<16x32xbf16>, vector<32x96xbf16>, vector<16x96xf32> -> vector<16x96xf32>
    %c0_5 = arith.constant 0 : index
    %c0_6 = arith.constant 0 : index
    %5 = vector.load %arg6[%c0_5, %c0_6] : memref<1x96xf32, #tpu.memory_space<vmem>>, vector<1x96xf32>
    %6 = vector.broadcast %5 : vector<1x96xf32> to vector<16x96xf32>
    %7 = arith.addf %4, %6 : vector<16x96xf32>
    %8 = vector.extract_strided_slice %7 {offsets = [0, 0], sizes = [16, 32], strides = [1, 1]} : vector<16x96xf32> to vector<16x32xf32>
    %cst_7 = arith.constant 0.288675129 : f32
    %9 = vector.broadcast %cst_7 : f32 to vector<16x32xf32>
    %10 = arith.mulf %8, %9 : vector<16x32xf32>
    %11 = vector.extract_strided_slice %7 {offsets = [0, 32], sizes = [16, 32], strides = [1, 1]} : vector<16x96xf32> to vector<16x32xf32>
    %12 = vector.extract_strided_slice %7 {offsets = [0, 64], sizes = [16, 32], strides = [1, 1]} : vector<16x96xf32> to vector<16x32xf32>
    %c0_8 = arith.constant 0 : index
    %c0_9 = arith.constant 0 : index
    %c0_10 = arith.constant 0 : index
    %13 = vector.load %arg3[%c0_8, %c0_9, %c0_10] : memref<16x16x32xf32, #tpu.memory_space<vmem>>, vector<16x16x32xf32>
    %c0_11 = arith.constant 0 : index
    %c0_12 = arith.constant 0 : index
    %c0_13 = arith.constant 0 : index
    %14 = vector.load %arg4[%c0_11, %c0_12, %c0_13] : memref<16x16x32xf32, #tpu.memory_space<vmem>>, vector<16x16x32xf32>
    %15 = vector.extract_strided_slice %10 {offsets = [0, 0], sizes = [16, 8], strides = [1, 1]} : vector<16x32xf32> to vector<16x8xf32>
    %16 = vector.extract_strided_slice %11 {offsets = [0, 0], sizes = [16, 8], strides = [1, 1]} : vector<16x32xf32> to vector<16x8xf32>
    %17 = vector.extract_strided_slice %12 {offsets = [0, 0], sizes = [16, 8], strides = [1, 1]} : vector<16x32xf32> to vector<16x8xf32>
    "tpu.trace_start"() <{level = 10 : i32, message = "id,jd->ij"}> : () -> ()
    %cst_14 = arith.constant dense<0.000000e+00> : vector<16x16xf32>
    %18 = tpu.matmul %15, %16, %cst_14 {dimension_numbers = #tpu.dot_dimension_numbers<[1], [1], [0], [0], [0, 0, 1, 0], [], []>} : vector<16x8xf32>, vector<16x8xf32>, vector<16x16xf32> -> vector<16x16xf32>
    "tpu.trace_stop"() : () -> ()
    %19 = vector.shape_cast %15 : vector<16x8xf32> to vector<16x1x8xf32>
    %20 = vector.extract_strided_slice %13 {offsets = [0, 0, 0], sizes = [16, 16, 8], strides = [1, 1, 1]} : vector<16x16x32xf32> to vector<16x16x8xf32>
    %21 = vector.broadcast %19 : vector<16x1x8xf32> to vector<16x16x8xf32>
    %22 = arith.mulf %21, %20 : vector<16x16x8xf32>
    %cst_15 = arith.constant dense<0.000000e+00> : vector<16x16xf32>
    %23 = vector.multi_reduction <add>, %22, %cst_15 [2] : vector<16x16x8xf32> to vector<16x16xf32>
    %24 = vector.extract_strided_slice %14 {offsets = [0, 0, 0], sizes = [16, 16, 8], strides = [1, 1, 1]} : vector<16x16x32xf32> to vector<16x16x8xf32>
    %25 = vector.shape_cast %16 : vector<16x8xf32> to vector<1x16x8xf32>
    %26 = vector.broadcast %25 : vector<1x16x8xf32> to vector<16x16x8xf32>
    %27 = arith.mulf %24, %26 : vector<16x16x8xf32>
    %cst_16 = arith.constant dense<0.000000e+00> : vector<16x16xf32>
    %28 = vector.multi_reduction <add>, %27, %cst_16 [2] : vector<16x16x8xf32> to vector<16x16xf32>
    %29 = arith.addf %18, %23 : vector<16x16xf32>
    %30 = arith.addf %29, %28 : vector<16x16xf32>
    %31 = arith.addf %30, %1 : vector<16x16xf32>
    %cst_17 = arith.constant dense<0xFF800000> : vector<16xf32>
    %32 = vector.multi_reduction <maximumf>, %31, %cst_17 [1] : vector<16x16xf32> to vector<16xf32>
    %33 = vector.shape_cast %32 : vector<16xf32> to vector<16x1xf32>
    %34 = vector.broadcast %33 : vector<16x1xf32> to vector<16x16xf32>
    %35 = arith.subf %31, %34 : vector<16x16xf32>
    %36 = math.exp %35 : vector<16x16xf32>
    %cst_18 = arith.constant dense<0.000000e+00> : vector<16xf32>
    %37 = vector.multi_reduction <add>, %36, %cst_18 [1] : vector<16x16xf32> to vector<16xf32>
    %38 = vector.shape_cast %37 : vector<16xf32> to vector<16x1xf32>
    %39 = tpu.reciprocal %38 {approx = true} : vector<16x1xf32> -> vector<16x1xf32>
    %40 = vector.broadcast %39 : vector<16x1xf32> to vector<16x16xf32>
    %41 = arith.mulf %36, %40 : vector<16x16xf32>
    %cst_19 = arith.constant dense<0.000000e+00> : vector<16x8xf32>
    %42 = tpu.matmul %41, %17, %cst_19 {dimension_numbers = #tpu.dot_dimension_numbers<[1], [0], [0], [1], [0, 0, 1, 1], [], []>} : vector<16x16xf32>, vector<16x8xf32>, vector<16x8xf32> -> vector<16x8xf32>
    %43 = vector.extract_strided_slice %10 {offsets = [0, 8], sizes = [16, 8], strides = [1, 1]} : vector<16x32xf32> to vector<16x8xf32>
    %44 = vector.extract_strided_slice %11 {offsets = [0, 8], sizes = [16, 8], strides = [1, 1]} : vector<16x32xf32> to vector<16x8xf32>
    %45 = vector.extract_strided_slice %12 {offsets = [0, 8], sizes = [16, 8], strides = [1, 1]} : vector<16x32xf32> to vector<16x8xf32>
    "tpu.trace_start"() <{level = 10 : i32, message = "id,jd->ij"}> : () -> ()
    %cst_20 = arith.constant dense<0.000000e+00> : vector<16x16xf32>
    %46 = tpu.matmul %43, %44, %cst_20 {dimension_numbers = #tpu.dot_dimension_numbers<[1], [1], [0], [0], [0, 0, 1, 0], [], []>} : vector<16x8xf32>, vector<16x8xf32>, vector<16x16xf32> -> vector<16x16xf32>
    "tpu.trace_stop"() : () -> ()
    %47 = vector.shape_cast %43 : vector<16x8xf32> to vector<16x1x8xf32>
    %48 = vector.extract_strided_slice %13 {offsets = [0, 0, 8], sizes = [16, 16, 8], strides = [1, 1, 1]} : vector<16x16x32xf32> to vector<16x16x8xf32>
    %49 = vector.broadcast %47 : vector<16x1x8xf32> to vector<16x16x8xf32>
    %50 = arith.mulf %49, %48 : vector<16x16x8xf32>
    %cst_21 = arith.constant dense<0.000000e+00> : vector<16x16xf32>
    %51 = vector.multi_reduction <add>, %50, %cst_21 [2] : vector<16x16x8xf32> to vector<16x16xf32>
    %52 = vector.extract_strided_slice %14 {offsets = [0, 0, 8], sizes = [16, 16, 8], strides = [1, 1, 1]} : vector<16x16x32xf32> to vector<16x16x8xf32>
    %53 = vector.shape_cast %44 : vector<16x8xf32> to vector<1x16x8xf32>
    %54 = vector.broadcast %53 : vector<1x16x8xf32> to vector<16x16x8xf32>
    %55 = arith.mulf %52, %54 : vector<16x16x8xf32>
    %cst_22 = arith.constant dense<0.000000e+00> : vector<16x16xf32>
    %56 = vector.multi_reduction <add>, %55, %cst_22 [2] : vector<16x16x8xf32> to vector<16x16xf32>
    %57 = arith.addf %46, %51 : vector<16x16xf32>
    %58 = arith.addf %57, %56 : vector<16x16xf32>
    %59 = arith.addf %58, %1 : vector<16x16xf32>
    %cst_23 = arith.constant dense<0xFF800000> : vector<16xf32>
    %60 = vector.multi_reduction <maximumf>, %59, %cst_23 [1] : vector<16x16xf32> to vector<16xf32>
    %61 = vector.shape_cast %60 : vector<16xf32> to vector<16x1xf32>
    %62 = vector.broadcast %61 : vector<16x1xf32> to vector<16x16xf32>
    %63 = arith.subf %59, %62 : vector<16x16xf32>
    %64 = math.exp %63 : vector<16x16xf32>
    %cst_24 = arith.constant dense<0.000000e+00> : vector<16xf32>
    %65 = vector.multi_reduction <add>, %64, %cst_24 [1] : vector<16x16xf32> to vector<16xf32>
    %66 = vector.shape_cast %65 : vector<16xf32> to vector<16x1xf32>
    %67 = tpu.reciprocal %66 {approx = true} : vector<16x1xf32> -> vector<16x1xf32>
    %68 = vector.broadcast %67 : vector<16x1xf32> to vector<16x16xf32>
    %69 = arith.mulf %64, %68 : vector<16x16xf32>
    %cst_25 = arith.constant dense<0.000000e+00> : vector<16x8xf32>
    %70 = tpu.matmul %69, %45, %cst_25 {dimension_numbers = #tpu.dot_dimension_numbers<[1], [0], [0], [1], [0, 0, 1, 1], [], []>} : vector<16x16xf32>, vector<16x8xf32>, vector<16x8xf32> -> vector<16x8xf32>
    %71 = vector.extract_strided_slice %10 {offsets = [0, 16], sizes = [16, 8], strides = [1, 1]} : vector<16x32xf32> to vector<16x8xf32>
    %72 = vector.extract_strided_slice %11 {offsets = [0, 16], sizes = [16, 8], strides = [1, 1]} : vector<16x32xf32> to vector<16x8xf32>
    %73 = vector.extract_strided_slice %12 {offsets = [0, 16], sizes = [16, 8], strides = [1, 1]} : vector<16x32xf32> to vector<16x8xf32>
    "tpu.trace_start"() <{level = 10 : i32, message = "id,jd->ij"}> : () -> ()
    %cst_26 = arith.constant dense<0.000000e+00> : vector<16x16xf32>
    %74 = tpu.matmul %71, %72, %cst_26 {dimension_numbers = #tpu.dot_dimension_numbers<[1], [1], [0], [0], [0, 0, 1, 0], [], []>} : vector<16x8xf32>, vector<16x8xf32>, vector<16x16xf32> -> vector<16x16xf32>
    "tpu.trace_stop"() : () -> ()
    %75 = vector.shape_cast %71 : vector<16x8xf32> to vector<16x1x8xf32>
    %76 = vector.extract_strided_slice %13 {offsets = [0, 0, 16], sizes = [16, 16, 8], strides = [1, 1, 1]} : vector<16x16x32xf32> to vector<16x16x8xf32>
    %77 = vector.broadcast %75 : vector<16x1x8xf32> to vector<16x16x8xf32>
    %78 = arith.mulf %77, %76 : vector<16x16x8xf32>
    %cst_27 = arith.constant dense<0.000000e+00> : vector<16x16xf32>
    %79 = vector.multi_reduction <add>, %78, %cst_27 [2] : vector<16x16x8xf32> to vector<16x16xf32>
    %80 = vector.extract_strided_slice %14 {offsets = [0, 0, 16], sizes = [16, 16, 8], strides = [1, 1, 1]} : vector<16x16x32xf32> to vector<16x16x8xf32>
    %81 = vector.shape_cast %72 : vector<16x8xf32> to vector<1x16x8xf32>
    %82 = vector.broadcast %81 : vector<1x16x8xf32> to vector<16x16x8xf32>
    %83 = arith.mulf %80, %82 : vector<16x16x8xf32>
    %cst_28 = arith.constant dense<0.000000e+00> : vector<16x16xf32>
    %84 = vector.multi_reduction <add>, %83, %cst_28 [2] : vector<16x16x8xf32> to vector<16x16xf32>
    %85 = arith.addf %74, %79 : vector<16x16xf32>
    %86 = arith.addf %85, %84 : vector<16x16xf32>
    %87 = arith.addf %86, %1 : vector<16x16xf32>
    %cst_29 = arith.constant dense<0xFF800000> : vector<16xf32>
    %88 = vector.multi_reduction <maximumf>, %87, %cst_29 [1] : vector<16x16xf32> to vector<16xf32>
    %89 = vector.shape_cast %88 : vector<16xf32> to vector<16x1xf32>
    %90 = vector.broadcast %89 : vector<16x1xf32> to vector<16x16xf32>
    %91 = arith.subf %87, %90 : vector<16x16xf32>
    %92 = math.exp %91 : vector<16x16xf32>
    %cst_30 = arith.constant dense<0.000000e+00> : vector<16xf32>
    %93 = vector.multi_reduction <add>, %92, %cst_30 [1] : vector<16x16xf32> to vector<16xf32>
    %94 = vector.shape_cast %93 : vector<16xf32> to vector<16x1xf32>
    %95 = tpu.reciprocal %94 {approx = true} : vector<16x1xf32> -> vector<16x1xf32>
    %96 = vector.broadcast %95 : vector<16x1xf32> to vector<16x16xf32>
    %97 = arith.mulf %92, %96 : vector<16x16xf32>
    %cst_31 = arith.constant dense<0.000000e+00> : vector<16x8xf32>
    %98 = tpu.matmul %97, %73, %cst_31 {dimension_numbers = #tpu.dot_dimension_numbers<[1], [0], [0], [1], [0, 0, 1, 1], [], []>} : vector<16x16xf32>, vector<16x8xf32>, vector<16x8xf32> -> vector<16x8xf32>
    %99 = vector.extract_strided_slice %10 {offsets = [0, 24], sizes = [16, 8], strides = [1, 1]} : vector<16x32xf32> to vector<16x8xf32>
    %100 = vector.extract_strided_slice %11 {offsets = [0, 24], sizes = [16, 8], strides = [1, 1]} : vector<16x32xf32> to vector<16x8xf32>
    %101 = vector.extract_strided_slice %12 {offsets = [0, 24], sizes = [16, 8], strides = [1, 1]} : vector<16x32xf32> to vector<16x8xf32>
    "tpu.trace_start"() <{level = 10 : i32, message = "id,jd->ij"}> : () -> ()
    %cst_32 = arith.constant dense<0.000000e+00> : vector<16x16xf32>
    %102 = tpu.matmul %99, %100, %cst_32 {dimension_numbers = #tpu.dot_dimension_numbers<[1], [1], [0], [0], [0, 0, 1, 0], [], []>} : vector<16x8xf32>, vector<16x8xf32>, vector<16x16xf32> -> vector<16x16xf32>
    "tpu.trace_stop"() : () -> ()
    %103 = vector.shape_cast %99 : vector<16x8xf32> to vector<16x1x8xf32>
    %104 = vector.extract_strided_slice %13 {offsets = [0, 0, 24], sizes = [16, 16, 8], strides = [1, 1, 1]} : vector<16x16x32xf32> to vector<16x16x8xf32>
    %105 = vector.broadcast %103 : vector<16x1x8xf32> to vector<16x16x8xf32>
    %106 = arith.mulf %105, %104 : vector<16x16x8xf32>
    %cst_33 = arith.constant dense<0.000000e+00> : vector<16x16xf32>
    %107 = vector.multi_reduction <add>, %106, %cst_33 [2] : vector<16x16x8xf32> to vector<16x16xf32>
    %108 = vector.extract_strided_slice %14 {offsets = [0, 0, 24], sizes = [16, 16, 8], strides = [1, 1, 1]} : vector<16x16x32xf32> to vector<16x16x8xf32>
    %109 = vector.shape_cast %100 : vector<16x8xf32> to vector<1x16x8xf32>
    %110 = vector.broadcast %109 : vector<1x16x8xf32> to vector<16x16x8xf32>
    %111 = arith.mulf %108, %110 : vector<16x16x8xf32>
    %cst_34 = arith.constant dense<0.000000e+00> : vector<16x16xf32>
    %112 = vector.multi_reduction <add>, %111, %cst_34 [2] : vector<16x16x8xf32> to vector<16x16xf32>
    %113 = arith.addf %102, %107 : vector<16x16xf32>
    %114 = arith.addf %113, %112 : vector<16x16xf32>
    %115 = arith.addf %114, %1 : vector<16x16xf32>
    %cst_35 = arith.constant dense<0xFF800000> : vector<16xf32>
    %116 = vector.multi_reduction <maximumf>, %115, %cst_35 [1] : vector<16x16xf32> to vector<16xf32>
    %117 = vector.shape_cast %116 : vector<16xf32> to vector<16x1xf32>
    %118 = vector.broadcast %117 : vector<16x1xf32> to vector<16x16xf32>
    %119 = arith.subf %115, %118 : vector<16x16xf32>
    %120 = math.exp %119 : vector<16x16xf32>
    %cst_36 = arith.constant dense<0.000000e+00> : vector<16xf32>
    %121 = vector.multi_reduction <add>, %120, %cst_36 [1] : vector<16x16xf32> to vector<16xf32>
    %122 = vector.shape_cast %121 : vector<16xf32> to vector<16x1xf32>
    %123 = tpu.reciprocal %122 {approx = true} : vector<16x1xf32> -> vector<16x1xf32>
    %124 = vector.broadcast %123 : vector<16x1xf32> to vector<16x16xf32>
    %125 = arith.mulf %120, %124 : vector<16x16xf32>
    %cst_37 = arith.constant dense<0.000000e+00> : vector<16x8xf32>
    %126 = tpu.matmul %125, %101, %cst_37 {dimension_numbers = #tpu.dot_dimension_numbers<[1], [0], [0], [1], [0, 0, 1, 1], [], []>} : vector<16x16xf32>, vector<16x8xf32>, vector<16x8xf32> -> vector<16x8xf32>
    %127 = tpu.concatenate %42, %70, %98, %126 in 1 : vector<16x8xf32>, vector<16x8xf32>, vector<16x8xf32>, vector<16x8xf32> -> vector<16x32xf32>
    %128 = arith.truncf %127 : vector<16x32xf32> to vector<16x32xbf16>
    %c0_38 = arith.constant 0 : index
    %c0_39 = arith.constant 0 : index
    %129 = vector.load %arg7[%c0_38, %c0_39] : memref<32x32xbf16, #tpu.memory_space<vmem>>, vector<32x32xbf16>
    %cst_40 = arith.constant dense<0.000000e+00> : vector<16x32xf32>
    %130 = tpu.matmul %128, %129, %cst_40 {dimension_numbers = #tpu.dot_dimension_numbers<[1], [0], [0], [1], [0, 0, 1, 1], [], []>} : vector<16x32xbf16>, vector<32x32xbf16>, vector<16x32xf32> -> vector<16x32xf32>
    %c0_41 = arith.constant 0 : index
    %c0_42 = arith.constant 0 : index
    %131 = vector.load %arg8[%c0_41, %c0_42] : memref<1x32xf32, #tpu.memory_space<vmem>>, vector<1x32xf32>
    %132 = vector.broadcast %131 : vector<1x32xf32> to vector<16x32xf32>
    %133 = arith.addf %130, %132 : vector<16x32xf32>
    %134 = arith.addf %0, %133 : vector<16x32xf32>
    %cst_43 = arith.constant dense<0.000000e+00> : vector<16xf32>
    %135 = vector.multi_reduction <add>, %134, %cst_43 [1] : vector<16x32xf32> to vector<16xf32>
    %136 = vector.shape_cast %135 : vector<16xf32> to vector<16x1xf32>
    %cst_44 = arith.constant 3.200000e+01 : f32
    %137 = vector.broadcast %cst_44 : f32 to vector<16x1xf32>
    %138 = arith.divf %136, %137 : vector<16x1xf32>
    %139 = vector.broadcast %138 : vector<16x1xf32> to vector<16x32xf32>
    %140 = arith.subf %134, %139 : vector<16x32xf32>
    %141 = arith.mulf %140, %140 : vector<16x32xf32>
    %cst_45 = arith.constant dense<0.000000e+00> : vector<16xf32>
    %142 = vector.multi_reduction <add>, %141, %cst_45 [1] : vector<16x32xf32> to vector<16xf32>
    %143 = vector.shape_cast %142 : vector<16xf32> to vector<16x1xf32>
    %cst_46 = arith.constant 3.200000e+01 : f32
    %144 = vector.broadcast %cst_46 : f32 to vector<16x1xf32>
    %145 = arith.divf %143, %144 : vector<16x1xf32>
    %146 = vector.broadcast %138 : vector<16x1xf32> to vector<16x32xf32>
    %147 = arith.subf %134, %146 : vector<16x32xf32>
    %cst_47 = arith.constant 9.99999996E-13 : f32
    %148 = vector.broadcast %cst_47 : f32 to vector<16x1xf32>
    %149 = arith.addf %145, %148 : vector<16x1xf32>
    %150 = math.rsqrt %149 : vector<16x1xf32>
    %151 = vector.broadcast %150 : vector<16x1xf32> to vector<16x32xf32>
    %152 = arith.mulf %147, %151 : vector<16x32xf32>
    %c0_48 = arith.constant 0 : index
    %c0_49 = arith.constant 0 : index
    %153 = vector.load %arg9[%c0_48, %c0_49] : memref<1x32xf32, #tpu.memory_space<vmem>>, vector<1x32xf32>
    %154 = vector.broadcast %153 : vector<1x32xf32> to vector<16x32xf32>
    %155 = arith.mulf %152, %154 : vector<16x32xf32>
    %c0_50 = arith.constant 0 : index
    %c0_51 = arith.constant 0 : index
    %156 = vector.load %arg10[%c0_50, %c0_51] : memref<1x32xf32, #tpu.memory_space<vmem>>, vector<1x32xf32>
    %157 = vector.broadcast %156 : vector<1x32xf32> to vector<16x32xf32>
    %158 = arith.addf %155, %157 : vector<16x32xf32>
    %159 = arith.truncf %158 : vector<16x32xf32> to vector<16x32xbf16>
    %c0_52 = arith.constant 0 : index
    %c0_53 = arith.constant 0 : index
    %160 = vector.load %arg11[%c0_52, %c0_53] : memref<32x64xbf16, #tpu.memory_space<vmem>>, vector<32x64xbf16>
    %cst_54 = arith.constant dense<0.000000e+00> : vector<16x64xf32>
    %161 = tpu.matmul %159, %160, %cst_54 {dimension_numbers = #tpu.dot_dimension_numbers<[1], [0], [0], [1], [0, 0, 1, 1], [], []>} : vector<16x32xbf16>, vector<32x64xbf16>, vector<16x64xf32> -> vector<16x64xf32>
    %c0_55 = arith.constant 0 : index
    %c0_56 = arith.constant 0 : index
    %162 = vector.load %arg12[%c0_55, %c0_56] : memref<1x64xf32, #tpu.memory_space<vmem>>, vector<1x64xf32>
    %163 = vector.broadcast %162 : vector<1x64xf32> to vector<16x64xf32>
    %164 = arith.addf %161, %163 : vector<16x64xf32>
    %cst_57 = arith.constant 5.000000e-01 : f32
    %165 = vector.broadcast %cst_57 : f32 to vector<16x64xf32>
    %166 = arith.mulf %165, %164 : vector<16x64xf32>
    %cst_58 = arith.constant 0.707106769 : f32
    %167 = vector.broadcast %cst_58 : f32 to vector<16x64xf32>
    %168 = arith.mulf %164, %167 : vector<16x64xf32>
    %cst_59 = arith.constant 0.000000e+00 : f32
    %169 = vector.broadcast %cst_59 : f32 to vector<16x64xf32>
    %170 = arith.cmpf oge, %168, %169 : vector<16x64xf32>
    %cst_60 = arith.constant 1.000000e+00 : f32
    %cst_61 = arith.constant -1.000000e+00 : f32
    %171 = vector.broadcast %cst_60 : f32 to vector<16x64xf32>
    %172 = vector.broadcast %cst_61 : f32 to vector<16x64xf32>
    %173 = arith.select %170, %171, %172 : vector<16x64xi1>, vector<16x64xf32>
    %174 = math.absf %168 : vector<16x64xf32>
    %cst_62 = arith.constant 0.327591091 : f32
    %175 = vector.broadcast %cst_62 : f32 to vector<16x64xf32>
    %176 = arith.mulf %175, %174 : vector<16x64xf32>
    %cst_63 = arith.constant 1.000000e+00 : f32
    %177 = vector.broadcast %cst_63 : f32 to vector<16x64xf32>
    %178 = arith.addf %177, %176 : vector<16x64xf32>
    %cst_64 = arith.constant 1.000000e+00 : f32
    %179 = vector.broadcast %cst_64 : f32 to vector<16x64xf32>
    %180 = arith.divf %179, %178 : vector<16x64xf32>
    %cst_65 = arith.constant 1.06140542 : f32
    %181 = vector.broadcast %cst_65 : f32 to vector<16x64xf32>
    %182 = arith.mulf %181, %180 : vector<16x64xf32>
    %cst_66 = arith.constant -1.45315206 : f32
    %183 = vector.broadcast %cst_66 : f32 to vector<16x64xf32>
    %184 = arith.addf %182, %183 : vector<16x64xf32>
    %185 = arith.mulf %184, %180 : vector<16x64xf32>
    %cst_67 = arith.constant 1.42141378 : f32
    %186 = vector.broadcast %cst_67 : f32 to vector<16x64xf32>
    %187 = arith.addf %185, %186 : vector<16x64xf32>
    %188 = arith.mulf %187, %180 : vector<16x64xf32>
    %cst_68 = arith.constant -0.284496725 : f32
    %189 = vector.broadcast %cst_68 : f32 to vector<16x64xf32>
    %190 = arith.addf %188, %189 : vector<16x64xf32>
    %191 = arith.mulf %190, %180 : vector<16x64xf32>
    %cst_69 = arith.constant 0.254829586 : f32
    %192 = vector.broadcast %cst_69 : f32 to vector<16x64xf32>
    %193 = arith.addf %191, %192 : vector<16x64xf32>
    %194 = arith.mulf %193, %180 : vector<16x64xf32>
    %cst_70 = arith.constant 0.000000e+00 : f32
    %195 = vector.broadcast %cst_70 : f32 to vector<16x64xf32>
    %196 = arith.subf %195, %174 : vector<16x64xf32>
    %197 = arith.mulf %196, %174 : vector<16x64xf32>
    %198 = math.exp %197 : vector<16x64xf32>
    %199 = arith.mulf %194, %198 : vector<16x64xf32>
    %cst_71 = arith.constant 1.000000e+00 : f32
    %200 = vector.broadcast %cst_71 : f32 to vector<16x64xf32>
    %201 = arith.subf %200, %199 : vector<16x64xf32>
    %202 = arith.mulf %173, %201 : vector<16x64xf32>
    %cst_72 = arith.constant 1.000000e+00 : f32
    %203 = vector.broadcast %cst_72 : f32 to vector<16x64xf32>
    %204 = arith.addf %203, %202 : vector<16x64xf32>
    %205 = arith.mulf %166, %204 : vector<16x64xf32>
    %206 = arith.truncf %205 : vector<16x64xf32> to vector<16x64xbf16>
    %c0_73 = arith.constant 0 : index
    %c0_74 = arith.constant 0 : index
    %207 = vector.load %arg13[%c0_73, %c0_74] : memref<64x32xbf16, #tpu.memory_space<vmem>>, vector<64x32xbf16>
    %cst_75 = arith.constant dense<0.000000e+00> : vector<16x32xf32>
    %208 = tpu.matmul %206, %207, %cst_75 {dimension_numbers = #tpu.dot_dimension_numbers<[1], [0], [0], [1], [0, 0, 1, 1], [], []>} : vector<16x64xbf16>, vector<64x32xbf16>, vector<16x32xf32> -> vector<16x32xf32>
    %c0_76 = arith.constant 0 : index
    %c0_77 = arith.constant 0 : index
    %209 = vector.load %arg14[%c0_76, %c0_77] : memref<1x32xf32, #tpu.memory_space<vmem>>, vector<1x32xf32>
    %210 = vector.broadcast %209 : vector<1x32xf32> to vector<16x32xf32>
    %211 = arith.addf %208, %210 : vector<16x32xf32>
    %212 = arith.addf %158, %211 : vector<16x32xf32>
    %cst_78 = arith.constant dense<0.000000e+00> : vector<16xf32>
    %213 = vector.multi_reduction <add>, %212, %cst_78 [1] : vector<16x32xf32> to vector<16xf32>
    %214 = vector.shape_cast %213 : vector<16xf32> to vector<16x1xf32>
    %cst_79 = arith.constant 3.200000e+01 : f32
    %215 = vector.broadcast %cst_79 : f32 to vector<16x1xf32>
    %216 = arith.divf %214, %215 : vector<16x1xf32>
    %217 = vector.broadcast %216 : vector<16x1xf32> to vector<16x32xf32>
    %218 = arith.subf %212, %217 : vector<16x32xf32>
    %219 = arith.mulf %218, %218 : vector<16x32xf32>
    %cst_80 = arith.constant dense<0.000000e+00> : vector<16xf32>
    %220 = vector.multi_reduction <add>, %219, %cst_80 [1] : vector<16x32xf32> to vector<16xf32>
    %221 = vector.shape_cast %220 : vector<16xf32> to vector<16x1xf32>
    %cst_81 = arith.constant 3.200000e+01 : f32
    %222 = vector.broadcast %cst_81 : f32 to vector<16x1xf32>
    %223 = arith.divf %221, %222 : vector<16x1xf32>
    %224 = vector.broadcast %216 : vector<16x1xf32> to vector<16x32xf32>
    %225 = arith.subf %212, %224 : vector<16x32xf32>
    %cst_82 = arith.constant 9.99999996E-13 : f32
    %226 = vector.broadcast %cst_82 : f32 to vector<16x1xf32>
    %227 = arith.addf %223, %226 : vector<16x1xf32>
    %228 = math.rsqrt %227 : vector<16x1xf32>
    %229 = vector.broadcast %228 : vector<16x1xf32> to vector<16x32xf32>
    %230 = arith.mulf %225, %229 : vector<16x32xf32>
    %c0_83 = arith.constant 0 : index
    %c0_84 = arith.constant 0 : index
    %231 = vector.load %arg15[%c0_83, %c0_84] : memref<1x32xf32, #tpu.memory_space<vmem>>, vector<1x32xf32>
    %232 = vector.broadcast %231 : vector<1x32xf32> to vector<16x32xf32>
    %233 = arith.mulf %230, %232 : vector<16x32xf32>
    %c0_85 = arith.constant 0 : index
    %c0_86 = arith.constant 0 : index
    %234 = vector.load %arg16[%c0_85, %c0_86] : memref<1x32xf32, #tpu.memory_space<vmem>>, vector<1x32xf32>
    %235 = vector.broadcast %234 : vector<1x32xf32> to vector<16x32xf32>
    %236 = arith.addf %233, %235 : vector<16x32xf32>
    %c0_87 = arith.constant 0 : index
    %c0_88 = arith.constant 0 : index
    %237 = vector.load %arg17[%c0_87, %c0_88] : memref<16x32xf32, #tpu.memory_space<vmem>>, vector<16x32xf32>
    tpu.vector_store %arg17[%c0_87, %c0_88], %236 {strides = array<i32>} : memref<16x32xf32, #tpu.memory_space<vmem>>, vector<16x32xf32>,
    return
  }
  func.func @transform_0(%arg0: i32) -> (i32, i32) {
    %c0_i32 = arith.constant 0 : i32
    %c0_i32_0 = arith.constant 0 : i32
    %c0_i32_1 = arith.constant 0 : i32
    return %c0_i32, %c0_i32_0 : i32, i32
  }
  func.func @transform_1(%arg0: i32) -> (i32, i32) {
    %c0_i32 = arith.constant 0 : i32
    %c0_i32_0 = arith.constant 0 : i32
    %c0_i32_1 = arith.constant 0 : i32
    return %c0_i32, %c0_i32_0 : i32, i32
  }
  func.func @transform_2(%arg0: i32) -> (i32, i32, i32) {
    %c0_i32 = arith.constant 0 : i32
    %c0_i32_0 = arith.constant 0 : i32
    %c0_i32_1 = arith.constant 0 : i32
    %c0_i32_2 = arith.constant 0 : i32
    return %c0_i32, %c0_i32_0, %c0_i32_1 : i32, i32, i32
  }
  func.func @transform_3(%arg0: i32) -> (i32, i32, i32) {
    %c0_i32 = arith.constant 0 : i32
    %c0_i32_0 = arith.constant 0 : i32
    %c0_i32_1 = arith.constant 0 : i32
    %c0_i32_2 = arith.constant 0 : i32
    return %c0_i32, %c0_i32_0, %c0_i32_1 : i32, i32, i32
  }
  func.func @transform_4(%arg0: i32) -> (i32, i32) {
    %c0_i32 = arith.constant 0 : i32
    %c0_i32_0 = arith.constant 0 : i32
    %c0_i32_1 = arith.constant 0 : i32
    return %c0_i32, %c0_i32_0 : i32, i32
  }
  func.func @transform_5(%arg0: i32) -> (i32, i32) {
    %c0_i32 = arith.constant 0 : i32
    %c0_i32_0 = arith.constant 0 : i32
    %c0_i32_1 = arith.constant 0 : i32
    return %c0_i32, %c0_i32_0 : i32, i32
  }
  func.func @transform_6(%arg0: i32) -> (i32, i32) {
    %c0_i32 = arith.constant 0 : i32
    %c0_i32_0 = arith.constant 0 : i32
    %c0_i32_1 = arith.constant 0 : i32
    return %c0_i32, %c0_i32_0 : i32, i32
  }
  func.func @transform_7(%arg0: i32) -> (i32, i32) {
    %c0_i32 = arith.constant 0 : i32
    %c0_i32_0 = arith.constant 0 : i32
    %c0_i32_1 = arith.constant 0 : i32
    return %c0_i32, %c0_i32_0 : i32, i32
  }
  func.func @transform_8(%arg0: i32) -> (i32, i32) {
    %c0_i32 = arith.constant 0 : i32
    %c0_i32_0 = arith.constant 0 : i32
    %c0_i32_1 = arith.constant 0 : i32
    return %c0_i32, %c0_i32_0 : i32, i32
  }
  func.func @transform_9(%arg0: i32) -> (i32, i32) {
    %c0_i32 = arith.constant 0 : i32
    %c0_i32_0 = arith.constant 0 : i32
    %c0_i32_1 = arith.constant 0 : i32
    return %c0_i32, %c0_i32_0 : i32, i32
  }
  func.func @transform_10(%arg0: i32) -> (i32, i32) {
    %c0_i32 = arith.constant 0 : i32
    %c0_i32_0 = arith.constant 0 : i32
    %c0_i32_1 = arith.constant 0 : i32
    return %c0_i32, %c0_i32_0 : i32, i32
  }
  func.func @transform_11(%arg0: i32) -> (i32, i32) {
    %c0_i32 = arith.constant 0 : i32
    %c0_i32_0 = arith.constant 0 : i32
    %c0_i32_1 = arith.constant 0 : i32
    return %c0_i32, %c0_i32_0 : i32, i32
  }
  func.func @transform_12(%arg0: i32) -> (i32, i32) {
    %c0_i32 = arith.constant 0 : i32
    %c0_i32_0 = arith.constant 0 : i32
    %c0_i32_1 = arith.constant 0 : i32
    return %c0_i32, %c0_i32_0 : i32, i32
  }
  func.func @transform_13(%arg0: i32) -> (i32, i32) {
    %c0_i32 = arith.constant 0 : i32
    %c0_i32_0 = arith.constant 0 : i32
    %c0_i32_1 = arith.constant 0 : i32
    return %c0_i32, %c0_i32_0 : i32, i32
  }
  func.func @transform_14(%arg0: i32) -> (i32, i32) {
    %c0_i32 = arith.constant 0 : i32
    %c0_i32_0 = arith.constant 0 : i32
    %c0_i32_1 = arith.constant 0 : i32
    return %c0_i32, %c0_i32_0 : i32, i32
  }
  func.func @transform_15(%arg0: i32) -> (i32, i32) {
    %c0_i32 = arith.constant 0 : i32
    %c0_i32_0 = arith.constant 0 : i32
    %c0_i32_1 = arith.constant 0 : i32
    return %c0_i32, %c0_i32_0 : i32, i32
  }
  func.func @transform_16(%arg0: i32) -> (i32, i32) {
    %c0_i32 = arith.constant 0 : i32
    %c0_i32_0 = arith.constant 0 : i32
    %c0_i32_1 = arith.constant 0 : i32
    return %c0_i32, %c0_i32_0 : i32, i32
  }
}

</mosaic_0001>

<bundles_post_ra>
// kernel: tpu_custom_call.1
= control target key start
LH: loop header
LB: loop body
LE: loop exit
PB: predicated region body
PF: predicated region fallthrough
CT: control target
= control target key end

     0   :  { %s7918_s0 = inlined_call_operand.vmem [shape: f32[16,32], index: 0, kind: input, shape index: {}]   ;;  %s7919_s1 = inlined_call_operand.vmem [shape: f32[16,16], index: 1, kind: input, shape index: {}]   ;;  %s7920_s2 = inlined_call_operand.hbm [shape: f32[16,16,32], index: 2, kind: input, shape index: {}]   ;;  %s7921_s3 = inlined_call_operand.hbm [shape: f32[16,16,32], index: 3, kind: input, shape index: {}]   ;;  %s7922_s4 = inlined_call_operand.vmem [shape: bf16[32,96], index: 4, kind: input, shape index: {}]   ;;  %s7923_s5 = inlined_call_operand.vmem [shape: f32[1,96], index: 5, kind: input, shape index: {}]   ;;  %s7924_s6 = inlined_call_operand.hbm [shape: bf16[32,32], index: 6, kind: input, shape index: {}]   ;;  %s7925_s7 = inlined_call_operand.vmem [shape: f32[1,32], index: 7, kind: input, shape index: {}]   ;;  %s7926_s8 = inlined_call_operand.vmem [shape: f32[1,32], index: 8, kind: input, shape index: {}]   ;;  %s7927_s9 = inlined_call_operand.vmem [shape: f32[1,32], index: 9, kind: input, shape index: {}]   ;;  %s7928_s10 = inlined_call_operand.hbm [shape: bf16[32,64], index: 10, kind: input, shape index: {}]   ;;  %s7929_s11 = inlined_call_operand.vmem [shape: f32[1,64], index: 11, kind: input, shape index: {}]   ;;  %s7930_s12 = inlined_call_operand.vmem [shape: bf16[64,32], index: 12, kind: input, shape index: {}]   ;;  %s7931_s13 = inlined_call_operand.vmem [shape: f32[1,32], index: 13, kind: input, shape index: {}]   ;;  %s7932_s14 = inlined_call_operand.vmem [shape: f32[1,32], index: 14, kind: input, shape index: {}]   ;;  %s7933_s15 = inlined_call_operand.vmem [shape: f32[1,32], index: 15, kind: input, shape index: {}]   ;;  %s7934_s16 = inlined_call_operand.hbm [shape: f32[16,32], index: 16, kind: output, shape index: {}]  }
   0x1   :  { %8019 = sst [smem:[#allocation171_spill]] %s7918_s0 }
   0x2   :  { %21 = vsyncpa [#allocation3], 0 }
   0x3   :  { %22 = vsyncpa [#allocation6], 0 }
   0x4   :  { %23 = vsyncpa [#allocation9], 0 }
   0x5   :  { %24 = vsyncpa [#allocation4], 0  ;;  %s5080_s21 = smov [#allocation5]   ;;  %s5081_s23 = smov [#allocation2]  }
   0x6   :  { %s46_s22 = sshll.u32 %s5080_s21, 4  ;;  %s34_s24 = sshll.u32 %s5081_s23, 4  ;;  %s47_s22 = int_to_ptr.vmem [resolvable:$true] %s46_s22  ;;  %s35_s24 = int_to_ptr.vmem [resolvable:$true] %s34_s24 }
   0x7   :  { %s4980_s25 = scalar_lea.vmem %s47_s22, 4096  ;;  %p4985_p1 = scmp.lt.s32.totalorder %s47_s22, %s47_s22 }
   0x8   :  { %p4981_p0 = scmp.ne.s32.totalorder %s47_s22, %s4980_s25  ;;  %p4986_p2 = scmp.lt.s32.totalorder %s4980_s25, %s4980_s25 }
   0xa   :  { %p4987_p3 = por %p4986_p2, %p4985_p1 }
   0xc   :  { %p4988_p4 = pnand %p4987_p3, %p4981_p0 }
   0xe   :  { %4991 = shalt.err (!%p4988_p4)
}
   0xf   :  { %s5082_s26 = smov 128   ;;  %s5083_s27 = smov 8  }
  0x10   :  { %52 = dma.hbm_to_vmem [thread:$0]  %s7921_s3, 4096, %s47_s22, [#allocation6], %s5082_s26, %s5082_s26, %s5083_s27  }
  0x11   :  { %s5000_s30 = scalar_lea.vmem %s35_s24, 4096  ;;  %p5005_p6 = scmp.lt.s32.totalorder %s35_s24, %s35_s24 }
  0x12   :  { %p5001_p5 = scmp.ne.s32.totalorder %s35_s24, %s5000_s30  ;;  %p5006_p7 = scmp.lt.s32.totalorder %s5000_s30, %s5000_s30 }
  0x14   :  { %p5007_p8 = por %p5006_p7, %p5005_p6 }
  0x16   :  { %p5008_p9 = pnand %p5007_p8, %p5001_p5 }
  0x18   :  { %5011 = shalt.err (!%p5008_p9)
}
  0x19   :  { %40 = dma.hbm_to_vmem [thread:$0]  %s7920_s2, 4096, %s35_s24, [#allocation3], %s5082_s26, %s5082_s26, %s5083_s27  }
  0x1a   :  { %s5084_s18 = smov [#allocation7]  }
  0x1b   :  { %s62_s19 = sshll.u32 %s5084_s18, 4  ;;  %s63_s19 = int_to_ptr.vmem [resolvable:$true] %s62_s19 }
  0x1c   :  { %s5020_s20 = scalar_lea.vmem %s63_s19, 256  ;;  %p5025_p11 = scmp.lt.s32.totalorder %s63_s19, %s63_s19 }
  0x1d   :  { %p5021_p10 = scmp.ne.s32.totalorder %s63_s19, %s5020_s20  ;;  %p5026_p12 = scmp.lt.s32.totalorder %s5020_s20, %s5020_s20 }
  0x1f   :  { %p5027_p13 = por %p5026_p12, %p5025_p11 }
  0x21   :  { %p5028_p0 = pnand %p5027_p13, %p5021_p10 }
  0x23   :  { %5031 = shalt.err (!%p5028_p0)
}
  0x24   :  { %s5085_s3 = smov 64   ;;  %s5086_s21 = smov 4  }
  0x25   :  { %68 = dma.hbm_to_vmem [thread:$0]  %s7924_s6, 256, %s63_s19, [#allocation6], %s5085_s3, %s5085_s3, %s5086_s21  }
  0x26   :  { %s5087_s25 = smov [#allocation8]  }
  0x27   :  { %s80_s2 = sshll.u32 %s5087_s25, 4  ;;  %s81_s2 = int_to_ptr.vmem [resolvable:$true] %s80_s2 }
  0x28   :  { %s5040_s24 = scalar_lea.vmem %s81_s2, 256  ;;  %p5045_p2 = scmp.lt.s32.totalorder %s81_s2, %s81_s2 }
  0x29   :  { %p5041_p1 = scmp.ne.s32.totalorder %s81_s2, %s5040_s24  ;;  %p5046_p3 = scmp.lt.s32.totalorder %s5040_s24, %s5040_s24 }
  0x2b   :  { %p5047_p4 = por %p5046_p3, %p5045_p2 }
  0x2d   :  { %p5048_p5 = pnand %p5047_p4, %p5041_p1 }
  0x2f   :  { %5051 = shalt.err (!%p5048_p5)
}
  0x30   :  { %86 = dma.hbm_to_vmem [thread:$0]  %s7928_s10, 256, %s81_s2, [#allocation9], %s5085_s3, %s5085_s3, %s5086_s21  }
  0x31   :  { %5072 = dma.done.wait [#allocation3], 4096  }
  0x32   :  { %5073 = vsyncadd [#allocation3], 4294963200 }
  0x33   :  { %5074 = dma.done.wait [#allocation6], 4352  }
  0x34   :  { %5075 = vsyncadd [#allocation6], 4294962944 }
  0x35   :  { %5076 = dma.done.wait [#allocation9], 256  }
  0x36   :  { %5077 = vsyncadd [#allocation9], 4294967040  ;;  %v7936_v0 = vmov 0.0   ;;  %vm5089_vm0 = vmmov 0   ;;  %v4910_v1 = vld [vmem:[%s7922_s4 + $0x8] sm:$0xff]   ;;  %v4911_v2 = vld [vmem:[%s7922_s4] sm:$0xff]   ;;  %v255_v6 = vlaneseq }
  0x37   :  { %4778 = vmatprep.subr.bf16.mxu1 %v7936_v0  ;;  %4782 = vmatprep.mubr.msk.bf16.mxu1 %vm5089_vm0, %v7936_v0  ;;  %s8020_s19 = sld [smem:[#allocation171_spill]]  ;;  %vm138_vm1 = vcmask 261120   ;;  %v5090_v12 = vmov 1966171168   ;;  %v4686_v15 = vld [vmem:[%s7923_s5] ss:$0 sm:$0xff] }
  0x38   :  { %4779 = vmatpush3.bf16.msra.mxu1 %v4910_v1  ;;  %v256_v7 = vshrl.u32 %v255_v6, 7  ;;  %v727_v8 = vand.u32 127, %v255_v6  ;;  %v253_v13 = vunpack.c.l.s4 %v5090_v12  ;;  %vm461_vm2 = vcmask 64512   ;;  %s5091_s23 = smov 96   ;;  %s5092_s25 = smov 120   ;;  %v186_v45 = vld [vmem:[#allocation2 + $0x8] sm:$0xff] }
  0x39   :  { %4780 = vmatprep.subr.bf16.mxu1 %v7936_v0  ;;  %s5093_s5 = smov 88   ;;  %s5094_s2 = smov 112   ;;  %v185_v48 = vld [vmem:[#allocation2] sm:$0xff]  ;;  %v188_v12 = vld [vmem:[#allocation2 + $0x18] sm:$0xff]  ;;  %v215_v0 = vld [vmem:[#allocation2 + $0xf0] sm:$0xff]  ;;  %vm737_vm3 = vcmask 130112  }
  0x3a   :  { %v5229_v9 = vsub.s32 %v727_v8, %v256_v7  ;;  %v732_v10 = vadd.s32 4294967288, %v727_v8  ;;  %v254_v14 = vunpack.c.0.s8 %v253_v13  ;;  %v351_v31 = vsub.s32 0, %v256_v7  ;;  %s5095_s24 = smov 80   ;;  %v187_v13 = vld [vmem:[#allocation2 + $0x10] sm:$0xff]  ;;  %s5096_s0 = smov 48  }
  0x3b   :  { %vm874_vm4 = vcmask 1041409   ;;  %vm876_vm5 = vcmask 1042434   ;;  %vm878_vm6 = vcmask 1043459   ;;  %vm880_vm7 = vcmask 1044484   ;;  %s5097_s10 = smov 72   ;;  %s5098_s17 = smov 56  }
  0x3c   :  { %4781 = vmatpush3.bf16.msra.mxu1 %v4911_v2  ;;  %8021 = vst [vmem:[#allocation15_spill] sm:$0xff] %v5229_v9  ;;  %v5231_v11 = vsub.s32 %v732_v10, %v256_v7  ;;  %v5238_v18 = vsub.s32 %v254_v14, %v256_v7  ;;  %vm882_vm8 = vcmask 1045509   ;;  %vm884_vm9 = vcmask 1046534   ;;  %s5099_s18 = smov 104   ;;  %s5101_s22 = smov 16  }
  0x3d   :  { %v110_v3 = vld [vmem:[%s8020_s19] sm:$0xff]  ;;  %v111_v4 = vld [vmem:[%s8020_s19 + $0x8] sm:$0xff]  ;;  %vm886_vm10 = vcmask 1047559   ;;  %vm1176_vm11 = vcmask 130048   ;;  %vm4294_vm12 = vcmask 195584   ;;  %vm4574_vm15 = vcmask 523264  }
  0x3e   :  { %v114_v5 = vpack.c.bf16 %v111_v4, %v110_v3  ;;  %8022 = vst [vmem:[#allocation16_spill] sm:$0xff] %v5231_v11  ;;  %v231_v11 = vld [vmem:[#allocation5 + $0x70] sm:$0xff] }
  0x40   :  { %4783 = vmatmul.mubr.msk.bf16.vlgmr.msra.gmra.mxu1 %vm138_vm1, %v114_v5 }
 0x100   :  { %v176_v16 = vpop.f32.mrf.mxu1 }
 0x101   :  { %v5236_v17 = vadd.f32 %v4686_v15, %v176_v16  ;;  %v190_v16 = vld [vmem:[#allocation2 + $0x28] sm:$0xff] }
 0x102   :  { %v4784_v19 = vpop.f32.mrf.mxu1 }
 0x103   :  { %8023 = vst [vmem:[#allocation17_spill] sm:$0xff] %v5236_v17  ;;  %560 = vrot.lane.b32.xlu1 %v5236_v17, %s5091_s23  ;;  %v5242_v20 = vmul.f32 0.28867513, %v5236_v17  ;;  %v189_v19 = vld [vmem:[#allocation2 + $0x20] sm:$0xff] }
 0x104   :  { %v179_v21 = vpop.f32.mrf.mxu1 }
 0x105   :  { %8024 = vst [vmem:[#allocation18_spill] sm:$0xff] %v5242_v20  ;;  %v5244_v22 = vadd.f32 %v4686_v15, %v179_v21  ;;  %1734 = vrot.lane.b32.xlu0 %v5242_v20, %s5092_s25  ;;  %4790 = vmatprep.mubr.msk.f32.mxu1 %vm461_vm2, %v5242_v20  ;;  %v258_v23 = vrot.slane %v5242_v20, %v5238_v18 }
 0x106   :  { %v251_v24 = vcombine.high %v5242_v20, %v5242_v20  ;;  %v4785_v25 = vpop.f32.mrf.mxu1 }
 0x107   :  { %8025 = vst [vmem:[#allocation19_spill] sm:$0xff] %v5244_v22  ;;  %1738 = vrot.lane.b32.xlu1 %v5236_v17, %s5093_s5  ;;  %v5256_v26 = vmul.f32 0.28867513, %v5244_v22  ;;  %v266_v27 = vcombine.high %v258_v23, %v258_v23  ;;  %v274_v38 = vrot.slane %v258_v23, %v5238_v18  ;;  %v194_v23 = vld [vmem:[#allocation2 + $0x48] sm:$0xff]  ;;  %v193_v25 = vld [vmem:[#allocation2 + $0x40] sm:$0xff] }
 0x108   :  { %v265_v28 = vrot.slane %v251_v24, %v5238_v18 }
 0x109   :  { %8026 = vst [vmem:[#allocation20_spill] sm:$0xff] %v5256_v26  ;;  %2706 = vrot.lane.b32.xlu0 %v5242_v20, %s5094_s2  ;;  %v288_v29 = vrot.slane %v266_v27, %v5238_v18  ;;  %v307_v32 = vrot.slane %v5256_v26, %v5238_v18  ;;  %v352_v43 = vrot.slane %v274_v38, %v351_v31 }
 0x10a   :  { %v281_v30 = vrot.slane %v265_v28, %v5238_v18  ;;  %v267_v33 = vcombine.high %v265_v28, %v265_v28  ;;  %v300_v44 = vcombine.high %v5256_v26, %v5256_v26  ;;  %v296_v10 = vcombine.high %v274_v38, %v274_v38 }
 0x10b   :  { %2710 = vrot.lane.b32.xlu1 %v5236_v17, %s5095_s24  ;;  %v323_v35 = vrot.slane %v307_v32, %v5238_v18  ;;  %v298_v36 = vcombine.high %v288_v29, %v288_v29  ;;  %v315_v47 = vcombine.high %v307_v32, %v307_v32  ;;  %v5289_v51 = vmul.f32 %v352_v43, %v186_v45 }
 0x10c   :  { %v5266_v34 = vrot.slane %v281_v30, %v351_v31  ;;  %v295_v37 = vrot.slane %v267_v33, %v5238_v18  ;;  %v297_v42 = vcombine.high %v281_v30, %v281_v30  ;;  %v314_v52 = vrot.slane %v300_v44, %v5238_v18 }
 0x10d   :  { %562 = vrot.lane.b32.xlu0 %v5244_v22, %s5091_s23  ;;  %v5273_v39 = vrot.slane %v323_v35, %v351_v31  ;;  %v5275_v40 = vrot.slane %v298_v36, %v351_v31  ;;  %v337_v49 = vrot.slane %v315_v47, %v5238_v18  ;;  %v345_v50 = vcombine.high %v323_v35, %v323_v35  ;;  %v202_v47 = vld [vmem:[#allocation2 + $0x88] sm:$0xff]  ;;  %s5102_s23 = smov 24  }
 0x10e   :  { %v5277_v41 = vrot.slane %v295_v37, %v351_v31  ;;  %v5282_v46 = vrot.slane %v297_v42, %v351_v31  ;;  %8027 = vst [vmem:[#allocation21_spill] sm:$0xff] %v5289_v51  ;;  %v299_v53 = vcombine.high %v295_v37, %v295_v37  ;;  %v5298_v57 = vmul.f32 %v352_v43, %v185_v48 }
 0x10f   :  { %2712 = vrot.lane.b32.xlu1 %v5244_v22, %s5095_s24  ;;  %v5292_v54 = vrot.slane %v337_v49, %v351_v31  ;;  %v5294_v55 = vrot.slane %v345_v50, %v351_v31  ;;  %v347_v56 = vcombine.high %v337_v49, %v337_v49  ;;  %v330_v58 = vrot.slane %v314_v52, %v5238_v18  ;;  %v192_v49 = vld [vmem:[#allocation2 + $0x38] sm:$0xff] }
 0x110   :  { %8028 = vst [vmem:[#allocation22_spill] sm:$0xff] %v5298_v57  ;;  %v5301_v59 = vrot.slane %v299_v53, %v351_v31  ;;  %v316_v60 = vcombine.high %v314_v52, %v314_v52  ;;  %v462_v6 = vsel %vm461_vm2, %v5298_v57, 0.0  ;;  %v465_v7 = vsel %vm461_vm2, %v5289_v51, 0.0  ;;  %v196_v52 = vld [vmem:[#allocation2 + $0x58] sm:$0xff] }
 0x111   :  { %1740 = vrot.lane.b32.xlu0 %v5244_v22, %s5093_s5  ;;  %v5305_v61 = vrot.slane %v330_v58, %v351_v31  ;;  %v5307_v62 = vrot.slane %v347_v56, %v351_v31  ;;  %v346_v2 = vcombine.high %v330_v58, %v330_v58  ;;  %v356_v8 = vrot.slane %v288_v29, %v351_v31  ;;  %v201_v56 = vld [vmem:[#allocation2 + $0x80] sm:$0xff]  ;;  %v198_v58 = vld [vmem:[#allocation2 + $0x68] sm:$0xff]  ;;  %v223_v22 = vld [vmem:[#allocation5 + $0x30] sm:$0xff] }
 0x112   :  { %v344_v63 = vrot.slane %v316_v60, %v5238_v18  ;;  %v360_v15 = vrot.slane %v296_v10, %v351_v31  ;;  %v5341_v27 = vmul.f32 %v5266_v34, %v194_v23  ;;  %v5346_v28 = vmul.f32 %v5266_v34, %v193_v25  ;;  %v203_v25 = vld [vmem:[#allocation2 + $0x90] sm:$0xff] }
 0x113   :  { %2708 = vrot.lane.b32.xlu1 %v5256_v26, %s5094_s2  ;;  %v5316_v4 = vrot.slane %v346_v2, %v351_v31  ;;  %v5324_v14 = vmul.f32 %v356_v8, %v188_v12  ;;  %v5328_v18 = vmul.f32 %v356_v8, %v187_v13  ;;  %v5397_v48 = vmul.f32 %v5273_v39, %v202_v47  ;;  %v191_v2 = vld [vmem:[#allocation2 + $0x30] sm:$0xff]  ;;  %v204_v12 = vld [vmem:[#allocation2 + $0x98] sm:$0xff] }
 0x114   :  { %v5312_v1 = vrot.slane %v344_v63, %v351_v31  ;;  %v348_v3 = vcombine.high %v344_v63, %v344_v63  ;;  %v5332_v21 = vmul.f32 %v360_v15, %v190_v16  ;;  %v5336_v24 = vmul.f32 %v360_v15, %v189_v19  ;;  %8033 = vst [vmem:[#allocation27_spill] sm:$0xff] %v5341_v27  ;;  %v206_v15 = vld [vmem:[#allocation2 + $0xa8] sm:$0xff] }
 0x115   :  { %1736 = vrot.lane.b32.xlu0 %v5256_v26, %s5092_s25  ;;  %8029 = vst [vmem:[#allocation23_spill] sm:$0xff] %v5324_v14  ;;  %8030 = vst [vmem:[#allocation24_spill] sm:$0xff] %v5328_v18  ;;  %v468_v36 = vsel %vm461_vm2, %v5328_v18, 0.0  ;;  %v471_v42 = vsel %vm461_vm2, %v5324_v14, 0.0  ;;  %v5402_v50 = vmul.f32 %v5275_v40, %v192_v49  ;;  %v5407_v53 = vmul.f32 %v5277_v41, %v196_v52  ;;  %v210_v19 = vld [vmem:[#allocation2 + $0xc8] sm:$0xff] }
 0x116   :  { %v5318_v5 = vrot.slane %v348_v3, %v351_v31  ;;  %8031 = vst [vmem:[#allocation25_spill] sm:$0xff] %v5332_v21  ;;  %8032 = vst [vmem:[#allocation26_spill] sm:$0xff] %v5336_v24  ;;  %v474_v37 = vsel %vm461_vm2, %v5336_v24, 0.0  ;;  %v477_v44 = vsel %vm461_vm2, %v5332_v21, 0.0  ;;  %v5412_v60 = vmul.f32 %v5273_v39, %v201_v56 }
 0x117   :  { %1320 = vrot.lane.b32.xlu1 %v5289_v51, %s5092_s25  ;;  %8034 = vst [vmem:[#allocation28_spill] sm:$0xff] %v5346_v28  ;;  %8035 = vst [vmem:[#allocation29_spill] sm:$0xff] %v5397_v48  ;;  %v5415_v63 = vmul.f32 %v5282_v46, %v198_v58  ;;  %v5422_v3 = vmul.f32 %v5275_v40, %v191_v2  ;;  %v513_v8 = vsel %vm461_vm2, %v5397_v48, 0.0  ;;  %v483_v10 = vsel %vm461_vm2, %v5402_v50, 0.0 }
 0x118   :  { %8036 = vst [vmem:[#allocation30_spill] sm:$0xff] %v5402_v50  ;;  %8037 = vst [vmem:[#allocation31_spill] sm:$0xff] %v5407_v53  ;;  %v5461_v13 = vmul.f32 %v5292_v54, %v204_v12  ;;  %v5466_v16 = vmul.f32 %v5294_v55, %v206_v15  ;;  %v5471_v23 = vmul.f32 %v5305_v61, %v210_v19  ;;  %v207_v19 = vld [vmem:[#allocation2 + $0xb0] sm:$0xff] }
 0x119   :  { %1318 = vrot.lane.b32.xlu0 %v5298_v57, %s5092_s25  ;;  %8038 = vst [vmem:[#allocation32_spill] sm:$0xff] %v5412_v60  ;;  %8039 = vst [vmem:[#allocation33_spill] sm:$0xff] %v5415_v63 }
 0x11a   :  { %8040 = vst [vmem:[#allocation34_spill] sm:$0xff] %v5422_v3  ;;  %8043 = vst [vmem:[#allocation37_spill] sm:$0xff] %v5461_v13  ;;  %v519_v56 = vsel %vm461_vm2, %v5461_v13, 0.0 }
 0x11b   :  { %2324 = vrot.lane.b32.xlu1 %v5289_v51, %s5094_s2  ;;  %8044 = vst [vmem:[#allocation38_spill] sm:$0xff] %v5466_v16  ;;  %8045 = vst [vmem:[#allocation39_spill] sm:$0xff] %v5471_v23 }
 0x11d   :  { %2322 = vrot.lane.b32.xlu0 %v5298_v57, %s5094_s2 }
 0x13c   :  { %463 = vadd.xlane.f32.xlu0 %v462_v6  ;;  %v195_v6 = vld [vmem:[#allocation2 + $0x50] sm:$0xff] }
 0x13d   :  { %v5429_v39 = vmul.f32 %v5277_v41, %v195_v6  ;;  %v510_v41 = vsel %vm461_vm2, %v5412_v60, 0.0 }
 0x13f   :  { %466 = vadd.xlane.f32.xlu1 %v465_v7  ;;  %8041 = vst [vmem:[#allocation35_spill] sm:$0xff] %v5429_v39  ;;  %v197_v7 = vld [vmem:[#allocation2 + $0x60] sm:$0xff] }
 0x140   :  { %v5436_v40 = vmul.f32 %v5282_v46, %v197_v7  ;;  %v480_v46 = vsel %vm461_vm2, %v5422_v3, 0.0  ;;  %v208_v7 = vld [vmem:[#allocation2 + $0xb8] sm:$0xff] }
 0x142   :  { %8042 = vst [vmem:[#allocation36_spill] sm:$0xff] %v5436_v40 }
 0x150   :  { %1324 = vrot.lane.b32.xlu1 %v5324_v14, %s5092_s25 }
 0x152   :  { %1322 = vrot.lane.b32.xlu0 %v5328_v18, %s5092_s25 }
 0x154   :  { %1328 = vrot.lane.b32.xlu1 %v5332_v21, %s5092_s25 }
 0x156   :  { %1326 = vrot.lane.b32.xlu0 %v5336_v24, %s5092_s25 }
 0x158   :  { %1336 = vrot.lane.b32.xlu1 %v5341_v27, %s5092_s25 }
 0x15a   :  { %1334 = vrot.lane.b32.xlu0 %v5346_v28, %s5092_s25 }
 0x15c   :  { %2328 = vrot.lane.b32.xlu1 %v5324_v14, %s5094_s2  ;;  %v221_v14 = vld [vmem:[#allocation5 + $0x20] sm:$0xff] }
 0x15e   :  { %2326 = vrot.lane.b32.xlu0 %v5328_v18, %s5094_s2  ;;  %v235_v18 = vld [vmem:[#allocation5 + $0x90] sm:$0xff] }
 0x160   :  { %2332 = vrot.lane.b32.xlu1 %v5332_v21, %s5094_s2 }
 0x162   :  { %2330 = vrot.lane.b32.xlu0 %v5336_v24, %s5094_s2 }
 0x164   :  { %2340 = vrot.lane.b32.xlu1 %v5341_v27, %s5094_s2 }
 0x166   :  { %2338 = vrot.lane.b32.xlu0 %v5346_v28, %s5094_s2 }
 0x175   :  { %v5362_v29 = vpop.permute.xlu1 %560 }
 0x176   :  { %v5661_v20 = vmul.f32 %v5362_v29, %v235_v18 }
 0x177   :  { %v1735_v30 = vpop.permute.xlu0 %1734 }
 0x178   :  { %4804 = vmatprep.mubr.msk.f32.mxu0 %vm461_vm2, %v1735_v30  ;;  %v5476_v30 = vmul.f32 %v5292_v54, %v203_v25  ;;  %v214_v25 = vld [vmem:[#allocation2 + $0xe8] sm:$0xff]  ;;  %8085 = vst [vmem:[#allocation79_spill] sm:$0xff] %v5661_v20 }
 0x179   :  { %v1739_v32 = vpop.permute.xlu1 %1738 }
 0x17a   :  { %8046 = vst [vmem:[#allocation40_spill] sm:$0xff] %v5476_v30 }
 0x17b   :  { %v2707_v31 = vpop.permute.xlu0 %2706 }
 0x17d   :  { %v2711_v34 = vpop.permute.xlu1 %2710 }
 0x17f   :  { %v5365_v33 = vpop.permute.xlu0 %562 }
 0x180   :  { %4786 = vmatprep.subr.msk.mxu1 %vm461_vm2, %v5365_v33 }
 0x181   :  { %4787 = vmatpush3.xpose.msk.msra.mxu1 %vm461_vm2, %v5365_v33  ;;  %v2713_v38 = vpop.permute.xlu1 %2712 }
 0x182   :  { %4788 = vmatprep.subr.msk.mxu1 %vm461_vm2, %v5362_v29 }
 0x183   :  { %v1741_v35 = vpop.permute.xlu0 %1740 }
 0x184   :  { %4800 = vmatprep.subr.msk.mxu0 %vm461_vm2, %v1741_v35 }
 0x185   :  { %4789 = vmatpush3.xpose.msk.msra.mxu1 %vm461_vm2, %v5362_v29  ;;  %4801 = vmatpush3.xpose.msk.msra.mxu0 %vm461_vm2, %v1741_v35  ;;  %v2709_v45 = vpop.permute.xlu1 %2708 }
 0x186   :  { %469 = vadd.xlane.f32.xlu0 %v468_v36  ;;  %4802 = vmatprep.subr.msk.mxu0 %vm461_vm2, %v1739_v32  ;;  %v209_v36 = vld [vmem:[#allocation2 + $0xc0] sm:$0xff] }
 0x187   :  { %v1737_v43 = vpop.permute.xlu0 %1736  ;;  %v5493_v54 = vmul.f32 %v5305_v61, %v209_v36 }
 0x188   :  { %475 = vadd.xlane.f32.xlu1 %v474_v37  ;;  %4791 = vmatmul.mubr.msk.f32.vlgmr.msra.gmra.mxu1 %vm461_vm2, %v5256_v26  ;;  %v233_v26 = vld [vmem:[#allocation5 + $0x80] sm:$0xff] }
 0x189   :  { %4803 = vmatpush3.xpose.msk.msra.mxu0 %vm461_vm2, %v1739_v32  ;;  %v200_v32 = vld [vmem:[#allocation2 + $0x78] sm:$0xff]  ;;  %8049 = vst [vmem:[#allocation43_spill] sm:$0xff] %v5493_v54  ;;  %v5532_v49 = vpop.permute.xlu1 %1320 }
 0x18a   :  { %472 = vadd.xlane.f32.xlu0 %v471_v42  ;;  %4814 = vmatprep.subr.msk.mxu0 %vm461_vm2, %v2713_v38  ;;  %v5486_v35 = vmul.f32 %v5301_v59, %v200_v32  ;;  %v5563_v32 = vmul.f32 %v5307_v62, %v207_v19 }
 0x18b   :  { %v5512_v61 = vpop.permute.xlu0 %1318 }
 0x18c   :  { %4805 = vmatmul.mubr.msk.f32.vlgmr.msra.gmra.mxu0 %vm461_vm2, %v1737_v43  ;;  %8048 = vst [vmem:[#allocation42_spill] sm:$0xff] %v5486_v35  ;;  %8062 = vst [vmem:[#allocation56_spill] sm:$0xff] %v5563_v32 }
 0x18d   :  { %4815 = vmatpush3.xpose.msk.msra.mxu0 %vm461_vm2, %v2713_v38  ;;  %4818 = vmatprep.mubr.msk.f32.mxu0 %vm461_vm2, %v2707_v31  ;;  %v205_v31 = vld [vmem:[#allocation2 + $0xa0] sm:$0xff]  ;;  %v5538_v58 = vpop.permute.xlu1 %2324 }
 0x18e   :  { %478 = vadd.xlane.f32.xlu0 %v477_v44  ;;  %4816 = vmatprep.subr.msk.mxu0 %vm461_vm2, %v2711_v34  ;;  %8055 = vst [vmem:[#allocation49_spill] sm:$0xff] %v5538_v58 }
 0x18f   :  { %v5518_v38 = vpop.permute.xlu0 %2322 }
 0x190   :  { %8051 = vst [vmem:[#allocation45_spill] sm:$0xff] %v5518_v38  ;;  %v227_v38 = vld [vmem:[#allocation5 + $0x50] sm:$0xff] }
 0x191   :  { %4817 = vmatpush3.xpose.msk.msra.mxu0 %vm461_vm2, %v2711_v34  ;;  %v5483_v34 = vmul.f32 %v5294_v55, %v205_v31  ;;  %v199_v55 = vld [vmem:[#allocation2 + $0x70] sm:$0xff] }
 0x192   :  { %v5504_v37 = vmul.f32 %v5301_v59, %v199_v55  ;;  %v5568_v55 = vmul.f32 %v5316_v4, %v214_v25  ;;  %v216_v25 = vld [vmem:[#allocation2 + $0xf8] sm:$0xff] }
 0x193   :  { %8047 = vst [vmem:[#allocation41_spill] sm:$0xff] %v5483_v34  ;;  %v522_v47 = vsel %vm461_vm2, %v5483_v34, 0.0 }
 0x194   :  { %4819 = vmatmul.mubr.msk.f32.vlgmr.msra.gmra.mxu0 %vm461_vm2, %v2709_v45  ;;  %8050 = vst [vmem:[#allocation44_spill] sm:$0xff] %v5504_v37  ;;  %v516_v45 = vsel %vm461_vm2, %v5476_v30, 0.0  ;;  %8064 = vst [vmem:[#allocation58_spill] sm:$0xff] %v5568_v55 }
 0x199   :  { %1352 = vrot.lane.b32.xlu1 %v5397_v48, %s5092_s25 }
 0x19d   :  { %1332 = vrot.lane.b32.xlu1 %v5402_v50, %s5092_s25 }
 0x1a1   :  { %1340 = vrot.lane.b32.xlu1 %v5407_v53, %s5092_s25 }
 0x1a4   :  { %1350 = vrot.lane.b32.xlu0 %v5412_v60, %s5092_s25 }
 0x1a5   :  { %1344 = vrot.lane.b32.xlu1 %v5415_v63, %s5092_s25 }
 0x1a8   :  { %1330 = vrot.lane.b32.xlu0 %v5422_v3, %s5092_s25 }
 0x1a9   :  { %2356 = vrot.lane.b32.xlu1 %v5397_v48, %s5094_s2  ;;  %v219_v48 = vld [vmem:[#allocation5 + $0x10] sm:$0xff] }
 0x1ac   :  { %1338 = vrot.lane.b32.xlu0 %v5429_v39, %s5092_s25 }
 0x1ad   :  { %2336 = vrot.lane.b32.xlu1 %v5402_v50, %s5094_s2 }
 0x1b0   :  { %1342 = vrot.lane.b32.xlu0 %v5436_v40, %s5092_s25 }
 0x1b1   :  { %2344 = vrot.lane.b32.xlu1 %v5407_v53, %s5094_s2 }
 0x1b4   :  { %2354 = vrot.lane.b32.xlu0 %v5412_v60, %s5094_s2  ;;  %v217_v60 = vld [vmem:[#allocation5] sm:$0xff] }
 0x1b5   :  { %2348 = vrot.lane.b32.xlu1 %v5415_v63, %s5094_s2 }
 0x1b8   :  { %2334 = vrot.lane.b32.xlu0 %v5422_v3, %s5094_s2 }
 0x1bc   :  { %2342 = vrot.lane.b32.xlu0 %v5429_v39, %s5094_s2 }
 0x1c0   :  { %2346 = vrot.lane.b32.xlu0 %v5436_v40, %s5094_s2 }
 0x1c5   :  { %v5520_v59 = vpop.xlane.xlu0 %463 }
 0x1c6   :  { %8052 = vst [vmem:[#allocation46_spill] sm:$0xff] %v5520_v59 }
 0x1c8   :  { %v5542_v6 = vpop.xlane.xlu1 %466 }
 0x1c9   :  { %v5522_v42 = vpop.permute.xlu0 %1322  ;;  %8057 = vst [vmem:[#allocation51_spill] sm:$0xff] %v5542_v6 }
 0x1cd   :  { %v5524_v43 = vpop.permute.xlu0 %1326 }
 0x1d1   :  { %v5526_v44 = vpop.permute.xlu0 %1334 }
 0x1d2   :  { %8053 = vst [vmem:[#allocation47_spill] sm:$0xff] %v5526_v44  ;;  %v245_v44 = vld [vmem:[#allocation5 + $0xe0] sm:$0xff] }
 0x1d5   :  { %v5534_v52 = vpop.permute.xlu0 %2326 }
 0x1d6   :  { %8054 = vst [vmem:[#allocation48_spill] sm:$0xff] %v5534_v52 }
 0x1d9   :  { %511 = vadd.xlane.f32.xlu1 %v510_v41  ;;  %v5540_v2 = vpop.permute.xlu0 %2330 }
 0x1da   :  { %8056 = vst [vmem:[#allocation50_spill] sm:$0xff] %v5540_v2 }
 0x1dd   :  { %481 = vadd.xlane.f32.xlu1 %v480_v46  ;;  %v5544_v41 = vpop.permute.xlu0 %2338  ;;  %v5547_v46 = vmul.f32 %v5307_v62, %v208_v7 }
 0x1de   :  { %8058 = vst [vmem:[#allocation52_spill] sm:$0xff] %v5544_v41  ;;  %v237_v41 = vld [vmem:[#allocation5 + $0xa0] sm:$0xff] }
 0x1df   :  { %514 = vadd.xlane.f32.xlu0 %v513_v8  ;;  %8059 = vst [vmem:[#allocation53_spill] sm:$0xff] %v5547_v46  ;;  %v5549_v8 = vpop.permute.xlu1 %1324  ;;  %v5677_v18 = vmul.f32 %v5362_v29, %v237_v41 }
 0x1e1   :  { %8090 = vst [vmem:[#allocation84_spill] sm:$0xff] %v5677_v18 }
 0x1e3   :  { %484 = vadd.xlane.f32.xlu0 %v483_v10  ;;  %v212_v10 = vld [vmem:[#allocation2 + $0xd8] sm:$0xff]  ;;  %v5560_v31 = vpop.permute.xlu1 %1328 }
 0x1e4   :  { %v5556_v15 = vmul.f32 %v5312_v1, %v212_v10 }
 0x1e6   :  { %8061 = vst [vmem:[#allocation55_spill] sm:$0xff] %v5556_v15 }
 0x1e7   :  { %v5577_v7 = vpop.permute.xlu1 %1336 }
 0x1e8   :  { %8066 = vst [vmem:[#allocation60_spill] sm:$0xff] %v5577_v7 }
 0x1ee   :  { %1356 = vrot.lane.b32.xlu1 %v5461_v13, %s5092_s25 }
 0x1f2   :  { %1360 = vrot.lane.b32.xlu1 %v5466_v16, %s5092_s25 }
 0x1f6   :  { %1368 = vrot.lane.b32.xlu1 %v5471_v23, %s5092_s25 }
 0x1f9   :  { %1354 = vrot.lane.b32.xlu0 %v5476_v30, %s5092_s25 }
 0x1fa   :  { %2360 = vrot.lane.b32.xlu1 %v5461_v13, %s5094_s2  ;;  %v5631_v13 = vmul.f32 %v5362_v29, %v217_v60  ;;  %v5647_v60 = vmul.f32 %v5362_v29, %v221_v14 }
 0x1fc   :  { %8078 = vst [vmem:[#allocation72_spill] sm:$0xff] %v5631_v13  ;;  %8081 = vst [vmem:[#allocation75_spill] sm:$0xff] %v5647_v60 }
 0x1fd   :  { %1358 = vrot.lane.b32.xlu0 %v5483_v34, %s5092_s25 }
 0x1fe   :  { %1348 = vrot.lane.b32.xlu1 %v5486_v35, %s5092_s25 }
 0x201   :  { %1366 = vrot.lane.b32.xlu0 %v5493_v54, %s5092_s25 }
 0x202   :  { %2364 = vrot.lane.b32.xlu1 %v5466_v16, %s5094_s2 }
 0x205   :  { %2358 = vrot.lane.b32.xlu0 %v5476_v30, %s5094_s2 }
 0x206   :  { %2372 = vrot.lane.b32.xlu1 %v5471_v23, %s5094_s2 }
 0x209   :  { %1346 = vrot.lane.b32.xlu0 %v5504_v37, %s5092_s25 }
 0x20a   :  { %2352 = vrot.lane.b32.xlu1 %v5486_v35, %s5094_s2 }
 0x20d   :  { %2362 = vrot.lane.b32.xlu0 %v5483_v34, %s5094_s2 }
 0x20f   :  { %v5551_v12 = vpop.xlane.xlu0 %469 }
 0x210   :  { %8060 = vst [vmem:[#allocation54_spill] sm:$0xff] %v5551_v12  ;;  %v222_v12 = vld [vmem:[#allocation5 + $0x28] sm:$0xff] }
 0x211   :  { %2370 = vrot.lane.b32.xlu0 %v5493_v54, %s5094_s2 }
 0x213   :  { %v5565_v36 = vpop.xlane.xlu0 %472 }
 0x214   :  { %8063 = vst [vmem:[#allocation57_spill] sm:$0xff] %v5565_v36  ;;  %v234_v36 = vld [vmem:[#allocation5 + $0x88] sm:$0xff] }
 0x215   :  { %2350 = vrot.lane.b32.xlu0 %v5504_v37, %s5094_s2 }
 0x217   :  { %v5581_v62 = vpop.xlane.xlu0 %478 }
 0x218   :  { %8067 = vst [vmem:[#allocation61_spill] sm:$0xff] %v5581_v62 }
 0x21b   :  { %v5594_v19 = vpop.permute.xlu0 %1350 }
 0x22e   :  { %517 = vadd.xlane.f32.xlu1 %v516_v45  ;;  %v211_v45 = vld [vmem:[#allocation2 + $0xd0] sm:$0xff] }
 0x232   :  { %523 = vadd.xlane.f32.xlu1 %v522_v47  ;;  %v5575_v47 = vmul.f32 %v5312_v1, %v211_v45  ;;  %v5592_v1 = vpop.permute.xlu1 %2328 }
 0x233   :  { %8069 = vst [vmem:[#allocation63_spill] sm:$0xff] %v5592_v1  ;;  %v240_v1 = vld [vmem:[#allocation5 + $0xb8] sm:$0xff] }
 0x234   :  { %520 = vadd.xlane.f32.xlu0 %v519_v56  ;;  %8065 = vst [vmem:[#allocation59_spill] sm:$0xff] %v5575_v47  ;;  %v213_v56 = vld [vmem:[#allocation2 + $0xe0] sm:$0xff] }
 0x235   :  { %v5586_v10 = vmul.f32 %v5316_v4, %v213_v56  ;;  %v5601_v4 = vmul.f32 %v5318_v5, %v216_v25  ;;  %v5607_v56 = vpop.permute.xlu0 %1330  ;;  %v5618_v25 = vmul.f32 %v5318_v5, %v215_v0  ;;  %v5638_v0 = vmul.f32 %v5362_v29, %v219_v48 }
 0x236   :  { %v5603_v45 = vpop.permute.xlu1 %2332  ;;  %8072 = vst [vmem:[#allocation66_spill] sm:$0xff] %v5607_v56  ;;  %v5654_v48 = vmul.f32 %v5362_v29, %v233_v26  ;;  %v5670_v26 = vmul.f32 %v5362_v29, %v223_v22 }
 0x237   :  { %8068 = vst [vmem:[#allocation62_spill] sm:$0xff] %v5586_v10  ;;  %8070 = vst [vmem:[#allocation64_spill] sm:$0xff] %v5601_v4 }
 0x238   :  { %8071 = vst [vmem:[#allocation65_spill] sm:$0xff] %v5603_v45  ;;  %8074 = vst [vmem:[#allocation68_spill] sm:$0xff] %v5618_v25 }
 0x239   :  { %v5620_v3 = vpop.permute.xlu0 %1338  ;;  %8079 = vst [vmem:[#allocation73_spill] sm:$0xff] %v5638_v0  ;;  %8083 = vst [vmem:[#allocation77_spill] sm:$0xff] %v5654_v48 }
 0x23a   :  { %v5615_v34 = vpop.permute.xlu1 %2340  ;;  %8075 = vst [vmem:[#allocation69_spill] sm:$0xff] %v5620_v3  ;;  %8088 = vst [vmem:[#allocation82_spill] sm:$0xff] %v5670_v26  ;;  %v5750_v3 = vmul.f32 %v5365_v33, %v234_v36 }
 0x23b   :  { %8073 = vst [vmem:[#allocation67_spill] sm:$0xff] %v5615_v34  ;;  %v225_v34 = vld [vmem:[#allocation5 + $0x40] sm:$0xff] }
 0x23c   :  { %v5688_v2 = vmul.f32 %v5362_v29, %v225_v34  ;;  %v241_v34 = vld [vmem:[#allocation5 + $0xc0] sm:$0xff]  ;;  %8109 = vst [vmem:[#allocation103_spill] sm:$0xff] %v5750_v3 }
 0x23d   :  { %v5628_v50 = vpop.permute.xlu0 %1342 }
 0x23e   :  { %v5624_v30 = vpop.xlane.xlu1 %475  ;;  %8077 = vst [vmem:[#allocation71_spill] sm:$0xff] %v5628_v50  ;;  %8093 = vst [vmem:[#allocation87_spill] sm:$0xff] %v5688_v2  ;;  %v239_v50 = vld [vmem:[#allocation5 + $0xb0] sm:$0xff] }
 0x23f   :  { %8076 = vst [vmem:[#allocation70_spill] sm:$0xff] %v5624_v30 }
 0x241   :  { %v5640_v5 = vpop.permute.xlu0 %2354 }
 0x242   :  { %v5633_v21 = vpop.permute.xlu1 %1352  ;;  %8080 = vst [vmem:[#allocation74_spill] sm:$0xff] %v5640_v5  ;;  %v598_v5 = vsel %vm461_vm2, %v5631_v13, 0.0 }
 0x243   :  { %1364 = vrot.lane.b32.xlu1 %v5547_v46, %s5092_s25 }
 0x245   :  { %v5651_v24 = vpop.permute.xlu0 %2334 }
 0x246   :  { %v5644_v51 = vpop.permute.xlu1 %1332  ;;  %8082 = vst [vmem:[#allocation76_spill] sm:$0xff] %v5651_v24 }
 0x247   :  { %1372 = vrot.lane.b32.xlu1 %v5556_v15, %s5092_s25 }
 0x249   :  { %v5663_v14 = vpop.permute.xlu0 %2342 }
 0x24a   :  { %1362 = vrot.lane.b32.xlu0 %v5563_v32, %s5092_s25  ;;  %v5656_v57 = vpop.permute.xlu1 %1340  ;;  %8086 = vst [vmem:[#allocation80_spill] sm:$0xff] %v5663_v14 }
 0x24b   :  { %1376 = vrot.lane.b32.xlu1 %v5568_v55, %s5092_s25  ;;  %8084 = vst [vmem:[#allocation78_spill] sm:$0xff] %v5656_v57 }
 0x24d   :  { %v5674_v24 = vpop.permute.xlu0 %2346 }
 0x24e   :  { %1370 = vrot.lane.b32.xlu0 %v5575_v47, %s5092_s25  ;;  %v5667_v17 = vpop.permute.xlu1 %1344  ;;  %8089 = vst [vmem:[#allocation83_spill] sm:$0xff] %v5674_v24  ;;  %v5695_v24 = vmul.f32 %v5362_v29, %v239_v50  ;;  %v5711_v50 = vmul.f32 %v5362_v29, %v241_v34 }
 0x24f   :  { %2368 = vrot.lane.b32.xlu1 %v5547_v46, %s5094_s2  ;;  %8087 = vst [vmem:[#allocation81_spill] sm:$0xff] %v5667_v17  ;;  %v226_v17 = vld [vmem:[#allocation5 + $0x48] sm:$0xff] }
 0x250   :  { %8095 = vst [vmem:[#allocation89_spill] sm:$0xff] %v5695_v24  ;;  %8099 = vst [vmem:[#allocation93_spill] sm:$0xff] %v5711_v50 }
 0x252   :  { %1374 = vrot.lane.b32.xlu0 %v5586_v10, %s5092_s25  ;;  %v5679_v14 = vpop.permute.xlu1 %2356 }
 0x253   :  { %2376 = vrot.lane.b32.xlu1 %v5556_v15, %s5094_s2  ;;  %8091 = vst [vmem:[#allocation85_spill] sm:$0xff] %v5679_v14 }
 0x256   :  { %2366 = vrot.lane.b32.xlu0 %v5563_v32, %s5094_s2  ;;  %v5692_v41 = vpop.permute.xlu1 %2336 }
 0x257   :  { %2380 = vrot.lane.b32.xlu1 %v5568_v55, %s5094_s2  ;;  %8094 = vst [vmem:[#allocation88_spill] sm:$0xff] %v5692_v41  ;;  %v218_v41 = vld [vmem:[#allocation5 + $0x8] sm:$0xff] }
 0x258   :  { %v5716_v14 = vmul.f32 %v5365_v33, %v218_v41  ;;  %v229_v41 = vld [vmem:[#allocation5 + $0x60] sm:$0xff] }
 0x25a   :  { %2374 = vrot.lane.b32.xlu0 %v5575_v47, %s5094_s2  ;;  %v5704_v30 = vpop.permute.xlu1 %2344  ;;  %8100 = vst [vmem:[#allocation94_spill] sm:$0xff] %v5716_v14 }
 0x25b   :  { %1380 = vrot.lane.b32.xlu1 %v5601_v4, %s5092_s25  ;;  %8098 = vst [vmem:[#allocation92_spill] sm:$0xff] %v5704_v30 }
 0x25e   :  { %2378 = vrot.lane.b32.xlu0 %v5586_v10, %s5094_s2 }
 0x25f   :  { %2384 = vrot.lane.b32.xlu1 %v5601_v4, %s5094_s2 }
 0x262   :  { %1378 = vrot.lane.b32.xlu0 %v5618_v25, %s5092_s25 }
 0x266   :  { %2382 = vrot.lane.b32.xlu0 %v5618_v25, %s5094_s2 }
 0x268   :  { %v5685_v22 = vpop.xlane.xlu0 %514 }
 0x269   :  { %8092 = vst [vmem:[#allocation86_spill] sm:$0xff] %v5685_v22 }
 0x26a   :  { %1542 = vrot.lane.b32.xlu0 %v5631_v13, %s5092_s25 }
 0x26c   :  { %v5697_v52 = vpop.xlane.xlu0 %484 }
 0x26d   :  { %8096 = vst [vmem:[#allocation90_spill] sm:$0xff] %v5697_v52  ;;  %v5718_v52 = vpop.permute.xlu1 %2348 }
 0x26e   :  { %1546 = vrot.lane.b32.xlu0 %v5638_v0, %s5092_s25  ;;  %8101 = vst [vmem:[#allocation95_spill] sm:$0xff] %v5718_v52  ;;  %v5736_v52 = vmul.f32 %v5365_v33, %v222_v12  ;;  %v236_v12 = vld [vmem:[#allocation5 + $0x98] sm:$0xff] }
 0x270   :  { %v5708_v59 = vpop.permute.xlu0 %1354  ;;  %8105 = vst [vmem:[#allocation99_spill] sm:$0xff] %v5736_v52 }
 0x271   :  { %v5729_v62 = vpop.xlane.xlu1 %511 }
 0x272   :  { %1550 = vrot.lane.b32.xlu0 %v5647_v60, %s5092_s25  ;;  %8104 = vst [vmem:[#allocation98_spill] sm:$0xff] %v5729_v62 }
 0x274   :  { %v5722_v30 = vpop.permute.xlu0 %1358 }
 0x275   :  { %8102 = vst [vmem:[#allocation96_spill] sm:$0xff] %v5722_v30  ;;  %v5745_v45 = vpop.xlane.xlu1 %481  ;;  %v242_v30 = vld [vmem:[#allocation5 + $0xc8] sm:$0xff] }
 0x276   :  { %1574 = vrot.lane.b32.xlu0 %v5654_v48, %s5092_s25  ;;  %8108 = vst [vmem:[#allocation102_spill] sm:$0xff] %v5745_v45  ;;  %v224_v45 = vld [vmem:[#allocation5 + $0x38] sm:$0xff] }
 0x278   :  { %v5738_v6 = vpop.permute.xlu0 %1366 }
 0x279   :  { %8106 = vst [vmem:[#allocation100_spill] sm:$0xff] %v5738_v6  ;;  %v5764_v22 = vpop.permute.xlu1 %1356 }
 0x27a   :  { %1578 = vrot.lane.b32.xlu0 %v5661_v20, %s5092_s25 }
 0x27c   :  { %v5757_v62 = vpop.permute.xlu0 %2358 }
 0x27d   :  { %8111 = vst [vmem:[#allocation105_spill] sm:$0xff] %v5757_v62  ;;  %v238_v62 = vld [vmem:[#allocation5 + $0xa8] sm:$0xff] }
 0x27e   :  { %1554 = vrot.lane.b32.xlu0 %v5670_v26, %s5092_s25  ;;  %v5782_v9 = vmul.f32 %v5365_v33, %v238_v62  ;;  %v5798_v62 = vmul.f32 %v5362_v29, %v231_v11 }
 0x280   :  { %v5773_v36 = vpop.permute.xlu0 %1346  ;;  %8115 = vst [vmem:[#allocation109_spill] sm:$0xff] %v5782_v9  ;;  %8119 = vst [vmem:[#allocation113_spill] sm:$0xff] %v5798_v62 }
 0x281   :  { %8114 = vst [vmem:[#allocation108_spill] sm:$0xff] %v5773_v36  ;;  %v5791_v36 = vmul.f32 %v5365_v33, %v226_v17  ;;  %v228_v17 = vld [vmem:[#allocation5 + $0x58] sm:$0xff] }
 0x282   :  { %1582 = vrot.lane.b32.xlu0 %v5677_v18, %s5092_s25  ;;  %v5817_v11 = vmul.f32 %v5365_v33, %v228_v17  ;;  %v247_v17 = vld [vmem:[#allocation5 + $0xf0] sm:$0xff] }
 0x283   :  { %599 = vadd.xlane.f32.xlu1 %v598_v5  ;;  %v5702_v5 = vmul.f32 %v5362_v29, %v227_v38  ;;  %v220_v38 = vld [vmem:[#allocation5 + $0x18] sm:$0xff]  ;;  %8117 = vst [vmem:[#allocation111_spill] sm:$0xff] %v5791_v36 }
 0x284   :  { %v5727_v34 = vmul.f32 %v5365_v33, %v220_v38  ;;  %v5743_v38 = vmul.f32 %v5362_v29, %v229_v41  ;;  %v5762_v41 = vmul.f32 %v5365_v33, %v236_v12  ;;  %v5777_v12 = vpop.permute.xlu1 %1360  ;;  %8124 = vst [vmem:[#allocation118_spill] sm:$0xff] %v5817_v11 }
 0x285   :  { %8097 = vst [vmem:[#allocation91_spill] sm:$0xff] %v5702_v5 }
 0x286   :  { %1558 = vrot.lane.b32.xlu0 %v5688_v2, %s5092_s25  ;;  %8103 = vst [vmem:[#allocation97_spill] sm:$0xff] %v5727_v34  ;;  %8107 = vst [vmem:[#allocation101_spill] sm:$0xff] %v5743_v38 }
 0x287   :  { %8112 = vst [vmem:[#allocation106_spill] sm:$0xff] %v5762_v41 }
 0x288   :  { %v5793_v58 = vpop.permute.xlu1 %1368 }
 0x289   :  { %8118 = vst [vmem:[#allocation112_spill] sm:$0xff] %v5793_v58  ;;  %v5810_v58 = vmul.f32 %v5362_v29, %v245_v44  ;;  %v5826_v44 = vmul.f32 %v5365_v33, %v242_v30 }
 0x28a   :  { %1586 = vrot.lane.b32.xlu0 %v5695_v24, %s5092_s25 }
 0x28b   :  { %8122 = vst [vmem:[#allocation116_spill] sm:$0xff] %v5810_v58  ;;  %8126 = vst [vmem:[#allocation120_spill] sm:$0xff] %v5826_v44 }
 0x28c   :  { %v5812_v25 = vpop.permute.xlu1 %2360 }
 0x28d   :  { %8123 = vst [vmem:[#allocation117_spill] sm:$0xff] %v5812_v25 }
 0x28e   :  { %1562 = vrot.lane.b32.xlu0 %v5702_v5, %s5092_s25 }
 0x292   :  { %1590 = vrot.lane.b32.xlu0 %v5711_v50, %s5092_s25 }
 0x294   :  { %1544 = vrot.lane.b32.xlu1 %v5716_v14, %s5092_s25 }
 0x296   :  { %2514 = vrot.lane.b32.xlu0 %v5631_v13, %s5094_s2  ;;  %v243_v13 = vld [vmem:[#allocation5 + $0xd0] sm:$0xff] }
 0x297   :  { %v5755_v6 = vmul.f32 %v5362_v29, %v243_v13  ;;  %v5771_v13 = vmul.f32 %v5365_v33, %v224_v45  ;;  %v5786_v45 = vpop.permute.xlu0 %2362 }
 0x298   :  { %1548 = vrot.lane.b32.xlu1 %v5727_v34, %s5092_s25  ;;  %8116 = vst [vmem:[#allocation110_spill] sm:$0xff] %v5786_v45  ;;  %v5803_v45 = vmul.f32 %v5365_v33, %v240_v1 }
 0x299   :  { %8110 = vst [vmem:[#allocation104_spill] sm:$0xff] %v5755_v6  ;;  %8113 = vst [vmem:[#allocation107_spill] sm:$0xff] %v5771_v13 }
 0x29a   :  { %2518 = vrot.lane.b32.xlu0 %v5638_v0, %s5094_s2  ;;  %8120 = vst [vmem:[#allocation114_spill] sm:$0xff] %v5803_v45 }
 0x29b   :  { %v5805_v57 = vpop.permute.xlu0 %2370 }
 0x29c   :  { %1552 = vrot.lane.b32.xlu1 %v5736_v52, %s5092_s25  ;;  %8121 = vst [vmem:[#allocation115_spill] sm:$0xff] %v5805_v57  ;;  %v5828_v57 = vpop.permute.xlu1 %1348 }
 0x29d   :  { %8127 = vst [vmem:[#allocation121_spill] sm:$0xff] %v5828_v57  ;;  %v230_v57 = vld [vmem:[#allocation5 + $0x68] sm:$0xff] }
 0x29e   :  { %1566 = vrot.lane.b32.xlu0 %v5743_v38, %s5092_s25  ;;  %v5854_v7 = vmul.f32 %v5365_v33, %v230_v57 }
 0x29f   :  { %v5821_v1 = vpop.permute.xlu0 %2350 }
 0x2a0   :  { %1576 = vrot.lane.b32.xlu1 %v5750_v3, %s5092_s25  ;;  %8125 = vst [vmem:[#allocation119_spill] sm:$0xff] %v5821_v1  ;;  %v5839_v1 = vmul.f32 %v5362_v29, %v247_v17  ;;  %v5843_v30 = vpop.permute.xlu1 %2364  ;;  %8133 = vst [vmem:[#allocation127_spill] sm:$0xff] %v5854_v7  ;;  %v244_v29 = vld [vmem:[#allocation5 + $0xd8] sm:$0xff] }
 0x2a1   :  { %8131 = vst [vmem:[#allocation125_spill] sm:$0xff] %v5843_v30 }
 0x2a2   :  { %1594 = vrot.lane.b32.xlu0 %v5755_v6, %s5092_s25  ;;  %8129 = vst [vmem:[#allocation123_spill] sm:$0xff] %v5839_v1 }
 0x2a4   :  { %1580 = vrot.lane.b32.xlu1 %v5762_v41, %s5092_s25  ;;  %v5856_v17 = vpop.permute.xlu1 %2372 }
 0x2a5   :  { %8134 = vst [vmem:[#allocation128_spill] sm:$0xff] %v5856_v17 }
 0x2a6   :  { %2522 = vrot.lane.b32.xlu0 %v5647_v60, %s5094_s2 }
 0x2a8   :  { %1556 = vrot.lane.b32.xlu1 %v5771_v13, %s5092_s25  ;;  %v5871_v57 = vpop.permute.xlu1 %2352 }
 0x2a9   :  { %8138 = vst [vmem:[#allocation132_spill] sm:$0xff] %v5871_v57  ;;  %v232_v57 = vld [vmem:[#allocation5 + $0x78] sm:$0xff] }
 0x2aa   :  { %2546 = vrot.lane.b32.xlu0 %v5654_v48, %s5094_s2 }
 0x2ac   :  { %1584 = vrot.lane.b32.xlu1 %v5782_v9, %s5092_s25 }
 0x2ae   :  { %2550 = vrot.lane.b32.xlu0 %v5661_v20, %s5094_s2 }
 0x2b0   :  { %1560 = vrot.lane.b32.xlu1 %v5791_v36, %s5092_s25 }
 0x2b2   :  { %1570 = vrot.lane.b32.xlu0 %v5798_v62, %s5092_s25 }
 0x2b4   :  { %1588 = vrot.lane.b32.xlu1 %v5803_v45, %s5092_s25 }
 0x2b6   :  { %1598 = vrot.lane.b32.xlu0 %v5810_v58, %s5092_s25 }
 0x2b8   :  { %1564 = vrot.lane.b32.xlu1 %v5817_v11, %s5092_s25 }
 0x2ba   :  { %2526 = vrot.lane.b32.xlu0 %v5670_v26, %s5094_s2 }
 0x2bc   :  { %1592 = vrot.lane.b32.xlu1 %v5826_v44, %s5092_s25 }
 0x2bd   :  { %v5832_v25 = vpop.xlane.xlu0 %520 }
 0x2be   :  { %8128 = vst [vmem:[#allocation122_spill] sm:$0xff] %v5832_v25  ;;  %2554 = vrot.lane.b32.xlu0 %v5677_v18, %s5094_s2 }
 0x2c0   :  { %2516 = vrot.lane.b32.xlu1 %v5716_v14, %s5094_s2 }
 0x2c1   :  { %v5841_v56 = vpop.permute.xlu0 %1362 }
 0x2c2   :  { %8130 = vst [vmem:[#allocation124_spill] sm:$0xff] %v5841_v56  ;;  %1602 = vrot.lane.b32.xlu0 %v5839_v1, %s5092_s25  ;;  %v5865_v56 = vmul.f32 %v5365_v33, %v244_v29 }
 0x2c4   :  { %2520 = vrot.lane.b32.xlu1 %v5727_v34, %s5094_s2  ;;  %8136 = vst [vmem:[#allocation130_spill] sm:$0xff] %v5865_v56 }
 0x2c5   :  { %v5849_v25 = vpop.permute.xlu0 %1370 }
 0x2c6   :  { %8132 = vst [vmem:[#allocation126_spill] sm:$0xff] %v5849_v25  ;;  %2530 = vrot.lane.b32.xlu0 %v5688_v2, %s5094_s2 }
 0x2c8   :  { %1568 = vrot.lane.b32.xlu1 %v5854_v7, %s5092_s25 }
 0x2c9   :  { %v5860_v30 = vpop.permute.xlu0 %1374 }
 0x2ca   :  { %8135 = vst [vmem:[#allocation129_spill] sm:$0xff] %v5860_v30  ;;  %2558 = vrot.lane.b32.xlu0 %v5695_v24, %s5094_s2  ;;  %v5879_v30 = vpop.xlane.xlu1 %517 }
 0x2cb   :  { %8140 = vst [vmem:[#allocation134_spill] sm:$0xff] %v5879_v30  ;;  %v5898_v30 = vmul.f32 %v5365_v33, %v232_v57 }
 0x2cc   :  { %1596 = vrot.lane.b32.xlu1 %v5865_v56, %s5092_s25 }
 0x2cd   :  { %v5869_v25 = vpop.permute.xlu0 %2366  ;;  %8144 = vst [vmem:[#allocation138_spill] sm:$0xff] %v5898_v30 }
 0x2ce   :  { %8137 = vst [vmem:[#allocation131_spill] sm:$0xff] %v5869_v25  ;;  %2534 = vrot.lane.b32.xlu0 %v5702_v5, %s5094_s2  ;;  %v5889_v25 = vpop.xlane.xlu1 %523 }
 0x2cf   :  { %8142 = vst [vmem:[#allocation136_spill] sm:$0xff] %v5889_v25 }
 0x2d0   :  { %2524 = vrot.lane.b32.xlu1 %v5736_v52, %s5094_s2 }
 0x2d1   :  { %v5877_v17 = vpop.permute.xlu0 %2374 }
 0x2d2   :  { %8139 = vst [vmem:[#allocation133_spill] sm:$0xff] %v5877_v17  ;;  %2562 = vrot.lane.b32.xlu0 %v5711_v50, %s5094_s2  ;;  %v246_v50 = vld [vmem:[#allocation5 + $0xe8] sm:$0xff] }
 0x2d3   :  { %v5909_v25 = vmul.f32 %v5365_v33, %v246_v50  ;;  %v248_v50 = vld [vmem:[#allocation5 + $0xf8] sm:$0xff] }
 0x2d4   :  { %2548 = vrot.lane.b32.xlu1 %v5750_v3, %s5094_s2 }
 0x2d5   :  { %v5885_v29 = vpop.permute.xlu0 %2378  ;;  %8146 = vst [vmem:[#allocation140_spill] sm:$0xff] %v5909_v25 }
 0x2d6   :  { %8141 = vst [vmem:[#allocation135_spill] sm:$0xff] %v5885_v29  ;;  %2538 = vrot.lane.b32.xlu0 %v5743_v38, %s5094_s2  ;;  %v5904_v38 = vpop.permute.xlu1 %1364 }
 0x2d8   :  { %2552 = vrot.lane.b32.xlu1 %v5762_v41, %s5094_s2 }
 0x2d9   :  { %v5893_v17 = vpop.permute.xlu0 %1378 }
 0x2da   :  { %8143 = vst [vmem:[#allocation137_spill] sm:$0xff] %v5893_v17  ;;  %2566 = vrot.lane.b32.xlu0 %v5755_v6, %s5094_s2  ;;  %v5917_v57 = vpop.permute.xlu1 %1372 }
 0x2db   :  { %8147 = vst [vmem:[#allocation141_spill] sm:$0xff] %v5917_v57 }
 0x2dc   :  { %1572 = vrot.lane.b32.xlu1 %v5898_v30, %s5092_s25 }
 0x2dd   :  { %v5902_v29 = vpop.permute.xlu0 %2382 }
 0x2de   :  { %8145 = vst [vmem:[#allocation139_spill] sm:$0xff] %v5902_v29  ;;  %2542 = vrot.lane.b32.xlu0 %v5798_v62, %s5094_s2  ;;  %v5929_v6 = vpop.permute.xlu1 %1376 }
 0x2df   :  { %8150 = vst [vmem:[#allocation144_spill] sm:$0xff] %v5929_v6 }
 0x2e0   :  { %1600 = vrot.lane.b32.xlu1 %v5909_v25, %s5092_s25 }
 0x2e1   :  { %v5913_v17 = vpop.permute.xlu0 %1542 }
 0x2e2   :  { %2570 = vrot.lane.b32.xlu0 %v5810_v58, %s5094_s2  ;;  %v5932_v58 = vmul.f32 %v5365_v33, %v248_v50 }
 0x2e4   :  { %2528 = vrot.lane.b32.xlu1 %v5771_v13, %s5094_s2  ;;  %8151 = vst [vmem:[#allocation145_spill] sm:$0xff] %v5932_v58 }
 0x2e5   :  { %v5921_v29 = vpop.permute.xlu0 %1546 }
 0x2e6   :  { %8148 = vst [vmem:[#allocation142_spill] sm:$0xff] %v5921_v29  ;;  %2574 = vrot.lane.b32.xlu0 %v5839_v1, %s5094_s2  ;;  %v5938_v29 = vpop.permute.xlu1 %2368 }
 0x2e7   :  { %8152 = vst [vmem:[#allocation146_spill] sm:$0xff] %v5938_v29 }
 0x2e8   :  { %2556 = vrot.lane.b32.xlu1 %v5782_v9, %s5094_s2 }
 0x2e9   :  { %v5927_v62 = vpop.permute.xlu0 %1550 }
 0x2ea   :  { %8149 = vst [vmem:[#allocation143_spill] sm:$0xff] %v5927_v62  ;;  %v5948_v6 = vpop.permute.xlu1 %2376 }
 0x2eb   :  { %8155 = vst [vmem:[#allocation149_spill] sm:$0xff] %v5948_v6  ;;  %v525_v6 = vsel %vm461_vm2, %v5466_v16, 0.0 }
 0x2ec   :  { %1604 = vrot.lane.b32.xlu1 %v5932_v58, %s5092_s25  ;;  %s5104_s25 = smov [#allocation10]  }
 0x2ed   :  { %v5936_v57 = vpop.permute.xlu0 %1574  ;;  %s4672_s5 = sshll.u32 %s5104_s25, 4  ;;  %s4673_s5 = int_to_ptr.vmem [resolvable:$true] %s4672_s5 }
 0x2ee   :  { %v5954_v50 = vpop.permute.xlu1 %2380  ;;  %p5057_p7 = scmp.lt.s32.totalorder %s4673_s5, %s4673_s5 }
 0x2ef   :  { %8157 = vst [vmem:[#allocation151_spill] sm:$0xff] %v5954_v50 }
 0x2f0   :  { %2532 = vrot.lane.b32.xlu1 %v5791_v36, %s5094_s2 }
 0x2f1   :  { %v5942_v1 = vpop.permute.xlu0 %1578 }
 0x2f2   :  { %8153 = vst [vmem:[#allocation147_spill] sm:$0xff] %v5942_v1 }
 0x2f4   :  { %2560 = vrot.lane.b32.xlu1 %v5803_v45, %s5094_s2 }
 0x2f5   :  { %v5946_v62 = vpop.permute.xlu0 %1554 }
 0x2f6   :  { %8154 = vst [vmem:[#allocation148_spill] sm:$0xff] %v5946_v62  ;;  %v5964_v62 = vpop.permute.xlu1 %1380 }
 0x2f7   :  { %8160 = vst [vmem:[#allocation154_spill] sm:$0xff] %v5964_v62 }
 0x2f8   :  { %2536 = vrot.lane.b32.xlu1 %v5817_v11, %s5094_s2 }
 0x2f9   :  { %v5952_v33 = vpop.permute.xlu0 %1582 }
 0x2fa   :  { %8156 = vst [vmem:[#allocation150_spill] sm:$0xff] %v5952_v33  ;;  %v5972_v33 = vpop.permute.xlu1 %2384 }
 0x2fb   :  { %8162 = vst [vmem:[#allocation156_spill] sm:$0xff] %v5972_v33 }
 0x2fc   :  { %2564 = vrot.lane.b32.xlu1 %v5826_v44, %s5094_s2 }
 0x2fd   :  { %v5958_v29 = vpop.permute.xlu0 %1558 }
 0x2fe   :  { %8158 = vst [vmem:[#allocation152_spill] sm:$0xff] %v5958_v29  ;;  %v601_v29 = vsel %vm461_vm2, %v5716_v14, 0.0  ;;  %v489_v14 = vsel %vm461_vm2, %v5341_v27, 0.0 }
 0x300   :  { %2540 = vrot.lane.b32.xlu1 %v5854_v7, %s5094_s2 }
 0x301   :  { %v5962_v1 = vpop.permute.xlu0 %1586 }
 0x302   :  { %8159 = vst [vmem:[#allocation153_spill] sm:$0xff] %v5962_v1 }
 0x304   :  { %2568 = vrot.lane.b32.xlu1 %v5865_v56, %s5094_s2 }
 0x305   :  { %526 = vadd.xlane.f32.xlu0 %v525_v6  ;;  %v5970_v50 = vpop.permute.xlu0 %1562  ;;  %v607_v6 = vsel %vm461_vm2, %v5727_v34, 0.0  ;;  %v613_v34 = vsel %vm461_vm2, %v5736_v52, 0.0 }
 0x306   :  { %8161 = vst [vmem:[#allocation155_spill] sm:$0xff] %v5970_v50 }
 0x308   :  { %2544 = vrot.lane.b32.xlu1 %v5898_v30, %s5094_s2 }
 0x309   :  { %602 = vadd.xlane.f32.xlu0 %v601_v29  ;;  %v5978_v1 = vpop.permute.xlu0 %1590 }
 0x30a   :  { %8163 = vst [vmem:[#allocation157_spill] sm:$0xff] %v5978_v1  ;;  %v531_v1 = vsel %vm461_vm2, %v5547_v46, 0.0 }
 0x30c   :  { %2572 = vrot.lane.b32.xlu1 %v5909_v25, %s5094_s2  ;;  %v5982_v62 = vpop.xlane.xlu1 %599 }
 0x30d   :  { %8164 = vst [vmem:[#allocation158_spill] sm:$0xff] %v5982_v62  ;;  %608 = vadd.xlane.f32.xlu0 %v607_v6  ;;  %v5992_v29 = vpop.permute.xlu0 %2514 }
 0x30e   :  { %8165 = vst [vmem:[#allocation159_spill] sm:$0xff] %v5992_v29 }
 0x310   :  { %2576 = vrot.lane.b32.xlu1 %v5932_v58, %s5094_s2  ;;  %v5988_v16 = vpop.permute.xlu1 %1544  ;;  %s5052_s2 = scalar_lea.vmem %s4673_s5, 256 }
 0x311   :  { %490 = vadd.xlane.f32.xlu0 %v489_v14  ;;  %v5998_v50 = vpop.permute.xlu0 %2518  ;;  %v649_v14 = vsel %vm461_vm2, %v5750_v3, 0.0  ;;  %p5053_p6 = scmp.ne.s32.totalorder %s4673_s5, %s5052_s2  ;;  %p5058_p8 = scmp.lt.s32.totalorder %s5052_s2, %s5052_s2 }
 0x312   :  { %8166 = vst [vmem:[#allocation160_spill] sm:$0xff] %v5998_v50 }
 0x313   :  { %p5059_p9 = por %p5058_p8, %p5057_p7 }
 0x314   :  { %v5994_v33 = vpop.permute.xlu1 %1548 }
 0x315   :  { %532 = vadd.xlane.f32.xlu0 %v531_v1  ;;  %v6008_v27 = vpop.permute.xlu0 %1566  ;;  %v655_v1 = vsel %vm461_vm2, %v5762_v41, 0.0  ;;  %p5060_p10 = pnand %p5059_p9, %p5053_p6 }
 0x316   :  { %8167 = vst [vmem:[#allocation161_spill] sm:$0xff] %v6008_v27 }
 0x318   :  { %v6000_v6 = vpop.permute.xlu1 %1552 }
 0x319   :  { %614 = vadd.xlane.f32.xlu0 %v613_v34  ;;  %v6014_v46 = vpop.permute.xlu0 %1594  ;;  %v495_v34 = vsel %vm461_vm2, %v5407_v53, 0.0 }
 0x31a   :  { %8168 = vst [vmem:[#allocation162_spill] sm:$0xff] %v6014_v46 }
 0x31c   :  { %v6004_v62 = vpop.permute.xlu1 %1576 }
 0x31d   :  { %650 = vadd.xlane.f32.xlu0 %v649_v14  ;;  %v537_v14 = vsel %vm461_vm2, %v5471_v23, 0.0  ;;  %v6024_v3 = vpop.permute.xlu0 %2522  ;;  %v604_v23 = vsel %vm461_vm2, %v5638_v0, 0.0 }
 0x320   :  { %v6010_v29 = vpop.permute.xlu1 %1580 }
 0x321   :  { %656 = vadd.xlane.f32.xlu0 %v655_v1  ;;  %v619_v1 = vsel %vm461_vm2, %v5771_v13, 0.0  ;;  %v6030_v41 = vpop.permute.xlu0 %2546 }
 0x324   :  { %v6016_v50 = vpop.permute.xlu1 %1556 }
 0x325   :  { %496 = vadd.xlane.f32.xlu0 %v495_v34  ;;  %v661_v34 = vsel %vm461_vm2, %v5782_v9, 0.0  ;;  %v6042_v13 = vpop.permute.xlu0 %2550  ;;  %v1423_v9 = vsel %vm461_vm2, %v5549_v8, 0.0  ;;  %v543_v8 = vsel %vm461_vm2, %v5556_v15, 0.0  ;;  %v492_v15 = vsel %vm461_vm2, %v5429_v39, 0.0  ;;  %v8192_v39 = vld [vmem:[#allocation143_spill] sm:$0xff] }
 0x328   :  { %v6020_v52 = vpop.permute.xlu1 %1584 }
 0x329   :  { %538 = vadd.xlane.f32.xlu0 %v537_v14  ;;  %v1417_v14 = vsel %vm461_vm2, %v5532_v49, 0.0  ;;  %v6052_v0 = vpop.permute.xlu0 %1570  ;;  %v501_v49 = vsel %vm461_vm2, %v5415_v63, 0.0 }
 0x32c   :  { %v6026_v27 = vpop.permute.xlu1 %1560 }
 0x32d   :  { %620 = vadd.xlane.f32.xlu0 %v619_v1  ;;  %v486_v1 = vsel %vm461_vm2, %v5346_v28, 0.0 }
 0x330   :  { %v6032_v46 = vpop.permute.xlu1 %1588 }
 0x331   :  { %662 = vadd.xlane.f32.xlu0 %v661_v34 }
 0x334   :  { %605 = vadd.xlane.f32.xlu1 %v604_v23  ;;  %v6040_v53 = vpop.permute.xlu1 %1564  ;;  %v528_v23 = vsel %vm461_vm2, %v5563_v32, 0.0  ;;  %v646_v32 = vsel %vm461_vm2, %v5654_v48, 0.0 }
 0x335   :  { %1418 = vadd.xlane.f32.xlu0 %v1417_v14  ;;  %v610_v14 = vsel %vm461_vm2, %v5647_v60, 0.0 }
 0x338   :  { %487 = vadd.xlane.f32.xlu1 %v486_v1  ;;  %v6048_v34 = vpop.permute.xlu1 %1592  ;;  %v6062_v1 = vpop.permute.xlu0 %1598 }
 0x339   :  { %1424 = vadd.xlane.f32.xlu0 %v1423_v9 }
 0x33c   :  { %529 = vadd.xlane.f32.xlu1 %v528_v23  ;;  %v6060_v9 = vpop.permute.xlu1 %2516  ;;  %v625_v23 = vsel %vm461_vm2, %v5791_v36, 0.0  ;;  %v6072_v63 = vpop.permute.xlu0 %2526 }
 0x33d   :  { %502 = vadd.xlane.f32.xlu0 %v501_v49 }
 0x340   :  { %611 = vadd.xlane.f32.xlu1 %v610_v14  ;;  %v6068_v49 = vpop.permute.xlu1 %2520  ;;  %v652_v14 = vsel %vm461_vm2, %v5661_v20, 0.0  ;;  %v6082_v36 = vpop.permute.xlu0 %2554  ;;  %v534_v20 = vsel %vm461_vm2, %v5493_v54, 0.0 }
 0x341   :  { %544 = vadd.xlane.f32.xlu0 %v543_v8  ;;  %v667_v8 = vsel %vm461_vm2, %v5803_v45, 0.0 }
 0x344   :  { %647 = vadd.xlane.f32.xlu1 %v646_v32  ;;  %v1429_v32 = vsel %vm461_vm2, %v5560_v31, 0.0  ;;  %v6092_v45 = vpop.permute.xlu0 %1602  ;;  %v1471_v31 = vsel %vm461_vm2, %v5764_v22, 0.0  ;;  %v549_v22 = vsel %vm461_vm2, %v5568_v55, 0.0 }
 0x345   :  { %626 = vadd.xlane.f32.xlu0 %v625_v23  ;;  %v6080_v23 = vpop.permute.xlu1 %1568 }
 0x348   :  { %653 = vadd.xlane.f32.xlu1 %v652_v14  ;;  %v1465_v14 = vsel %vm461_vm2, %v5633_v21, 0.0 }
 0x349   :  { %668 = vadd.xlane.f32.xlu0 %v667_v8  ;;  %v6088_v8 = vpop.permute.xlu1 %1596 }
 0x34c   :  { %493 = vadd.xlane.f32.xlu1 %v492_v15  ;;  %v616_v15 = vsel %vm461_vm2, %v5670_v26, 0.0  ;;  %v1414_v26 = vsel %vm461_vm2, %v5512_v61, 0.0  ;;  %v498_v61 = vsel %vm461_vm2, %v5436_v40, 0.0  ;;  %v8187_v40 = vld [vmem:[#allocation104_spill] sm:$0xff] }
 0x34d   :  { %1430 = vadd.xlane.f32.xlu0 %v1429_v32  ;;  %v658_v32 = vsel %vm461_vm2, %v5677_v18, 0.0  ;;  %v6100_v21 = vpop.permute.xlu1 %2524 }
 0x350   :  { %535 = vadd.xlane.f32.xlu1 %v534_v20  ;;  %v507_v20 = vsel %vm461_vm2, %v5486_v35, 0.0 }
 0x351   :  { %1466 = vadd.xlane.f32.xlu0 %v1465_v14  ;;  %v6102_v14 = vpop.permute.xlu0 %2530 }
 0x352   :  { %8169 = vst [vmem:[#allocation163_spill] sm:$0xff] %v6102_v14 }
 0x354   :  { %617 = vadd.xlane.f32.xlu1 %v616_v15  ;;  %v6108_v15 = vpop.permute.xlu1 %2548 }
 0x355   :  { %1472 = vadd.xlane.f32.xlu0 %v1471_v31  ;;  %v1420_v31 = vsel %vm461_vm2, %v5522_v42, 0.0  ;;  %v540_v42 = vsel %vm461_vm2, %v5575_v47, 0.0 }
 0x358   :  { %659 = vadd.xlane.f32.xlu1 %v658_v32  ;;  %v6112_v32 = vpop.permute.xlu0 %2558 }
 0x359   :  { %508 = vadd.xlane.f32.xlu0 %v507_v20  ;;  %8170 = vst [vmem:[#allocation164_spill] sm:$0xff] %v6112_v32  ;;  %v631_v20 = vsel %vm461_vm2, %v5817_v11, 0.0 }
 0x35c   :  { %1415 = vadd.xlane.f32.xlu1 %v1414_v26  ;;  %v673_v26 = vsel %vm461_vm2, %v5826_v44, 0.0  ;;  %v6122_v55 = vpop.permute.xlu0 %2534  ;;  %v664_v44 = vsel %vm461_vm2, %v5695_v24, 0.0 }
 0x35d   :  { %550 = vadd.xlane.f32.xlu0 %v549_v22  ;;  %v6120_v22 = vpop.permute.xlu1 %2552  ;;  %8171 = vst [vmem:[#allocation165_spill] sm:$0xff] %v6122_v55 }
 0x360   :  { %1421 = vadd.xlane.f32.xlu1 %v1420_v31  ;;  %v1435_v31 = vsel %vm461_vm2, %v5644_v51, 0.0  ;;  %v6132_v11 = vpop.permute.xlu0 %2562  ;;  %v555_v51 = vsel %vm461_vm2, %v5601_v4, 0.0 }
 0x361   :  { %632 = vadd.xlane.f32.xlu0 %v631_v20  ;;  %v6128_v20 = vpop.permute.xlu1 %1572  ;;  %8172 = vst [vmem:[#allocation166_spill] sm:$0xff] %v6132_v11 }
 0x364   :  { %499 = vadd.xlane.f32.xlu1 %v498_v61  ;;  %v622_v61 = vsel %vm461_vm2, %v5688_v2, 0.0  ;;  %v1426_v2 = vsel %vm461_vm2, %v5524_v43, 0.0  ;;  %v1468_v43 = vsel %vm461_vm2, %v5708_v59, 0.0  ;;  %v546_v59 = vsel %vm461_vm2, %v5586_v10, 0.0  ;;  %v8179_v10 = vld [vmem:[#allocation93_spill] sm:$0xff] }
 0x365   :  { %674 = vadd.xlane.f32.xlu0 %v673_v26  ;;  %v1477_v26 = vsel %vm461_vm2, %v5777_v12, 0.0  ;;  %v1641_v12 = vsel %vm461_vm2, %v5988_v16, 0.0  ;;  %v637_v16 = vsel %vm461_vm2, %v5854_v7, 0.0  ;;  %v628_v7 = vsel %vm461_vm2, %v5702_v5, 0.0 }
 0x366   :  { %v670_v4 = vsel %vm461_vm2, %v8179_v10, 0.0  ;;  %v8181_v10 = vld [vmem:[#allocation96_spill] sm:$0xff] }
 0x368   :  { %541 = vadd.xlane.f32.xlu1 %v540_v42  ;;  %v6140_v42 = vpop.permute.xlu1 %1600 }
 0x369   :  { %1436 = vadd.xlane.f32.xlu0 %v1435_v31  ;;  %v6142_v31 = vpop.permute.xlu0 %2538 }
 0x36a   :  { %8173 = vst [vmem:[#allocation167_spill] sm:$0xff] %v6142_v31 }
 0x36c   :  { %623 = vadd.xlane.f32.xlu1 %v622_v61  ;;  %v6148_v61 = vpop.permute.xlu1 %2528 }
 0x36d   :  { %1478 = vadd.xlane.f32.xlu0 %v1477_v26  ;;  %v6152_v26 = vpop.permute.xlu0 %2566 }
 0x36e   :  { %8174 = vst [vmem:[#allocation168_spill] sm:$0xff] %v6152_v26 }
 0x370   :  { %665 = vadd.xlane.f32.xlu1 %v664_v44  ;;  %v1462_v44 = vsel %vm461_vm2, %v5594_v19, 0.0  ;;  %v504_v19 = vsel %vm461_vm2, %v5504_v37, 0.0 }
 0x371   :  { %556 = vadd.xlane.f32.xlu0 %v555_v51  ;;  %v1647_v51 = vsel %vm461_vm2, %v5994_v33, 0.0  ;;  %v679_v33 = vsel %vm461_vm2, %v5865_v56, 0.0 }
 0x374   :  { %1427 = vadd.xlane.f32.xlu1 %v1426_v2  ;;  %v6160_v2 = vpop.permute.xlu1 %2556 }
 0x375   :  { %1642 = vadd.xlane.f32.xlu0 %v1641_v12  ;;  %v6162_v12 = vpop.permute.xlu0 %2542 }
 0x376   :  { %8175 = vst [vmem:[#allocation169_spill] sm:$0xff] %v6162_v12 }
 0x378   :  { %1463 = vadd.xlane.f32.xlu1 %v1462_v44  ;;  %v6168_v44 = vpop.permute.xlu1 %1604 }
 0x379   :  { %1648 = vadd.xlane.f32.xlu0 %v1647_v51  ;;  %v6172_v51 = vpop.permute.xlu0 %2570 }
 0x37a   :  { %8176 = vst [vmem:[#allocation170_spill] sm:$0xff] %v6172_v51 }
 0x37c   :  { %1469 = vadd.xlane.f32.xlu1 %v1468_v43  ;;  %v8177_v43 = vld [vmem:[#allocation60_spill] sm:$0xff] }
 0x37d   :  { %638 = vadd.xlane.f32.xlu0 %v637_v16  ;;  %v1441_v16 = vsel %vm461_vm2, %v8177_v43, 0.0  ;;  %v6182_v56 = vpop.permute.xlu0 %2574 }
 0x37e   :  { %8178 = vst [vmem:[#allocation60_spill] sm:$0xff] %v6182_v56  ;;  %v8198_v56 = vld [vmem:[#allocation15_spill] sm:$0xff] }
 0x380   :  { %505 = vadd.xlane.f32.xlu1 %v504_v19  ;;  %v1483_v19 = vsel %vm461_vm2, %v5904_v38, 0.0 }
 0x381   :  { %680 = vadd.xlane.f32.xlu0 %v679_v33  ;;  %v6180_v33 = vpop.permute.xlu1 %2532 }
 0x384   :  { %547 = vadd.xlane.f32.xlu1 %v546_v59  ;;  %v1653_v59 = vsel %vm461_vm2, %v6000_v6, 0.0  ;;  %v1695_v6 = vsel %vm461_vm2, %v6010_v29, 0.0  ;;  %v1638_v29 = vsel %vm461_vm2, %v5913_v17, 0.0  ;;  %v8185_v17 = vld [vmem:[#allocation101_spill] sm:$0xff] }
 0x385   :  { %1442 = vadd.xlane.f32.xlu0 %v1441_v16  ;;  %v6190_v16 = vpop.permute.xlu1 %2560  ;;  %v634_v35 = vsel %vm461_vm2, %v8185_v17, 0.0  ;;  %v8188_v17 = vld [vmem:[#allocation47_spill] sm:$0xff] }
 0x386   :  { %v1438_v18 = vsel %vm461_vm2, %v8188_v17, 0.0 }
 0x388   :  { %629 = vadd.xlane.f32.xlu1 %v628_v7  ;;  %v8180_v7 = vld [vmem:[#allocation66_spill] sm:$0xff] }
 0x389   :  { %1484 = vadd.xlane.f32.xlu0 %v1483_v19  ;;  %v1432_v38 = vsel %vm461_vm2, %v8180_v7, 0.0  ;;  %v1689_v19 = vsel %vm461_vm2, %v6004_v62, 0.0  ;;  %v8182_v7 = vld [vmem:[#allocation68_spill] sm:$0xff]  ;;  %v643_v62 = vsel %vm461_vm2, %v5898_v30, 0.0  ;;  %v8184_v30 = vld [vmem:[#allocation78_spill] sm:$0xff] }
 0x38c   :  { %671 = vadd.xlane.f32.xlu1 %v670_v4  ;;  %v1474_v4 = vsel %vm461_vm2, %v8181_v10, 0.0 }
 0x38d   :  { %1654 = vadd.xlane.f32.xlu0 %v1653_v59  ;;  %v6202_v59 = vpop.permute.xlu1 %2536 }
 0x38e   :  { %v6188_v43 = vpop.xlane.xlu0 %526 }
 0x390   :  { %1433 = vadd.xlane.f32.xlu1 %v1432_v38  ;;  %v552_v38 = vsel %vm461_vm2, %v8182_v7, 0.0  ;;  %v8183_v7 = vld [vmem:[#allocation142_spill] sm:$0xff] }
 0x391   :  { %1690 = vadd.xlane.f32.xlu0 %v1689_v19  ;;  %v6212_v10 = vpop.permute.xlu1 %2564  ;;  %v1644_v24 = vsel %vm461_vm2, %v8183_v7, 0.0 }
 0x392   :  { %v6196_v5 = vpop.xlane.xlu0 %602 }
 0x394   :  { %1475 = vadd.xlane.f32.xlu1 %v1474_v4  ;;  %v685_v4 = vsel %vm461_vm2, %v5909_v25, 0.0  ;;  %v8186_v25 = vld [vmem:[#allocation112_spill] sm:$0xff] }
 0x395   :  { %1696 = vadd.xlane.f32.xlu0 %v1695_v6 }
 0x396   :  { %v6204_v37 = vpop.xlane.xlu0 %608 }
 0x398   :  { %553 = vadd.xlane.f32.xlu1 %v552_v38  ;;  %v1447_v38 = vsel %vm461_vm2, %v8184_v30, 0.0  ;;  %v1659_v30 = vsel %vm461_vm2, %v6016_v50, 0.0  ;;  %v8190_v50 = vld [vmem:[#allocation49_spill] sm:$0xff] }
 0x399   :  { %644 = vadd.xlane.f32.xlu0 %v643_v62  ;;  %v6224_v62 = vpop.permute.xlu1 %2540 }
 0x39a   :  { %v6210_v19 = vpop.xlane.xlu0 %490 }
 0x39c   :  { %1639 = vadd.xlane.f32.xlu1 %v1638_v29  ;;  %v1489_v29 = vsel %vm461_vm2, %v8186_v25, 0.0 }
 0x39d   :  { %686 = vadd.xlane.f32.xlu0 %v685_v4  ;;  %v6234_v7 = vpop.permute.xlu1 %2568 }
 0x39e   :  { %v6218_v6 = vpop.xlane.xlu0 %532 }
 0x3a0   :  { %1645 = vadd.xlane.f32.xlu1 %v1644_v24  ;;  %v676_v24 = vsel %vm461_vm2, %v8187_v40, 0.0  ;;  %v8189_v40 = vld [vmem:[#allocation124_spill] sm:$0xff] }
 0x3a1   :  { %1448 = vadd.xlane.f32.xlu0 %v1447_v38  ;;  %v6246_v25 = vpop.permute.xlu1 %2544  ;;  %v1480_v54 = vsel %vm461_vm2, %v8189_v40, 0.0  ;;  %v1686_v40 = vsel %vm461_vm2, %v5936_v57, 0.0 }
 0x3a2   :  { %v6226_v47 = vpop.xlane.xlu0 %614 }
 0x3a4   :  { %635 = vadd.xlane.f32.xlu1 %v634_v35  ;;  %v1701_v35 = vsel %vm461_vm2, %v6020_v52, 0.0  ;;  %v1650_v52 = vsel %vm461_vm2, %v8192_v39, 0.0  ;;  %v8195_v39 = vld [vmem:[#allocation147_spill] sm:$0xff] }
 0x3a5   :  { %1490 = vadd.xlane.f32.xlu0 %v1489_v29  ;;  %v6256_v17 = vpop.permute.xlu1 %2572  ;;  %v1692_v60 = vsel %vm461_vm2, %v8195_v39, 0.0  ;;  %v8200_v39 = vld [vmem:[#allocation113_spill] sm:$0xff] }
 0x3a6   :  { %v6232_v4 = vpop.xlane.xlu0 %650  ;;  %8191 = vst [vmem:[#allocation66_spill] sm:$0xff] %v6256_v17 }
 0x3a8   :  { %677 = vadd.xlane.f32.xlu1 %v676_v24  ;;  %v2421_v24 = vsel %vm461_vm2, %v8190_v50, 0.0 }
 0x3a9   :  { %1660 = vadd.xlane.f32.xlu0 %v1659_v30  ;;  %v6268_v50 = vpop.permute.xlu1 %2576 }
 0x3aa   :  { %v6240_v38 = vpop.xlane.xlu0 %656  ;;  %8194 = vst [vmem:[#allocation96_spill] sm:$0xff] %v6268_v50 }
 0x3ac   :  { %1439 = vadd.xlane.f32.xlu1 %v1438_v18  ;;  %v8193_v18 = vld [vmem:[#allocation63_spill] sm:$0xff] }
 0x3ad   :  { %1702 = vadd.xlane.f32.xlu0 %v1701_v35  ;;  %v2427_v35 = vsel %vm461_vm2, %v8193_v18, 0.0  ;;  %v8196_v18 = vld [vmem:[#allocation16_spill] sm:$0xff] }
 0x3ae   :  { %v6248_v29 = vpop.xlane.xlu0 %496 }
 0x3b0   :  { %1481 = vadd.xlane.f32.xlu1 %v1480_v54  ;;  %v691_v54 = vsel %vm461_vm2, %v5932_v58, 0.0  ;;  %v8199_v58 = vld [vmem:[#allocation158_spill] sm:$0xff] }
 0x3b1   :  { %2422 = vadd.xlane.f32.xlu0 %v2421_v24 }
 0x3b2   :  { %v6254_v30 = vpop.xlane.xlu0 %538 }
 0x3b4   :  { %1651 = vadd.xlane.f32.xlu1 %v1650_v52  ;;  %v1019_v52 = vrot.slane %v6196_v5, %v8196_v18  ;;  %v640_v5 = vsel %vm461_vm2, %v8200_v39, 0.0  ;;  %v8203_v39 = vld [vmem:[#allocation86_spill] sm:$0xff] }
 0x3b5   :  { %2428 = vadd.xlane.f32.xlu0 %v2427_v35  ;;  %v8197_v35 = vld [vmem:[#allocation81_spill] sm:$0xff]  ;;  %v809_v55 = vrot.slane %v8203_v39, %v8196_v18 }
 0x3b6   :  { %v6262_v48 = vpop.xlane.xlu0 %620  ;;  %v1453_v28 = vsel %vm461_vm2, %v8197_v35, 0.0  ;;  %v8201_v35 = vld [vmem:[#allocation122_spill] sm:$0xff] }
 0x3b8   :  { %1687 = vadd.xlane.f32.xlu1 %v1686_v40  ;;  %v1015_v40 = vrot.slane %v8199_v58, %v8198_v56  ;;  %v8202_v58 = vld [vmem:[#allocation141_spill] sm:$0xff] }
 0x3b9   :  { %692 = vadd.xlane.f32.xlu0 %v691_v54  ;;  %v1028_v54 = vrot.slane %v6204_v37, %v8196_v18  ;;  %v1495_v31 = vsel %vm461_vm2, %v8202_v58, 0.0  ;;  %v827_v37 = vrot.slane %v6188_v43, %v8196_v18 }
 0x3ba   :  { %v6270_v24 = vpop.xlane.xlu0 %662 }
 0x3bc   :  { %1693 = vadd.xlane.f32.xlu1 %v1692_v60  ;;  %v818_v60 = vrot.slane %v8201_v35, %v8196_v18  ;;  %v8204_v35 = vld [vmem:[#allocation134_spill] sm:$0xff] }
 0x3bd   :  { %1454 = vadd.xlane.f32.xlu0 %v1453_v28  ;;  %v606_v57 = vpop.xlane.xlu1 %605  ;;  %v1020_v28 = vsel %vm737_vm3, %v1019_v52, %v1015_v40  ;;  %v814_v50 = vrot.slane %v8204_v35, %v8198_v56 }
 0x3be   :  { %v1024_v51 = vrot.slane %v606_v57, %v8198_v56  ;;  %v6283_v12 = vpop.xlane.xlu0 %1418 }
 0x3bf   :  { %v819_v39 = vsel %vm737_vm3, %v818_v60, %v814_v50  ;;  %v8208_v60 = vld [vmem:[#allocation69_spill] sm:$0xff] }
 0x3c0   :  { %v1029_v26 = vsel %vm737_vm3, %v1028_v54, %v1024_v51  ;;  %641 = vadd.xlane.f32.xlu1 %v640_v5  ;;  %v773_v51 = vrot.slane %v6210_v19, %v8196_v18  ;;  %v8205_v54 = vld [vmem:[#allocation136_spill] sm:$0xff]  ;;  %v1665_v19 = vsel %vm461_vm2, %v6026_v27, 0.0  ;;  %v1444_v27 = vsel %vm461_vm2, %v8208_v60, 0.0 }
 0x3c1   :  { %v1156_v57 = vsel %vm874_vm4, %v1029_v26, %v1020_v28  ;;  %1496 = vadd.xlane.f32.xlu0 %v1495_v31  ;;  %v488_v11 = vpop.xlane.xlu1 %487  ;;  %v823_v43 = vrot.slane %v8205_v54, %v8198_v56  ;;  %v8206_v5 = vld [vmem:[#allocation116_spill] sm:$0xff]  ;;  %v8207_v26 = vld [vmem:[#allocation98_spill] sm:$0xff] }
 0x3c2   :  { %v769_v52 = vrot.slane %v488_v11, %v8198_v56  ;;  %v6303_v40 = vpop.xlane.xlu0 %1424  ;;  %v682_v31 = vsel %vm461_vm2, %v8206_v5, 0.0  ;;  %v805_v28 = vrot.slane %v8207_v26, %v8198_v56  ;;  %v836_v5 = vrot.slane %v6218_v6, %v8196_v18 }
 0x3c3   :  { %v828_v11 = vsel %vm737_vm3, %v827_v37, %v823_v43  ;;  %v1037_v43 = vrot.slane %v6226_v47, %v8196_v18  ;;  %v8211_v47 = vld [vmem:[#allocation57_spill] sm:$0xff] }
 0x3c4   :  { %v6313_v58 = vsel %vm737_vm3, %v773_v51, %v769_v52  ;;  %683 = vadd.xlane.f32.xlu1 %v682_v31  ;;  %v810_v54 = vsel %vm737_vm3, %v809_v55, %v805_v28  ;;  %v1707_v55 = vsel %vm461_vm2, %v6032_v46, 0.0 }
 0x3c5   :  { %1666 = vadd.xlane.f32.xlu0 %v1665_v19  ;;  %v530_v35 = vpop.xlane.xlu1 %529  ;;  %v888_v50 = vsel %vm874_vm4, %v819_v39, %v810_v54  ;;  %v8209_v39 = vld [vmem:[#allocation100_spill] sm:$0xff] }
 0x3c6   :  { %v832_v26 = vrot.slane %v530_v35, %v8198_v56  ;;  %v6322_v32 = vpop.xlane.xlu0 %502  ;;  %v889_v37 = vsel %vm876_vm5, %v828_v11, %v888_v50  ;;  %v1486_v19 = vsel %vm461_vm2, %v8209_v39, 0.0  ;;  %v8210_v11 = vld [vmem:[#allocation65_spill] sm:$0xff]  ;;  %v1091_v50 = vrot.slane %v6232_v4, %v8196_v18 }
 0x3c7   :  { %v2433_v46 = vsel %vm461_vm2, %v8210_v11, 0.0  ;;  %v8217_v11 = vld [vmem:[#allocation85_spill] sm:$0xff] }
 0x3c8   :  { %v837_v51 = vsel %vm737_vm3, %v836_v5, %v832_v26  ;;  %1445 = vadd.xlane.f32.xlu1 %v1444_v27  ;;  %v746_v26 = vrot.slane %v8211_v47, %v8196_v18 }
 0x3c9   :  { %v6332_v6 = vsel %vm878_vm6, %v837_v51, %v889_v37  ;;  %1708 = vadd.xlane.f32.xlu0 %v1707_v55  ;;  %v612_v52 = vpop.xlane.xlu1 %611  ;;  %v8212_v37 = vld [vmem:[#allocation51_spill] sm:$0xff]  ;;  %v8213_v55 = vld [vmem:[#allocation61_spill] sm:$0xff] }
 0x3ca   :  { %v1033_v31 = vrot.slane %v612_v52, %v8198_v56  ;;  %v6337_v28 = vpop.xlane.xlu0 %544  ;;  %v736_v51 = vrot.slane %v8212_v37, %v8196_v18  ;;  %v755_v52 = vrot.slane %v8213_v55, %v8196_v18  ;;  %v8219_v37 = vld [vmem:[#allocation70_spill] sm:$0xff] }
 0x3cb   :  { %v751_v55 = vrot.slane %v8219_v37, %v8198_v56 }
 0x3cc   :  { %v1038_v5 = vsel %vm737_vm3, %v1037_v43, %v1033_v31  ;;  %1487 = vadd.xlane.f32.xlu1 %v1486_v19  ;;  %v8215_v31 = vld [vmem:[#allocation54_spill] sm:$0xff] }
 0x3cd   :  { %v6345_v35 = vsel %vm876_vm5, %v1038_v5, %v1156_v57  ;;  %2434 = vadd.xlane.f32.xlu0 %v2433_v46  ;;  %v648_v54 = vpop.xlane.xlu1 %647  ;;  %v8214_v57 = vld [vmem:[#allocation148_spill] sm:$0xff]  ;;  %v742_v39 = vrot.slane %v8215_v31, %v8198_v56  ;;  %v8216_v19 = vld [vmem:[#allocation90_spill] sm:$0xff]  ;;  %v2469_v46 = vsel %vm461_vm2, %v8217_v11, 0.0 }
 0x3ce   :  { %v1087_v60 = vrot.slane %v648_v54, %v8198_v56  ;;  %v6352_v27 = vpop.xlane.xlu0 %626  ;;  %v1656_v43 = vsel %vm461_vm2, %v8214_v57, 0.0  ;;  %v764_v5 = vrot.slane %v8216_v19, %v8196_v18  ;;  %v8218_v54 = vld [vmem:[#allocation46_spill] sm:$0xff] }
 0x3cf   :  { %v731_v47 = vrot.slane %v8218_v54, %v8198_v56  ;;  %v747_v17 = vsel %vm737_vm3, %v746_v26, %v742_v39  ;;  %v8220_v31 = vld [vmem:[#allocation102_spill] sm:$0xff]  ;;  %v8222_v39 = vld [vmem:[#allocation117_spill] sm:$0xff] }
 0x3d0   :  { %v1092_v4 = vsel %vm737_vm3, %v1091_v50, %v1087_v60  ;;  %1657 = vadd.xlane.f32.xlu1 %v1656_v43  ;;  %v760_v14 = vrot.slane %v8220_v31, %v8198_v56  ;;  %v1100_v50 = vrot.slane %v6240_v38, %v8196_v18  ;;  %v756_v43 = vsel %vm737_vm3, %v755_v52, %v751_v55  ;;  %v8221_v11 = vld [vmem:[#allocation150_spill] sm:$0xff] }
 0x3d1   :  { %2470 = vadd.xlane.f32.xlu0 %v2469_v46  ;;  %v654_v57 = vpop.xlane.xlu1 %653  ;;  %v1698_v54 = vsel %vm461_vm2, %v8221_v11, 0.0  ;;  %v738_v46 = vsel %vm737_vm3, %v736_v51, %v731_v47  ;;  %v2475_v31 = vsel %vm461_vm2, %v8222_v39, 0.0  ;;  %v782_v51 = vrot.slane %v6248_v29, %v8196_v18  ;;  %v8224_v11 = vld [vmem:[#allocation121_spill] sm:$0xff]  ;;  %v8225_v39 = vld [vmem:[#allocation48_spill] sm:$0xff] }
 0x3d2   :  { %v1096_v60 = vrot.slane %v654_v57, %v8198_v56  ;;  %v6377_v19 = vpop.xlane.xlu0 %668  ;;  %v765_v37 = vsel %vm737_vm3, %v764_v5, %v760_v14  ;;  %v875_v38 = vsel %vm874_vm4, %v747_v17, %v738_v46  ;;  %v845_v46 = vrot.slane %v6254_v30, %v8196_v18 }
 0x3d3   :  { %v877_v55 = vsel %vm876_vm5, %v756_v43, %v875_v38  ;;  %v1459_v43 = vsel %vm461_vm2, %v8224_v11, 0.0  ;;  %v8226_v38 = vld [vmem:[#allocation144_spill] sm:$0xff]  ;;  %v1046_v30 = vrot.slane %v6262_v48, %v8196_v18  ;;  %v1109_v48 = vrot.slane %v6270_v24, %v8196_v18 }
 0x3d4   :  { %v1101_v26 = vsel %vm737_vm3, %v1100_v50, %v1096_v60  ;;  %1699 = vadd.xlane.f32.xlu1 %v1698_v54  ;;  %v879_v47 = vsel %vm878_vm6, %v765_v37, %v877_v55  ;;  %v8223_v50 = vld [vmem:[#allocation45_spill] sm:$0xff]  ;;  %v1781_v24 = vrot.slane %v6283_v12, %v8196_v18 }
 0x3d5   :  { %v1163_v57 = vsel %vm874_vm4, %v1101_v26, %v1092_v4  ;;  %2476 = vadd.xlane.f32.xlu0 %v2475_v31  ;;  %v494_v52 = vpop.xlane.xlu1 %493  ;;  %v2418_v17 = vsel %vm461_vm2, %v8223_v50, 0.0  ;;  %v881_v4 = vsel %vm880_vm7, %v6313_v58, %v879_v47  ;;  %v2424_v58 = vsel %vm461_vm2, %v8225_v39, 0.0  ;;  %v8227_v50 = vld [vmem:[#allocation123_spill] sm:$0xff] }
 0x3d6   :  { %v778_v14 = vrot.slane %v494_v52, %v8198_v56  ;;  %v6393_v5 = vpop.xlane.xlu0 %1430  ;;  %v1501_v52 = vsel %vm461_vm2, %v8226_v38, 0.0 }
 0x3d8   :  { %v783_v60 = vsel %vm737_vm3, %v782_v51, %v778_v14  ;;  %2419 = vadd.xlane.f32.xlu1 %v2418_v17  ;;  %v688_v17 = vsel %vm461_vm2, %v8227_v50, 0.0 }
 0x3d9   :  { %v883_v29 = vsel %vm882_vm8, %v783_v60, %v881_v4  ;;  %1460 = vadd.xlane.f32.xlu0 %v1459_v43  ;;  %v536_v54 = vpop.xlane.xlu1 %535  ;;  %v1671_v60 = vsel %vm461_vm2, %v6040_v53, 0.0  ;;  %v1713_v53 = vsel %vm461_vm2, %v6048_v34, 0.0 }
 0x3da   :  { %v841_v37 = vrot.slane %v536_v54, %v8198_v56  ;;  %v6407_v26 = vpop.xlane.xlu0 %1466 }
 0x3dc   :  { %v846_v31 = vsel %vm737_vm3, %v845_v46, %v841_v37  ;;  %2425 = vadd.xlane.f32.xlu1 %v2424_v58  ;;  %v8228_v46 = vld [vmem:[#allocation71_spill] sm:$0xff] }
 0x3dd   :  { %v891_v55 = vsel %vm880_vm7, %v846_v31, %v6332_v6  ;;  %1502 = vadd.xlane.f32.xlu0 %v1501_v52  ;;  %v618_v51 = vpop.xlane.xlu1 %617  ;;  %v1450_v37 = vsel %vm461_vm2, %v8228_v46, 0.0  ;;  %v8229_v52 = vld [vmem:[#allocation126_spill] sm:$0xff] }
 0x3de   :  { %v1042_v14 = vrot.slane %v618_v51, %v8198_v56  ;;  %v6419_v47 = vpop.xlane.xlu0 %1472  ;;  %v1492_v51 = vsel %vm461_vm2, %v8229_v52, 0.0 }
 0x3e0   :  { %v1047_v4 = vsel %vm737_vm3, %v1046_v30, %v1042_v14  ;;  %689 = vadd.xlane.f32.xlu1 %v688_v17  ;;  %v8230_v14 = vld [vmem:[#allocation88_spill] sm:$0xff]  ;;  %v1790_v17 = vrot.slane %v6303_v40, %v8196_v18  ;;  %v791_v40 = vrot.slane %v6322_v32, %v8196_v18  ;;  %v854_v32 = vrot.slane %v6337_v28, %v8196_v18 }
 0x3e1   :  { %v1158_v6 = vsel %vm878_vm6, %v1047_v4, %v6345_v35  ;;  %1672 = vadd.xlane.f32.xlu0 %v1671_v60  ;;  %v660_v11 = vpop.xlane.xlu1 %659  ;;  %v2439_v34 = vsel %vm461_vm2, %v8230_v14, 0.0  ;;  %v8231_v60 = vld [vmem:[#allocation152_spill] sm:$0xff]  ;;  %v1055_v28 = vrot.slane %v6352_v27, %v8196_v18  ;;  %v1118_v27 = vrot.slane %v6377_v19, %v8196_v18 }
 0x3e2   :  { %v1105_v43 = vrot.slane %v660_v11, %v8198_v56  ;;  %v6431_v54 = vpop.xlane.xlu0 %508  ;;  %v1662_v11 = vsel %vm461_vm2, %v8231_v60, 0.0  ;;  %v1799_v19 = vrot.slane %v6393_v5, %v8196_v18  ;;  %v1853_v5 = vrot.slane %v6407_v26, %v8196_v18 }
 0x3e4   :  { %v1110_v39 = vsel %vm737_vm3, %v1109_v48, %v1105_v43  ;;  %1451 = vadd.xlane.f32.xlu1 %v1450_v37  ;;  %v8232_v43 = vld [vmem:[#allocation125_spill] sm:$0xff] }
 0x3e5   :  { %v1164_v35 = vsel %vm876_vm5, %v1110_v39, %v1163_v57  ;;  %1714 = vadd.xlane.f32.xlu0 %v1713_v53  ;;  %v1416_v58 = vpop.xlane.xlu1 %1415  ;;  %v2481_v46 = vsel %vm461_vm2, %v8232_v43, 0.0 }
 0x3e6   :  { %v1777_v31 = vrot.slane %v1416_v58, %v8198_v56  ;;  %v6442_v38 = vpop.xlane.xlu0 %550 }
 0x3e8   :  { %v1782_v30 = vsel %vm737_vm3, %v1781_v24, %v1777_v31  ;;  %1493 = vadd.xlane.f32.xlu1 %v1492_v51  ;;  %v8233_v24 = vld [vmem:[#allocation153_spill] sm:$0xff]  ;;  %v2613_v51 = vsel %vm461_vm2, %v6060_v9, 0.0  ;;  %v2619_v9 = vsel %vm461_vm2, %v6068_v49, 0.0 }
 0x3e9   :  { %2440 = vadd.xlane.f32.xlu0 %v2439_v34  ;;  %v1422_v57 = vpop.xlane.xlu1 %1421  ;;  %v1704_v31 = vsel %vm461_vm2, %v8233_v24, 0.0 }
 0x3ea   :  { %v1786_v12 = vrot.slane %v1422_v57, %v8198_v56  ;;  %v6452_v4 = vpop.xlane.xlu0 %632 }
 0x3ec   :  { %v1791_v48 = vsel %vm737_vm3, %v1790_v17, %v1786_v12  ;;  %1663 = vadd.xlane.f32.xlu1 %v1662_v11  ;;  %v8234_v17 = vld [vmem:[#allocation50_spill] sm:$0xff] }
 0x3ed   :  { %v1918_v37 = vsel %vm874_vm4, %v1791_v48, %v1782_v30  ;;  %2482 = vadd.xlane.f32.xlu0 %v2481_v46  ;;  %v500_v39 = vpop.xlane.xlu1 %499  ;;  %v2430_v12 = vsel %vm461_vm2, %v8234_v17, 0.0  ;;  %v8235_v46 = vld [vmem:[#allocation74_spill] sm:$0xff] }
 0x3ee   :  { %v787_v53 = vrot.slane %v500_v39, %v8198_v56  ;;  %v6463_v58 = vpop.xlane.xlu0 %674  ;;  %v2466_v39 = vsel %vm461_vm2, %v8235_v46, 0.0 }
 0x3f0   :  { %v792_v52 = vsel %vm737_vm3, %v791_v40, %v787_v53  ;;  %1705 = vadd.xlane.f32.xlu1 %v1704_v31  ;;  %v8236_v53 = vld [vmem:[#allocation154_spill] sm:$0xff] }
 0x3f1   :  { %v6471_v30 = vsel %vm884_vm9, %v792_v52, %v883_v29  ;;  %2614 = vadd.xlane.f32.xlu0 %v2613_v51  ;;  %v542_v14 = vpop.xlane.xlu1 %541  ;;  %v1507_v49 = vsel %vm461_vm2, %v8236_v53, 0.0  ;;  %v8237_v51 = vld [vmem:[#allocation105_spill] sm:$0xff] }
 0x3f2   :  { %v850_v34 = vrot.slane %v542_v14, %v8198_v56  ;;  %v6476_v57 = vpop.xlane.xlu0 %1436  ;;  %v2472_v14 = vsel %vm461_vm2, %v8237_v51, 0.0  ;;  %v8241_v51 = vld [vmem:[#allocation155_spill] sm:$0xff] }
 0x3f4   :  { %v855_v60 = vsel %vm737_vm3, %v854_v32, %v850_v34  ;;  %2431 = vadd.xlane.f32.xlu1 %v2430_v12  ;;  %v1677_v34 = vsel %vm461_vm2, %v6080_v23, 0.0  ;;  %v1719_v23 = vsel %vm461_vm2, %v6088_v8, 0.0 }
 0x3f5   :  { %v6484_v29 = vsel %vm882_vm8, %v855_v60, %v891_v55  ;;  %2620 = vadd.xlane.f32.xlu0 %v2619_v9  ;;  %v624_v11 = vpop.xlane.xlu1 %623  ;;  %v8238_v9 = vld [vmem:[#allocation108_spill] sm:$0xff] }
 0x3f6   :  { %v1051_v48 = vrot.slane %v624_v11, %v8198_v56  ;;  %v6489_v43 = vpop.xlane.xlu0 %1478  ;;  %v1456_v11 = vsel %vm461_vm2, %v8238_v9, 0.0 }
 0x3f8   :  { %v1056_v40 = vsel %vm737_vm3, %v1055_v28, %v1051_v48  ;;  %2467 = vadd.xlane.f32.xlu1 %v2466_v39 }
 0x3f9   :  { %v6497_v55 = vsel %vm880_vm7, %v1056_v40, %v1158_v6  ;;  %1508 = vadd.xlane.f32.xlu0 %v1507_v49  ;;  %v666_v24 = vpop.xlane.xlu1 %665  ;;  %v8239_v40 = vld [vmem:[#allocation129_spill] sm:$0xff] }
 0x3fa   :  { %v1114_v31 = vrot.slane %v666_v24, %v8198_v56  ;;  %v6502_v52 = vpop.xlane.xlu0 %556  ;;  %v1498_v53 = vsel %vm461_vm2, %v8239_v40, 0.0  ;;  %v8240_v24 = vld [vmem:[#allocation67_spill] sm:$0xff]  ;;  %v863_v40 = vrot.slane %v6442_v38, %v8196_v18  ;;  %v1064_v38 = vrot.slane %v6452_v4, %v8196_v18 }
 0x3fb   :  { %v2445_v8 = vsel %vm461_vm2, %v8240_v24, 0.0  ;;  %v8244_v24 = vld [vmem:[#allocation76_spill] sm:$0xff]  ;;  %v1127_v4 = vrot.slane %v6463_v58, %v8196_v18  ;;  %v1808_v58 = vrot.slane %v6476_v57, %v8196_v18  ;;  %v1871_v57 = vrot.slane %v6489_v43, %v8196_v18 }
 0x3fc   :  { %v1119_v32 = vsel %vm737_vm3, %v1118_v27, %v1114_v31  ;;  %2473 = vadd.xlane.f32.xlu1 %v2472_v14  ;;  %v1862_v27 = vrot.slane %v6419_v47, %v8196_v18  ;;  %v1668_v14 = vsel %vm461_vm2, %v8241_v51, 0.0  ;;  %v800_v47 = vrot.slane %v6431_v54, %v8196_v18 }
 0x3fd   :  { %v6510_v6 = vsel %vm878_vm6, %v1119_v32, %v1164_v35  ;;  %1678 = vadd.xlane.f32.xlu0 %v1677_v34  ;;  %v1428_v17 = vpop.xlane.xlu1 %1427  ;;  %v8242_v34 = vld [vmem:[#allocation146_spill] sm:$0xff]  ;;  %v872_v43 = vrot.slane %v6502_v52, %v8196_v18 }
 0x3fe   :  { %v1795_v12 = vrot.slane %v1428_v17, %v8198_v56  ;;  %v6515_v60 = vpop.xlane.xlu0 %1642  ;;  %v2487_v17 = vsel %vm461_vm2, %v8242_v34, 0.0 }
 0x3ff   :  { %v2056_v52 = vrot.slane %v6515_v60, %v8196_v18 }
 0x400   :  { %v1800_v28 = vsel %vm737_vm3, %v1799_v19, %v1795_v12  ;;  %1457 = vadd.xlane.f32.xlu1 %v1456_v11 }
 0x401   :  { %v6523_v35 = vsel %vm876_vm5, %v1800_v28, %v1918_v37  ;;  %1720 = vadd.xlane.f32.xlu0 %v1719_v23  ;;  %v1464_v48 = vpop.xlane.xlu1 %1463  ;;  %v8243_v28 = vld [vmem:[#allocation157_spill] sm:$0xff] }
 0x402   :  { %v1849_v46 = vrot.slane %v1464_v48, %v8198_v56  ;;  %v6528_v39 = vpop.xlane.xlu0 %1648  ;;  %v1710_v23 = vsel %vm461_vm2, %v8243_v28, 0.0 }
 0x404   :  { %v1854_v49 = vsel %vm737_vm3, %v1853_v5, %v1849_v46  ;;  %1499 = vadd.xlane.f32.xlu1 %v1498_v53  ;;  %v2625_v5 = vsel %vm461_vm2, %v6100_v21, 0.0  ;;  %v2661_v21 = vsel %vm461_vm2, %v6108_v15, 0.0  ;;  %v2667_v15 = vsel %vm461_vm2, %v6120_v22, 0.0 }
 0x405   :  { %2446 = vadd.xlane.f32.xlu0 %v2445_v8  ;;  %v1470_v37 = vpop.xlane.xlu1 %1469  ;;  %v2436_v8 = vsel %vm461_vm2, %v8244_v24, 0.0  ;;  %v1683_v22 = vsel %vm461_vm2, %v6128_v20, 0.0  ;;  %v1725_v20 = vsel %vm461_vm2, %v6140_v42, 0.0  ;;  %v8249_v42 = vld [vmem:[#allocation92_spill] sm:$0xff] }
 0x406   :  { %v1858_v26 = vrot.slane %v1470_v37, %v8198_v56  ;;  %v6538_v31 = vpop.xlane.xlu0 %638 }
 0x408   :  { %v1863_v32 = vsel %vm737_vm3, %v1862_v27, %v1858_v26  ;;  %1669 = vadd.xlane.f32.xlu1 %v1668_v14  ;;  %v8245_v14 = vld [vmem:[#allocation110_spill] sm:$0xff] }
 0x409   :  { %v1925_v19 = vsel %vm874_vm4, %v1863_v32, %v1854_v49  ;;  %2488 = vadd.xlane.f32.xlu0 %v2487_v17  ;;  %v506_v12 = vpop.xlane.xlu1 %505  ;;  %v2478_v32 = vsel %vm461_vm2, %v8245_v14, 0.0  ;;  %v2451_v14 = vsel %vm461_vm2, %v8249_v42, 0.0 }
 0x40a   :  { %v796_v9 = vrot.slane %v506_v12, %v8198_v56  ;;  %v6549_v11 = vpop.xlane.xlu0 %680 }
 0x40c   :  { %v801_v48 = vsel %vm737_vm3, %v800_v47, %v796_v9  ;;  %1711 = vadd.xlane.f32.xlu1 %v1710_v23  ;;  %v8246_v9 = vld [vmem:[#allocation159_spill] sm:$0xff] }
 0x40d   :  { %v6558_v46 = vsel %vm886_vm10, %v801_v48, %v6471_v30  ;;  %2626 = vadd.xlane.f32.xlu0 %v2625_v5  ;;  %v548_v54 = vpop.xlane.xlu1 %547  ;;  %v2610_v28 = vsel %vm461_vm2, %v8246_v9, 0.0  ;;  %v8251_v9 = vld [vmem:[#allocation128_spill] sm:$0xff] }
 0x40e   :  { %v859_v53 = vrot.slane %v548_v54, %v8198_v56  ;;  %v6563_v49 = vpop.xlane.xlu0 %1442 }
 0x410   :  { %v864_v37 = vsel %vm737_vm3, %v863_v40, %v859_v53  ;;  %2437 = vadd.xlane.f32.xlu1 %v2436_v8  ;;  %v8247_v40 = vld [vmem:[#allocation160_spill] sm:$0xff] }
 0x411   :  { %v893_v30 = vsel %vm884_vm9, %v864_v37, %v6484_v29  ;;  %2662 = vadd.xlane.f32.xlu0 %v2661_v21  ;;  %v630_v27 = vpop.xlane.xlu1 %629  ;;  %v2616_v53 = vsel %vm461_vm2, %v8247_v40, 0.0 }
 0x412   :  { %v1060_v26 = vrot.slane %v630_v27, %v8198_v56  ;;  %v6575_v51 = vpop.xlane.xlu0 %1484  ;;  %v8248_v27 = vld [vmem:[#allocation137_spill] sm:$0xff] }
 0x414   :  { %v1065_v34 = vsel %vm737_vm3, %v1064_v38, %v1060_v26  ;;  %2479 = vadd.xlane.f32.xlu1 %v2478_v32  ;;  %v1504_v38 = vsel %vm461_vm2, %v8248_v27, 0.0  ;;  %v2673_v27 = vsel %vm461_vm2, %v6160_v2, 0.0  ;;  %v1731_v2 = vsel %vm461_vm2, %v6168_v44, 0.0  ;;  %v8255_v44 = vld [vmem:[#allocation95_spill] sm:$0xff] }
 0x415   :  { %v6584_v29 = vsel %vm882_vm8, %v1065_v34, %v6497_v55  ;;  %2668 = vadd.xlane.f32.xlu0 %v2667_v15  ;;  %v672_v17 = vpop.xlane.xlu1 %671 }
 0x416   :  { %v1123_v12 = vrot.slane %v672_v17, %v8198_v56  ;;  %v6589_v47 = vpop.xlane.xlu0 %1654  ;;  %v8250_v17 = vld [vmem:[#allocation161_spill] sm:$0xff] }
 0x418   :  { %v1128_v23 = vsel %vm737_vm3, %v1127_v4, %v1123_v12  ;;  %2611 = vadd.xlane.f32.xlu1 %v2610_v28  ;;  %v1674_v4 = vsel %vm461_vm2, %v8250_v17, 0.0  ;;  %v2493_v28 = vsel %vm461_vm2, %v8251_v9, 0.0  ;;  %v2622_v9 = vsel %vm461_vm2, %v6024_v3, 0.0 }
 0x419   :  { %v6598_v55 = vsel %vm880_vm7, %v1128_v23, %v6510_v6  ;;  %1684 = vadd.xlane.f32.xlu0 %v1683_v22  ;;  %v1434_v48 = vpop.xlane.xlu1 %1433  ;;  %v2658_v3 = vsel %vm461_vm2, %v6030_v41, 0.0  ;;  %v2664_v41 = vsel %vm461_vm2, %v6042_v13, 0.0  ;;  %v1680_v13 = vsel %vm461_vm2, %v6052_v0, 0.0 }
 0x41a   :  { %v1804_v5 = vrot.slane %v1434_v48, %v8198_v56  ;;  %v6603_v54 = vpop.xlane.xlu0 %1690  ;;  %v1722_v0 = vsel %vm461_vm2, %v6062_v1, 0.0 }
 0x41c   :  { %v1809_v24 = vsel %vm737_vm3, %v1808_v58, %v1804_v5  ;;  %2617 = vadd.xlane.f32.xlu1 %v2616_v53  ;;  %v8252_v58 = vld [vmem:[#allocation162_spill] sm:$0xff]  ;;  %v2631_v53 = vsel %vm461_vm2, %v6148_v61, 0.0 }
 0x41d   :  { %v6612_v6 = vsel %vm878_vm6, %v1809_v24, %v6523_v35  ;;  %1726 = vadd.xlane.f32.xlu0 %v1725_v20  ;;  %v1476_v8 = vpop.xlane.xlu1 %1475  ;;  %v1716_v5 = vsel %vm461_vm2, %v8252_v58, 0.0  ;;  %v2065_v24 = vrot.slane %v6528_v39, %v8196_v18  ;;  %v1073_v39 = vrot.slane %v6538_v31, %v8196_v18 }
 0x41e   :  { %v1867_v37 = vrot.slane %v1476_v8, %v8198_v56  ;;  %v6617_v21 = vpop.xlane.xlu0 %1696  ;;  %v8253_v8 = vld [vmem:[#allocation52_spill] sm:$0xff]  ;;  %v1136_v31 = vrot.slane %v6549_v11, %v8196_v18  ;;  %v1817_v11 = vrot.slane %v6563_v49, %v8196_v18  ;;  %v1880_v49 = vrot.slane %v6575_v51, %v8196_v18 }
 0x41f   :  { %v2074_v51 = vrot.slane %v6589_v47, %v8196_v18  ;;  %v2128_v47 = vrot.slane %v6603_v54, %v8196_v18 }
 0x420   :  { %v1872_v26 = vsel %vm737_vm3, %v1871_v57, %v1867_v37  ;;  %1505 = vadd.xlane.f32.xlu1 %v1504_v38  ;;  %v2442_v57 = vsel %vm461_vm2, %v8253_v8, 0.0 }
 0x421   :  { %v6625_v35 = vsel %vm876_vm5, %v1872_v26, %v1925_v19  ;;  %2452 = vadd.xlane.f32.xlu0 %v2451_v14  ;;  %v554_v32 = vpop.xlane.xlu1 %553  ;;  %v8254_v14 = vld [vmem:[#allocation131_spill] sm:$0xff] }
 0x422   :  { %v6629_v34 = vpop.xlane.xlu0 %644  ;;  %v868_v15 = vrot.slane %v554_v32, %v8198_v56  ;;  %v2484_v32 = vsel %vm461_vm2, %v8254_v14, 0.0 }
 0x424   :  { %v873_v12 = vsel %vm737_vm3, %v872_v43, %v868_v15  ;;  %1675 = vadd.xlane.f32.xlu1 %v1674_v4 }
 0x425   :  { %v6638_v19 = vsel %vm886_vm10, %v873_v12, %v893_v30  ;;  %2494 = vadd.xlane.f32.xlu0 %v2493_v28  ;;  %v1640_v23 = vpop.xlane.xlu1 %1639 }
 0x426   :  { %v6642_v22 = vpop.xlane.xlu0 %686  ;;  %v2052_v48 = vrot.slane %v1640_v23, %v8198_v56  ;;  %v2457_v23 = vsel %vm461_vm2, %v8255_v44, 0.0  ;;  %v8259_v44 = vld [vmem:[#allocation151_spill] sm:$0xff] }
 0x428   :  { %v2057_v40 = vsel %vm737_vm3, %v2056_v52, %v2052_v48  ;;  %1717 = vadd.xlane.f32.xlu1 %v1716_v5 }
 0x429   :  { %2632 = vadd.xlane.f32.xlu0 %v2631_v53  ;;  %v1646_v30 = vpop.xlane.xlu1 %1645 }
 0x42a   :  { %v6652_v20 = vpop.xlane.xlu0 %1448  ;;  %v2061_v60 = vrot.slane %v1646_v30, %v8198_v56 }
 0x42c   :  { %v2066_v37 = vsel %vm737_vm3, %v2065_v24, %v2061_v60  ;;  %2443 = vadd.xlane.f32.xlu1 %v2442_v57  ;;  %v2637_v57 = vsel %vm461_vm2, %v6180_v33, 0.0  ;;  %v2679_v33 = vsel %vm461_vm2, %v6190_v16, 0.0 }
 0x42d   :  { %v2193_v61 = vsel %vm874_vm4, %v2066_v37, %v2057_v40  ;;  %2674 = vadd.xlane.f32.xlu0 %v2673_v27  ;;  %v636_v38 = vpop.xlane.xlu1 %635  ;;  %v8256_v40 = vld [vmem:[#allocation149_spill] sm:$0xff] }
 0x42e   :  { %v6663_v26 = vpop.xlane.xlu0 %1490  ;;  %v1069_v42 = vrot.slane %v636_v38, %v8198_v56  ;;  %v2499_v53 = vsel %vm461_vm2, %v8256_v40, 0.0  ;;  %v8260_v40 = vld [vmem:[#allocation115_spill] sm:$0xff] }
 0x430   :  { %v1074_v43 = vsel %vm737_vm3, %v1073_v39, %v1069_v42  ;;  %2485 = vadd.xlane.f32.xlu1 %v2484_v32 }
 0x431   :  { %v6673_v15 = vsel %vm884_vm9, %v1074_v43, %v6584_v29  ;;  %1732 = vadd.xlane.f32.xlu0 %v1731_v2  ;;  %v678_v17 = vpop.xlane.xlu1 %677  ;;  %v8257_v2 = vld [vmem:[#allocation132_spill] sm:$0xff] }
 0x432   :  { %v6677_v4 = vpop.xlane.xlu0 %1660  ;;  %v1132_v12 = vrot.slane %v678_v17, %v8198_v56  ;;  %v2463_v16 = vsel %vm461_vm2, %v8257_v2, 0.0  ;;  %v2137_v17 = vrot.slane %v6617_v21, %v8196_v18 }
 0x434   :  { %v1137_v28 = vsel %vm737_vm3, %v1136_v31, %v1132_v12  ;;  %2623 = vadd.xlane.f32.xlu1 %v2622_v9  ;;  %v6745_v12 = vpop.f32.mrf.mxu1  ;;  %v8258_v9 = vld [vmem:[#allocation80_spill] sm:$0xff] }
 0x435   :  { %v6687_v29 = vsel %vm882_vm8, %v1137_v28, %v6598_v55  ;;  %2458 = vadd.xlane.f32.xlu0 %v2457_v23  ;;  %v1440_v52 = vpop.xlane.xlu1 %1439  ;;  %v2448_v1 = vsel %vm461_vm2, %v8258_v9, 0.0  ;;  %v2505_v23 = vsel %vm461_vm2, %v8259_v44, 0.0  ;;  %v2655_v44 = vsel %vm461_vm2, %v6246_v25, 0.0 }
 0x436   :  { %v6691_v48 = vpop.xlane.xlu0 %1702  ;;  %v1813_v58 = vrot.slane %v1440_v52, %v8198_v56  ;;  %v1145_v25 = vrot.slane %v6642_v22, %v8196_v18 }
 0x438   :  { %v1818_v5 = vsel %vm737_vm3, %v1817_v11, %v1813_v58  ;;  %2659 = vadd.xlane.f32.xlu1 %v2658_v3  ;;  %v1082_v11 = vrot.slane %v6629_v34, %v8196_v18 }
 0x439   :  { %v6701_v55 = vsel %vm880_vm7, %v1818_v5, %v6612_v6  ;;  %2500 = vadd.xlane.f32.xlu0 %v2499_v53  ;;  %v1482_v30 = vpop.xlane.xlu1 %1481  ;;  %v971_v5 = vpop.f32.mrf.mxu1  ;;  %v2490_v53 = vsel %vm461_vm2, %v8260_v40, 0.0 }
 0x43a   :  { %v6705_v24 = vpop.xlane.xlu0 %2422  ;;  %v1876_v60 = vrot.slane %v1482_v30, %v8198_v56 }
 0x43c   :  { %v1881_v8 = vsel %vm737_vm3, %v1880_v49, %v1876_v60  ;;  %2665 = vadd.xlane.f32.xlu1 %v2664_v41  ;;  %v2643_v49 = vsel %vm461_vm2, %v6202_v59, 0.0  ;;  %v972_v60 = vadd.f32 %v971_v5, %v6558_v46  ;;  %v1826_v46 = vrot.slane %v6652_v20, %v8196_v18 }
 0x43d   :  { %v6715_v6 = vsel %vm878_vm6, %v1881_v8, %v6625_v35  ;;  %2638 = vadd.xlane.f32.xlu0 %v2637_v57  ;;  %v1652_v37 = vpop.xlane.xlu1 %1651  ;;  %v1889_v20 = vrot.slane %v6663_v26, %v8196_v18  ;;  %v2083_v26 = vrot.slane %v6677_v4, %v8196_v18 }
 0x43e   :  { %v6719_v27 = vpop.xlane.xlu0 %2428  ;;  %v2070_v38 = vrot.slane %v1652_v37, %v8198_v56  ;;  %v2628_v37 = vsel %vm461_vm2, %v6072_v63, 0.0 }
 0x440   :  { %v2075_v39 = vsel %vm737_vm3, %v2074_v51, %v2070_v38  ;;  %1681 = vadd.xlane.f32.xlu1 %v1680_v13  ;;  %v2685_v51 = vsel %vm461_vm2, %v6212_v10, 0.0  ;;  %v2670_v13 = vsel %vm461_vm2, %v6082_v36, 0.0  ;;  %v1728_v36 = vsel %vm461_vm2, %v6092_v45, 0.0  ;;  %v8262_v45 = vld [vmem:[#allocation83_spill] sm:$0xff] }
 0x441   :  { %v6728_v35 = vsel %vm876_vm5, %v2075_v39, %v2193_v61  ;;  %2680 = vadd.xlane.f32.xlu0 %v2679_v33  ;;  %v1688_v42 = vpop.xlane.xlu1 %1687  ;;  %v8261_v33 = vld [vmem:[#allocation156_spill] sm:$0xff] }
 0x442   :  { %v6732_v14 = vpop.xlane.xlu0 %692  ;;  %v2124_v32 = vrot.slane %v1688_v42, %v8198_v56  ;;  %v2511_v63 = vsel %vm461_vm2, %v8261_v33, 0.0  ;;  %v977_v33 = vadd.f32 %v6745_v12, %v6638_v19 }
 0x444   :  { %v2129_v43 = vsel %vm737_vm3, %v2128_v47, %v2124_v32  ;;  %1723 = vadd.xlane.f32.xlu1 %v1722_v0 }
 0x445   :  { %2464 = vadd.xlane.f32.xlu0 %v2463_v16  ;;  %v1694_v61 = vpop.xlane.xlu1 %1693 }
 0x446   :  { %v6742_v31 = vpop.xlane.xlu0 %1454  ;;  %v2133_v54 = vrot.slane %v1694_v61, %v8198_v56 }
 0x448   :  { %v2138_v28 = vsel %vm737_vm3, %v2137_v17, %v2133_v54  ;;  %2449 = vadd.xlane.f32.xlu1 %v2448_v1  ;;  %v2454_v17 = vsel %vm461_vm2, %v8262_v45, 0.0  ;;  %v8263_v1 = vld [vmem:[#allocation133_spill] sm:$0xff] }
 0x449   :  { %v6753_v52 = vsel %vm874_vm4, %v2138_v28, %v2129_v43  ;;  %2506 = vadd.xlane.f32.xlu0 %v2505_v23  ;;  %v642_v21 = vpop.xlane.xlu1 %641  ;;  %v2649_v43 = vsel %vm461_vm2, %v6224_v62, 0.0  ;;  %v2691_v62 = vsel %vm461_vm2, %v6234_v7, 0.0  ;;  %v2496_v28 = vsel %vm461_vm2, %v8263_v1, 0.0 }
 0x44a   :  { %v6757_v58 = vpop.xlane.xlu0 %1496  ;;  %v1078_v3 = vrot.slane %v642_v21, %v8198_v56  ;;  %v8264_v21 = vld [vmem:[#allocation163_spill] sm:$0xff] }
 0x44c   :  { %v1083_v30 = vsel %vm737_vm3, %v1082_v11, %v1078_v3  ;;  %2491 = vadd.xlane.f32.xlu1 %v2490_v53  ;;  %v8265_v11 = vld [vmem:[#allocation66_spill] sm:$0xff] }
 0x44d   :  { %2644 = vadd.xlane.f32.xlu0 %v2643_v49  ;;  %v684_v41 = vpop.xlane.xlu1 %683  ;;  %v1162_v34 = vsel %vm886_vm10, %v1083_v30, %v6673_v15  ;;  %v2697_v3 = vsel %vm461_vm2, %v8265_v11, 0.0  ;;  %v8266_v30 = vld [vmem:[#allocation164_spill] sm:$0xff]  ;;  %v8274_v11 = vld [vmem:[#allocation167_spill] sm:$0xff] }
 0x44e   :  { %v6768_v8 = vpop.xlane.xlu0 %1666  ;;  %v6770_v57 = vadd.f32 %v1162_v34, %v972_v60  ;;  %v1141_v5 = vrot.slane %v684_v41, %v8198_v56  ;;  %v2676_v49 = vsel %vm461_vm2, %v8266_v30, 0.0  ;;  %v8267_v60 = vld [vmem:[#allocation96_spill] sm:$0xff]  ;;  %v1154_v41 = vrot.slane %v6732_v14, %v8196_v18  ;;  %v6863_v14 = vld [vmem:[%s7919_s1 + $0x8] sm:$0xff] }
 0x44f   :  { %v2703_v34 = vsel %vm461_vm2, %v8267_v60, 0.0  ;;  %v8275_v30 = vld [vmem:[#allocation168_spill] sm:$0xff] }
 0x450   :  { %2629 = vadd.xlane.f32.xlu1 %v2628_v37  ;;  %v1146_v37 = vsel %vm737_vm3, %v1145_v25, %v1141_v5 }
 0x451   :  { %2686 = vadd.xlane.f32.xlu0 %v2685_v51  ;;  %v1446_v59 = vpop.xlane.xlu1 %1445 }
 0x452   :  { %v6778_v38 = vpop.xlane.xlu0 %1708  ;;  %v1822_v15 = vrot.slane %v1446_v59, %v8198_v56 }
 0x454   :  { %v1827_v39 = vsel %vm737_vm3, %v1826_v46, %v1822_v15  ;;  %2671 = vadd.xlane.f32.xlu1 %v2670_v13  ;;  %v8268_v15 = vld [vmem:[#allocation119_spill] sm:$0xff]  ;;  %v1168_v13 = vsel %vm884_vm9, %v1146_v37, %v6687_v29  ;;  %v8276_v37 = vld [vmem:[#allocation169_spill] sm:$0xff] }
 0x455   :  { %v6788_v10 = vsel %vm882_vm8, %v1827_v39, %v6701_v55  ;;  %2512 = vadd.xlane.f32.xlu0 %v2511_v63  ;;  %v1488_v42 = vpop.xlane.xlu1 %1487  ;;  %v2460_v22 = vsel %vm461_vm2, %v8268_v15, 0.0  ;;  %v8277_v15 = vld [vmem:[#allocation170_spill] sm:$0xff] }
 0x456   :  { %v6792_v47 = vpop.xlane.xlu0 %2434  ;;  %v1885_v32 = vrot.slane %v1488_v42, %v8198_v56 }
 0x458   :  { %v1890_v0 = vsel %vm737_vm3, %v1889_v20, %v1885_v32  ;;  %1729 = vadd.xlane.f32.xlu1 %v1728_v36  ;;  %v8269_v36 = vld [vmem:[#allocation135_spill] sm:$0xff] }
 0x459   :  { %v6802_v55 = vsel %vm880_vm7, %v1890_v0, %v6715_v6  ;;  %2650 = vadd.xlane.f32.xlu0 %v2649_v43  ;;  %v1658_v2 = vpop.xlane.xlu1 %1657  ;;  %v2502_v29 = vsel %vm461_vm2, %v8269_v36, 0.0 }
 0x45a   :  { %v6806_v16 = vpop.xlane.xlu0 %2470  ;;  %v2079_v61 = vrot.slane %v1658_v2, %v8198_v56  ;;  %v8271_v2 = vld [vmem:[#allocation165_spill] sm:$0xff] }
 0x45c   :  { %v2084_v54 = vsel %vm737_vm3, %v2083_v26, %v2079_v61  ;;  %2455 = vadd.xlane.f32.xlu1 %v2454_v17  ;;  %v2640_v26 = vsel %vm461_vm2, %v8271_v2, 0.0  ;;  %v8272_v17 = vld [vmem:[#allocation166_spill] sm:$0xff] }
 0x45d   :  { %v6816_v6 = vsel %vm878_vm6, %v2084_v54, %v6728_v35  ;;  %2692 = vadd.xlane.f32.xlu0 %v2691_v62  ;;  %v6818_v9 = vpop.xlane.xlu1 %1699  ;;  %v2634_v35 = vsel %vm461_vm2, %v8264_v21, 0.0  ;;  %v2682_v54 = vsel %vm461_vm2, %v8272_v17, 0.0 }
 0x45e   :  { %v6820_v4 = vpop.xlane.xlu0 %2476 }
 0x460   :  { %2497 = vadd.xlane.f32.xlu1 %v2496_v28  ;;  %v8273_v28 = vld [vmem:[#allocation139_spill] sm:$0xff] }
 0x461   :  { %2656 = vadd.xlane.f32.xlu0 %v2655_v44  ;;  %v6826_v23 = vpop.xlane.xlu1 %2419  ;;  %v2508_v44 = vsel %vm461_vm2, %v8273_v28, 0.0 }
 0x462   :  { %v6828_v7 = vpop.xlane.xlu0 %1460 }
 0x464   :  { %2635 = vadd.xlane.f32.xlu1 %v2634_v35 }
 0x465   :  { %2698 = vadd.xlane.f32.xlu0 %v2697_v3  ;;  %v6835_v40 = vpop.xlane.xlu1 %2425  ;;  %v2646_v3 = vsel %vm461_vm2, %v8274_v11, 0.0 }
 0x466   :  { %v6837_v53 = vpop.xlane.xlu0 %1502 }
 0x468   :  { %2677 = vadd.xlane.f32.xlu1 %v2676_v49  ;;  %v2688_v49 = vsel %vm461_vm2, %v8275_v30, 0.0 }
 0x469   :  { %2704 = vadd.xlane.f32.xlu0 %v2703_v34  ;;  %v690_v51 = vpop.xlane.xlu1 %689 }
 0x46a   :  { %v6848_v59 = vpop.xlane.xlu0 %1672  ;;  %v1150_v46 = vrot.slane %v690_v51, %v8198_v56  ;;  %v2652_v51 = vsel %vm461_vm2, %v8276_v37, 0.0 }
 0x46c   :  { %v1155_v39 = vsel %vm737_vm3, %v1154_v41, %v1150_v46  ;;  %2461 = vadd.xlane.f32.xlu1 %v2460_v22  ;;  %v2694_v22 = vsel %vm461_vm2, %v8277_v15, 0.0 }
 0x46d   :  { %v6858_v63 = vpop.xlane.xlu1 %1451  ;;  %v1169_v42 = vsel %vm886_vm10, %v1155_v39, %v1168_v13  ;;  %v6916_v13 = vld [vmem:[%s7919_s1] sm:$0xff] }
 0x46e   :  { %v6866_v20 = vpop.xlane.xlu0 %1714  ;;  %v1173_v32 = vadd.f32 %v1169_v42, %v977_v33  ;;  %v8279_v42 = vld [vmem:[#allocation60_spill] sm:$0xff]  ;;  %v6926_v36 = vadd.f32 %v6770_v57, %v6916_v13 }
 0x470   :  { %2503 = vadd.xlane.f32.xlu1 %v2502_v29  ;;  %v6871_v0 = vadd.f32 %v1173_v32, %v6863_v14  ;;  %v2700_v32 = vsel %vm461_vm2, %v8279_v42, 0.0  ;;  %8280 = vst [vmem:[#allocation112_spill] sm:$0xff] %v6926_v36  ;;  %v1177_v2 = vsel %vm1176_vm11, %v6926_v36, -inf }
 0x471   :  { %v6873_v19 = vpop.xlane.xlu1 %1493 }
 0x472   :  { %8270 = vst [vmem:[#allocation142_spill] sm:$0xff] %v6871_v0  ;;  %v6875_v12 = vpop.xlane.xlu0 %2440  ;;  %v1180_v43 = vsel %vm1176_vm11, %v6871_v0, -inf }
 0x473   :  { %1181 = vmax.xlane.f32.xlu0 %v1180_v43 }
 0x474   :  { %2641 = vadd.xlane.f32.xlu1 %v2640_v26 }
 0x475   :  { %v6881_v61 = vpop.xlane.xlu1 %1663 }
 0x476   :  { %v6883_v45 = vpop.xlane.xlu0 %2482 }
 0x478   :  { %2683 = vadd.xlane.f32.xlu1 %v2682_v54 }
 0x479   :  { %v6887_v62 = vpop.xlane.xlu1 %1705 }
 0x47a   :  { %v6889_v1 = vpop.xlane.xlu0 %2614 }
 0x47c   :  { %2509 = vadd.xlane.f32.xlu1 %v2508_v44 }
 0x47d   :  { %v6893_v21 = vpop.xlane.xlu1 %2431 }
 0x47e   :  { %v6895_v35 = vpop.xlane.xlu0 %2620 }
 0x480   :  { %2647 = vadd.xlane.f32.xlu1 %v2646_v3 }
 0x481   :  { %v6899_v5 = vpop.xlane.xlu1 %2467 }
 0x482   :  { %v6901_v25 = vpop.xlane.xlu0 %1508 }
 0x484   :  { %2689 = vadd.xlane.f32.xlu1 %v2688_v49 }
 0x485   :  { %v6905_v60 = vpop.xlane.xlu1 %2473 }
 0x486   :  { %v1679_v34 = vpop.xlane.xlu0 %1678 }
 0x488   :  { %2653 = vadd.xlane.f32.xlu1 %v2652_v51 }
 0x489   :  { %v1458_v41 = vpop.xlane.xlu1 %1457 }
 0x48a   :  { %v6909_v46 = vpop.xlane.xlu0 %1720 }
 0x48c   :  { %2695 = vadd.xlane.f32.xlu1 %v2694_v22 }
 0x48d   :  { %v6918_v39 = vpop.xlane.xlu1 %1499 }
 0x48e   :  { %v6920_v33 = vpop.xlane.xlu0 %2446 }
 0x48f   :  { %8278 = vst [vmem:[#allocation78_spill] sm:$0xff] %v6920_v33  ;;  %v1844_v33 = vrot.slane %v6828_v7, %v8196_v18 }
 0x490   :  { %2701 = vadd.xlane.f32.xlu1 %v2700_v32 }
 0x491   :  { %v1670_v29 = vpop.xlane.xlu1 %1669 }
 0x492   :  { %v6928_v43 = vpop.xlane.xlu0 %2488 }
 0x493   :  { %8281 = vst [vmem:[#allocation47_spill] sm:$0xff] %v6928_v43  ;;  %v2088_v43 = vrot.slane %v6881_v61, %v8198_v56 }
 0x494   :  { %1178 = vmax.xlane.f32.xlu1 %v1177_v2 }
 0x495   :  { %v6932_v26 = vpop.xlane.xlu1 %1711 }
 0x496   :  { %v6934_v17 = vpop.xlane.xlu0 %2626 }
 0x497   :  { %8282 = vst [vmem:[#allocation124_spill] sm:$0xff] %v6934_v17  ;;  %v1840_v17 = vrot.slane %v1458_v41, %v8198_v56 }
 0x499   :  { %v6936_v54 = vpop.xlane.xlu1 %2437 }
 0x49a   :  { %v6938_v28 = vpop.xlane.xlu0 %2662 }
 0x49b   :  { %8283 = vst [vmem:[#allocation49_spill] sm:$0xff] %v6938_v28 }
 0x49d   :  { %v6940_v44 = vpop.xlane.xlu1 %2479 }
 0x49e   :  { %v6942_v57 = vpop.xlane.xlu0 %2668 }
 0x49f   :  { %8284 = vst [vmem:[#allocation143_spill] sm:$0xff] %v6942_v57 }
 0x4a1   :  { %v6944_v11 = vpop.xlane.xlu1 %2611 }
 0x4a2   :  { %v1685_v3 = vpop.xlane.xlu0 %1684 }
 0x4a5   :  { %v6946_v30 = vpop.xlane.xlu1 %2617 }
 0x4a6   :  { %v6948_v49 = vpop.xlane.xlu0 %1726 }
 0x4a9   :  { %v6950_v37 = vpop.xlane.xlu1 %1505 }
 0x4aa   :  { %v6952_v51 = vpop.xlane.xlu0 %2452 }
 0x4ab   :  { %8285 = vst [vmem:[#allocation63_spill] sm:$0xff] %v6952_v51  ;;  %v1831_v51 = vrot.slane %v6858_v63, %v8198_v56  ;;  %v2092_v63 = vrot.slane %v6768_v8, %v8196_v18 }
 0x4ad   :  { %v1676_v15 = vpop.xlane.xlu1 %1675  ;;  %v2093_v7 = vsel %vm737_vm3, %v2092_v63, %v2088_v43 }
 0x4ae   :  { %v6954_v22 = vpop.xlane.xlu0 %2494  ;;  %v2106_v41 = vrot.slane %v1676_v15, %v8198_v56 }
 0x4af   :  { %8286 = vst [vmem:[#allocation147_spill] sm:$0xff] %v6954_v22 }
 0x4b1   :  { %v6956_v42 = vpop.xlane.xlu1 %1717 }
 0x4b2   :  { %v6958_v32 = vpop.xlane.xlu0 %2632 }
 0x4b3   :  { %8287 = vst [vmem:[#allocation16_spill] sm:$0xff] %v6958_v32 }
 0x4b5   :  { %v6960_v2 = vpop.xlane.xlu1 %2443 }
 0x4b6   :  { %v6962_v50 = vpop.xlane.xlu0 %2674 }
 0x4b7   :  { %8288 = vst [vmem:[#allocation81_spill] sm:$0xff] %v6962_v50  ;;  %v1835_v50 = vrot.slane %v6742_v31, %v8196_v18  ;;  %v2101_v31 = vrot.slane %v6848_v59, %v8196_v18 }
 0x4b9   :  { %v6964_v36 = vpop.xlane.xlu1 %2485 }
 0x4ba   :  { %8289 = vst [vmem:[#allocation15_spill] sm:$0xff] %v6964_v36  ;;  %v6966_v0 = vpop.xlane.xlu0 %1732  ;;  %v6997_v36 = vpop.f32.mrf.mxu0 }
 0x4bc   :  { %v2008_v43 = vpop.f32.mrf.mxu0 }
 0x4bd   :  { %v6968_v57 = vpop.xlane.xlu1 %2623 }
 0x4be   :  { %8290 = vst [vmem:[#allocation158_spill] sm:$0xff] %v6968_v57  ;;  %v6970_v28 = vpop.xlane.xlu0 %2458 }
 0x4bf   :  { %8291 = vst [vmem:[#allocation122_spill] sm:$0xff] %v6970_v28  ;;  %v2097_v28 = vrot.slane %v1670_v29, %v8198_v56  ;;  %v2110_v29 = vrot.slane %v1679_v34, %v8196_v18 }
 0x4c1   :  { %v6974_v22 = vpop.xlane.xlu1 %2659  ;;  %v2102_v8 = vsel %vm737_vm3, %v2101_v31, %v2097_v28  ;;  %v2111_v15 = vsel %vm737_vm3, %v2110_v29, %v2106_v41 }
 0x4c2   :  { %8292 = vst [vmem:[#allocation141_spill] sm:$0xff] %v6974_v22  ;;  %v6977_v32 = vpop.xlane.xlu0 %2500  ;;  %v1836_v22 = vsel %vm737_vm3, %v1835_v50, %v1831_v51 }
 0x4c3   :  { %8293 = vst [vmem:[#allocation86_spill] sm:$0xff] %v6977_v32  ;;  %v1845_v32 = vsel %vm737_vm3, %v1844_v33, %v1840_v17  ;;  %v1923_v50 = vsel %vm884_vm9, %v1836_v22, %v6788_v10  ;;  %v2196_v33 = vsel %vm880_vm7, %v2093_v7, %v6816_v6  ;;  %v2119_v17 = vrot.slane %v1685_v3, %v8196_v18 }
 0x4c4   :  { %v1924_v51 = vsel %vm886_vm10, %v1845_v32, %v1923_v50  ;;  %v2197_v34 = vsel %vm882_vm8, %v2102_v8, %v2196_v33  ;;  %v1898_v33 = vrot.slane %v6757_v58, %v8196_v18 }
 0x4c5   :  { %v6990_v57 = vpop.xlane.xlu1 %2665  ;;  %v2198_v10 = vsel %vm884_vm9, %v2111_v15, %v2197_v34  ;;  %v2009_v22 = vadd.f32 %v2008_v43, %v1924_v51  ;;  %v2142_v51 = vrot.slane %v6818_v9, %v8198_v56  ;;  %v1903_v15 = vrot.slane %v6918_v39, %v8198_v56 }
 0x4c6   :  { %v6995_v61 = vpop.xlane.xlu0 %2638  ;;  %v1912_v43 = vrot.slane %v6950_v37, %v8198_v56  ;;  %v1907_v9 = vrot.slane %v6837_v53, %v8196_v18  ;;  %v2160_v39 = vrot.slane %v6932_v26, %v8198_v56  ;;  %v2155_v34 = vrot.slane %v6778_v38, %v8196_v18 }
 0x4c7   :  { %8294 = vst [vmem:[#allocation134_spill] sm:$0xff] %v6995_v61  ;;  %v2169_v37 = vrot.slane %v6956_v42, %v8198_v56 }
 0x4c8   :  { %v1908_v53 = vsel %vm737_vm3, %v1907_v9, %v1903_v15 }
 0x4c9   :  { %v1682_v59 = vpop.xlane.xlu1 %1681 }
 0x4ca   :  { %v2115_v61 = vrot.slane %v1682_v59, %v8198_v56  ;;  %v7011_v63 = vpop.xlane.xlu0 %2680 }
 0x4cc   :  { %v2120_v28 = vsel %vm737_vm3, %v2119_v17, %v2115_v61  ;;  %v1894_v61 = vrot.slane %v6873_v19, %v8198_v56  ;;  %v2151_v17 = vrot.slane %v6887_v62, %v8198_v56  ;;  %v2146_v19 = vrot.slane %v6691_v48, %v8196_v18 }
 0x4cd   :  { %v1724_v32 = vpop.xlane.xlu1 %1723  ;;  %v2199_v41 = vsel %vm886_vm10, %v2120_v28, %v2198_v10  ;;  %v1916_v62 = vrot.slane %v6901_v25, %v8196_v18  ;;  %v2164_v48 = vrot.slane %v6866_v20, %v8196_v18  ;;  %v2173_v25 = vrot.slane %v6909_v46, %v8196_v18 }
 0x4ce   :  { %v2209_v31 = vadd.f32 %v2199_v41, %v2009_v22  ;;  %v7019_v3 = vpop.xlane.xlu0 %2464  ;;  %v1899_v58 = vsel %vm737_vm3, %v1898_v33, %v1894_v61  ;;  %v2147_v10 = vsel %vm737_vm3, %v2146_v19, %v2142_v51  ;;  %v2178_v26 = vrot.slane %v1724_v32, %v8198_v56 }
 0x4cf   :  { %v2156_v22 = vsel %vm737_vm3, %v2155_v34, %v2151_v17  ;;  %v1917_v42 = vsel %vm737_vm3, %v1916_v62, %v1912_v43  ;;  %v1929_v41 = vsel %vm882_vm8, %v1899_v58, %v6802_v55  ;;  %v2165_v20 = vsel %vm737_vm3, %v2164_v48, %v2160_v39 }
 0x4d0   :  { %v7017_v6 = vadd.f32 %v2209_v31, %v6916_v13  ;;  %v2182_v31 = vrot.slane %v6948_v49, %v8196_v18  ;;  %v2201_v32 = vsel %vm876_vm5, %v2147_v10, %v6753_v52  ;;  %v2174_v61 = vsel %vm737_vm3, %v2173_v25, %v2169_v37 }
 0x4d1   :  { %v7021_v7 = vpop.xlane.xlu1 %2449  ;;  %v2202_v51 = vsel %vm878_vm6, %v2156_v22, %v2201_v32  ;;  %v2191_v17 = vrot.slane %v6966_v0, %v8196_v18  ;;  %v2753_v32 = vrot.slane %v6705_v24, %v8196_v18 }
 0x4d2   :  { %v2213_v29 = vsel %vm1176_vm11, %v7017_v6, -inf  ;;  %v7027_v8 = vpop.xlane.xlu0 %2506  ;;  %v2183_v15 = vsel %vm737_vm3, %v2182_v31, %v2178_v26  ;;  %v2203_v55 = vsel %vm880_vm7, %v2165_v20, %v2202_v51  ;;  %v2749_v20 = vrot.slane %v6826_v23, %v8198_v56 }
 0x4d3   :  { %2214 = vmax.xlane.f32.xlu1 %v2213_v29  ;;  %v1930_v29 = vsel %vm884_vm9, %v1908_v53, %v1929_v41  ;;  %v2204_v52 = vsel %vm882_vm8, %v2174_v61, %v2203_v55  ;;  %v2762_v41 = vrot.slane %v6719_v27, %v8196_v18  ;;  %v2767_v61 = vrot.slane %v6893_v21, %v8198_v56 }
 0x4d4   :  { %v1931_v46 = vsel %vm886_vm10, %v1917_v42, %v1930_v29  ;;  %v2205_v19 = vsel %vm884_vm9, %v2183_v15, %v2204_v52  ;;  %v2758_v42 = vrot.slane %v6835_v40, %v8198_v56  ;;  %v2830_v51 = vrot.slane %v6905_v60, %v8198_v56 }
 0x4d5   :  { %v7025_v50 = vpop.xlane.xlu1 %2491  ;;  %v2014_v39 = vadd.f32 %v6997_v36, %v1931_v46  ;;  %v2771_v27 = vrot.slane %v6792_v47, %v8196_v18  ;;  %v2821_v23 = vrot.slane %v6899_v5, %v8198_v56  ;;  %v2834_v46 = vrot.slane %v6820_v4, %v8196_v18 }
 0x4d6   :  { %v7061_v28 = vpop.xlane.xlu0 %2644  ;;  %v2763_v29 = vsel %vm737_vm3, %v2762_v41, %v2758_v42  ;;  %v2754_v24 = vsel %vm737_vm3, %v2753_v32, %v2749_v20  ;;  %v2776_v15 = vrot.slane %v6936_v54, %v8198_v56  ;;  %v2839_v21 = vrot.slane %v6940_v44, %v8198_v56  ;;  %v8297_v42 = vld [vmem:[#allocation78_spill] sm:$0xff]  ;;  %v8299_v32 = vld [vmem:[#allocation124_spill] sm:$0xff] }
 0x4d7   :  { %v2890_v47 = vsel %vm874_vm4, %v2763_v29, %v2754_v24  ;;  %v3033_v5 = vrot.slane %v6946_v30, %v8198_v56  ;;  %v2780_v4 = vrot.slane %v6875_v12, %v8196_v18  ;;  %v2843_v55 = vrot.slane %v6883_v45, %v8196_v18 }
 0x4d8   :  { %v2772_v54 = vsel %vm737_vm3, %v2771_v27, %v2767_v61  ;;  %v2835_v44 = vsel %vm737_vm3, %v2834_v46, %v2830_v51  ;;  %v3024_v30 = vrot.slane %v6944_v11, %v8198_v56  ;;  %v2785_v45 = vrot.slane %v6960_v2, %v8198_v56  ;;  %v8298_v2 = vld [vmem:[#allocation47_spill] sm:$0xff]  ;;  %v8300_v61 = vld [vmem:[#allocation49_spill] sm:$0xff] }
 0x4d9   :  { %v7035_v59 = vpop.xlane.xlu1 %2629  ;;  %v2781_v12 = vsel %vm737_vm3, %v2780_v4, %v2776_v15  ;;  %v2844_v52 = vsel %vm737_vm3, %v2843_v55, %v2839_v21  ;;  %v2789_v41 = vrot.slane %v8297_v42, %v8196_v18  ;;  %v2852_v20 = vrot.slane %v8298_v2, %v8196_v18  ;;  %v8302_v55 = vld [vmem:[#allocation63_spill] sm:$0xff] }
 0x4da   :  { %v7086_v43 = vpop.xlane.xlu0 %2686  ;;  %v3046_v29 = vrot.slane %v8299_v32, %v8196_v18  ;;  %v3100_v51 = vrot.slane %v8300_v61, %v8196_v18 }
 0x4dd   :  { %v7063_v38 = vpop.xlane.xlu1 %2671 }
 0x4de   :  { %v7097_v0 = vpop.xlane.xlu0 %2512 }
 0x4e1   :  { %v1730_v33 = vpop.xlane.xlu1 %1729 }
 0x4e2   :  { %v2187_v49 = vrot.slane %v1730_v33, %v8198_v56  ;;  %v7105_v26 = vpop.xlane.xlu0 %2650  ;;  %v2825_v33 = vrot.slane %v6806_v16, %v8196_v18  ;;  %v3037_v16 = vrot.slane %v6895_v35, %v8196_v18  ;;  %v2891_v35 = vsel %vm876_vm5, %v2772_v54, %v2890_v47 }
 0x4e3   :  { %v2892_v27 = vsel %vm878_vm6, %v2781_v12, %v2891_v35  ;;  %v2798_v54 = vrot.slane %v8302_v55, %v8196_v18  ;;  %v8306_v35 = vld [vmem:[#allocation81_spill] sm:$0xff] }
 0x4e4   :  { %v2192_v9 = vsel %vm737_vm3, %v2191_v17, %v2187_v49  ;;  %v3028_v17 = vrot.slane %v6889_v1, %v8196_v18  ;;  %v2826_v49 = vsel %vm737_vm3, %v2825_v33, %v2821_v23  ;;  %v3038_v11 = vsel %vm737_vm3, %v3037_v16, %v3033_v5  ;;  %v8301_v23 = vld [vmem:[#allocation143_spill] sm:$0xff]  ;;  %v8303_v16 = vld [vmem:[#allocation141_spill] sm:$0xff] }
 0x4e5   :  { %v7091_v34 = vpop.xlane.xlu1 %2455  ;;  %v2206_v58 = vsel %vm886_vm10, %v2192_v9, %v2205_v19  ;;  %v8295_v19 = vld [vmem:[#allocation15_spill] sm:$0xff]  ;;  %v3109_v46 = vrot.slane %v8301_v23, %v8196_v18  ;;  %v2790_v33 = vsel %vm737_vm3, %v2789_v41, %v2785_v45  ;;  %v2794_v5 = vrot.slane %v7021_v7, %v8198_v56  ;;  %v8308_v41 = vld [vmem:[#allocation86_spill] sm:$0xff] }
 0x4e6   :  { %v2210_v62 = vadd.f32 %v2206_v58, %v2014_v39  ;;  %v7109_v22 = vpop.xlane.xlu0 %2692  ;;  %v2848_v9 = vrot.slane %v8295_v19, %v8198_v56  ;;  %v2897_v58 = vsel %vm874_vm4, %v2835_v44, %v2826_v49  ;;  %v3029_v15 = vsel %vm737_vm3, %v3028_v17, %v3024_v30  ;;  %v8304_v30 = vld [vmem:[#allocation147_spill] sm:$0xff] }
 0x4e7   :  { %v2898_v24 = vsel %vm876_vm5, %v2844_v52, %v2897_v58  ;;  %v3165_v21 = vsel %vm874_vm4, %v3038_v11, %v3029_v15  ;;  %v3096_v49 = vrot.slane %v8303_v16, %v8198_v56  ;;  %v2857_v17 = vrot.slane %v7025_v50, %v8198_v56  ;;  %v8305_v52 = vld [vmem:[#allocation16_spill] sm:$0xff]  ;;  %v8310_v16 = vld [vmem:[#allocation142_spill] sm:$0xff] }
 0x4e8   :  { %v7095_v37 = vadd.f32 %v2210_v62, %v6863_v14  ;;  %v8296_v62 = vld [vmem:[#allocation158_spill] sm:$0xff]  ;;  %v2853_v47 = vsel %vm737_vm3, %v2852_v20, %v2848_v9  ;;  %v2861_v12 = vrot.slane %v8304_v30, %v8196_v18  ;;  %v3055_v45 = vrot.slane %v8305_v52, %v8196_v18 }
 0x4e9   :  { %v7099_v10 = vpop.xlane.xlu1 %2497  ;;  %v3105_v7 = vrot.slane %v6990_v57, %v8198_v56  ;;  %v3051_v19 = vrot.slane %v7035_v59, %v8198_v56  ;;  %v3118_v58 = vrot.slane %v8306_v35, %v8196_v18  ;;  %v2893_v11 = vsel %vm880_vm7, %v2790_v33, %v2892_v27 }
 0x4ea   :  { %v2216_v48 = vsel %vm1176_vm11, %v7095_v37, -inf  ;;  %v7128_v40 = vpop.xlane.xlu0 %2656  ;;  %v2899_v50 = vsel %vm878_vm6, %v2853_v47, %v2898_v24  ;;  %v2870_v57 = vrot.slane %v8308_v41, %v8196_v18  ;;  %v2799_v2 = vsel %vm737_vm3, %v2798_v54, %v2794_v5 }
 0x4eb   :  { %2217 = vmax.xlane.f32.xlu0 %v2216_v48  ;;  %v3042_v48 = vrot.slane %v8296_v62, %v8198_v56  ;;  %v8307_v62 = vld [vmem:[#allocation122_spill] sm:$0xff]  ;;  %v2803_v59 = vrot.slane %v7091_v34, %v8198_v56  ;;  %v3101_v32 = vsel %vm737_vm3, %v3100_v51, %v3096_v49  ;;  %v2862_v27 = vsel %vm737_vm3, %v2861_v12, %v2857_v17 }
 0x4ec   :  { %v3110_v24 = vsel %vm737_vm3, %v3109_v46, %v3105_v7  ;;  %v3127_v15 = vrot.slane %v7011_v63, %v8196_v18  ;;  %v2816_v51 = vrot.slane %v7019_v3, %v8196_v18  ;;  %v2879_v47 = vrot.slane %v7027_v8, %v8196_v18 }
 0x4ed   :  { %v7103_v53 = vpop.xlane.xlu1 %2635  ;;  %v3047_v44 = vsel %vm737_vm3, %v3046_v29, %v3042_v48  ;;  %v2807_v48 = vrot.slane %v8307_v62, %v8196_v18  ;;  %v8309_v29 = vld [vmem:[#allocation134_spill] sm:$0xff]  ;;  %v2894_v5 = vsel %vm882_vm8, %v2799_v2, %v2893_v11  ;;  %v3073_v63 = vrot.slane %v7061_v28, %v8196_v18 }
 0x4ee   :  { %v7167_v39 = vpop.xlane.xlu0 %2698  ;;  %v3166_v42 = vsel %vm876_vm5, %v3047_v44, %v3165_v21  ;;  %v3064_v61 = vrot.slane %v8309_v29, %v8196_v18  ;;  %v3056_v21 = vsel %vm737_vm3, %v3055_v45, %v3051_v19  ;;  %v3060_v34 = vrot.slane %v7103_v53, %v8198_v56 }
 0x4ef   :  { %v2900_v46 = vsel %vm880_vm7, %v2862_v27, %v2899_v50  ;;  %v2808_v55 = vsel %vm737_vm3, %v2807_v48, %v2803_v59  ;;  %v3136_v3 = vrot.slane %v7086_v43, %v8196_v18  ;;  %v3167_v8 = vsel %vm878_vm6, %v3056_v21, %v3166_v42 }
 0x4f0   :  { %v3114_v28 = vrot.slane %v7063_v38, %v8198_v56  ;;  %v3082_v17 = vrot.slane %v7105_v26, %v8196_v18  ;;  %v2866_v30 = vrot.slane %v7099_v10, %v8198_v56  ;;  %v3065_v12 = vsel %vm737_vm3, %v3064_v61, %v3060_v34 }
 0x4f1   :  { %v7107_v36 = vpop.xlane.xlu1 %2677  ;;  %v2888_v43 = vrot.slane %v7097_v0, %v8196_v18  ;;  %v2895_v52 = vsel %vm884_vm9, %v2808_v55, %v2894_v5  ;;  %v3091_v45 = vrot.slane %v7128_v40, %v8196_v18  ;;  %v3168_v0 = vsel %vm880_vm7, %v3065_v12, %v3167_v8 }
 0x4f2   :  { %v7211_v9 = vpop.xlane.xlu0 %2704  ;;  %v3123_v38 = vrot.slane %v7107_v36, %v8198_v56  ;;  %v3119_v48 = vsel %vm737_vm3, %v3118_v58, %v3114_v28  ;;  %v2871_v36 = vsel %vm737_vm3, %v2870_v57, %v2866_v30  ;;  %v3172_v21 = vsel %vm874_vm4, %v3110_v24, %v3101_v32 }
 0x4f3   :  { %v2901_v34 = vsel %vm882_vm8, %v2871_v36, %v2900_v46 }
 0x4f4   :  { %v3128_v29 = vsel %vm737_vm3, %v3127_v15, %v3123_v38  ;;  %v8314_v38 = vld [vmem:[#allocation18_spill] sm:$0xff] }
 0x4f5   :  { %v7111_v25 = vpop.xlane.xlu1 %2461 }
 0x4f6   :  { %v2812_v23 = vrot.slane %v7111_v25, %v8198_v56 }
 0x4f8   :  { %v2817_v44 = vsel %vm737_vm3, %v2816_v51, %v2812_v23 }
 0x4f9   :  { %v7119_v31 = vpop.xlane.xlu1 %2503  ;;  %v2896_v26 = vsel %vm886_vm10, %v2817_v44, %v2895_v52 }
 0x4fa   :  { %v2875_v10 = vrot.slane %v7119_v31, %v8198_v56 }
 0x4fc   :  { %v1182_v33 = vpop.xlane.xlu0 %1181  ;;  %v2880_v58 = vsel %vm737_vm3, %v2879_v47, %v2875_v10  ;;  %v8316_v10 = vld [vmem:[#allocation24_spill] sm:$0xff] }
 0x4fd   :  { %v7141_v60 = vpop.xlane.xlu1 %2641  ;;  %v1184_v49 = vsub.f32 %v8310_v16, %v1182_v33  ;;  %v3173_v33 = vsel %vm876_vm5, %v3119_v48, %v3172_v21  ;;  %v2902_v51 = vsel %vm884_vm9, %v2880_v58, %v2901_v34 }
 0x4fe   :  { %v3069_v25 = vrot.slane %v7141_v60, %v8198_v56  ;;  %v4820_v60 = vpop.f32.mrf.mxu0 }
 0x4ff   :  { %v1187_v11 = vmul.f32 1.442695, %v1184_v49  ;;  %v8311_v49 = vld [vmem:[#allocation112_spill] sm:$0xff] }
 0x500   :  { %v3074_v7 = vsel %vm737_vm3, %v3073_v63, %v3069_v25  ;;  %v2980_v62 = vpop.f32.mrf.mxu0  ;;  %v3174_v25 = vsel %vm878_vm6, %v3128_v29, %v3173_v33 }
 0x501   :  { %v7169_v1 = vpop.xlane.xlu1 %2683  ;;  %v3169_v42 = vsel %vm882_vm8, %v3074_v7, %v3168_v0  ;;  %4920 = vpow2.f32 %v1187_v11  ;;  %v8312_v7 = vld [vmem:[#allocation17_spill] sm:$0xff]  ;;  %v8320_v11 = vld [vmem:[#allocation23_spill] sm:$0xff] }
 0x502   :  { %v3132_v31 = vrot.slane %v7169_v1, %v8198_v56  ;;  %v8319_v0 = vld [vmem:[#allocation21_spill] sm:$0xff] }
 0x504   :  { %v3137_v15 = vsel %vm737_vm3, %v3136_v3, %v3132_v31 }
 0x505   :  { %v7194_v4 = vpop.xlane.xlu1 %2509  ;;  %v3175_v46 = vsel %vm880_vm7, %v3137_v15, %v3174_v25 }
 0x506   :  { %v2884_v50 = vrot.slane %v7194_v4, %v8198_v56  ;;  %v3145_v4 = vrot.slane %v7109_v22, %v8196_v18  ;;  %v3154_v22 = vrot.slane %v7167_v39, %v8196_v18  ;;  %v3163_v39 = vrot.slane %v7211_v9, %v8196_v18 }
 0x508   :  { %v2889_v1 = vsel %vm737_vm3, %v2888_v43, %v2884_v50  ;;  %v8321_v50 = vld [vmem:[#allocation25_spill] sm:$0xff] }
 0x509   :  { %v2648_v20 = vpop.xlane.xlu1 %2647  ;;  %v2903_v32 = vsel %vm886_vm10, %v2889_v1, %v2902_v51 }
 0x50a   :  { %v3078_v53 = vrot.slane %v2648_v20, %v8198_v56  ;;  %v2981_v20 = vadd.f32 %v2980_v62, %v2896_v26  ;;  %v2986_v8 = vadd.f32 %v4820_v60, %v2903_v32  ;;  %v8315_v26 = vld [vmem:[#allocation22_spill] sm:$0xff] }
 0x50c   :  { %v3083_v19 = vsel %vm737_vm3, %v3082_v17, %v3078_v53 }
 0x50d   :  { %v2690_v54 = vpop.xlane.xlu1 %2689  ;;  %v3170_v41 = vsel %vm884_vm9, %v3083_v19, %v3169_v42  ;;  %v8317_v19 = vld [vmem:[#allocation26_spill] sm:$0xff] }
 0x50e   :  { %v3141_v2 = vrot.slane %v2690_v54, %v8198_v56  ;;  %v7319_v43 = vpop.eup %4920 }
 0x50f   :  { %v1192_v52 = vsel %vm1176_vm11, %v7319_v43, 0.0 }
 0x510   :  { %v3146_v47 = vsel %vm737_vm3, %v3145_v4, %v3141_v2 }
 0x511   :  { %v2654_v35 = vpop.xlane.xlu1 %2653 }
 0x512   :  { %v3087_v40 = vrot.slane %v2654_v35, %v8198_v56  ;;  %v8318_v35 = vld [vmem:[#allocation20_spill] sm:$0xff] }
 0x514   :  { %v3092_v59 = vsel %vm737_vm3, %v3091_v45, %v3087_v40 }
 0x515   :  { %v2696_v57 = vpop.xlane.xlu1 %2695  ;;  %v3171_v61 = vsel %vm886_vm10, %v3092_v59, %v3170_v41 }
 0x516   :  { %v3150_v27 = vrot.slane %v2696_v57, %v8198_v56  ;;  %v3181_v23 = vadd.f32 %v3171_v61, %v2981_v20 }
 0x518   :  { %v7301_v5 = vadd.f32 %v3181_v23, %v6916_v13  ;;  %v3155_v24 = vsel %vm737_vm3, %v3154_v22, %v3150_v27  ;;  %v3176_v13 = vsel %vm882_vm8, %v3146_v47, %v3175_v46  ;;  %v8324_v46 = vld [vmem:[#allocation30_spill] sm:$0xff] }
 0x519   :  { %v2702_v63 = vpop.xlane.xlu1 %2701  ;;  %v3177_v54 = vsel %vm884_vm9, %v3155_v24, %v3176_v13  ;;  %v8327_v13 = vld [vmem:[#allocation94_spill] sm:$0xff] }
 0x51a   :  { %v3159_v55 = vrot.slane %v2702_v63, %v8198_v56  ;;  %v3185_v53 = vsel %vm1176_vm11, %v7301_v5, -inf  ;;  %v8323_v63 = vld [vmem:[#allocation37_spill] sm:$0xff] }
 0x51b   :  { %3186 = vmax.xlane.f32.xlu1 %v3185_v53  ;;  %v8326_v53 = vld [vmem:[#allocation32_spill] sm:$0xff] }
 0x51c   :  { %v3164_v3 = vsel %vm737_vm3, %v3163_v39, %v3159_v55  ;;  %v8325_v55 = vld [vmem:[#allocation38_spill] sm:$0xff] }
 0x51d   :  { %v1179_v44 = vpop.xlane.xlu1 %1178  ;;  %v3178_v16 = vsel %vm886_vm10, %v3164_v3, %v3177_v54  ;;  %v8328_v54 = vld [vmem:[#allocation40_spill] sm:$0xff]  ;;  %v8329_v3 = vld [vmem:[#allocation97_spill] sm:$0xff] }
 0x51e   :  { %v1183_v9 = vsub.f32 %v8311_v49, %v1179_v44  ;;  %v3182_v28 = vadd.f32 %v3178_v16, %v2986_v8  ;;  %v8330_v8 = vld [vmem:[#allocation34_spill] sm:$0xff]  ;;  %v8331_v44 = vld [vmem:[#allocation27_spill] sm:$0xff]  ;;  %v8332_v16 = vld [vmem:[#allocation41_spill] sm:$0xff] }
 0x51f   :  { %v8333_v49 = vld [vmem:[#allocation53_spill] sm:$0xff] }
 0x520   :  { %v1185_v17 = vmul.f32 1.442695, %v1183_v9  ;;  %v3184_v30 = vadd.f32 %v3182_v28, %v6863_v14  ;;  %v8313_v14 = vld [vmem:[#allocation19_spill] sm:$0xff]  ;;  %v8334_v9 = vld [vmem:[#allocation72_spill] sm:$0xff] }
 0x521   :  { %v8335_v28 = vld [vmem:[#allocation99_spill] sm:$0xff] }
 0x522   :  { %4922 = vpow2.f32 %v1185_v17  ;;  %v3188_v12 = vsel %vm1176_vm11, %v3184_v30, -inf  ;;  %v8336_v17 = vld [vmem:[#allocation73_spill] sm:$0xff] }
 0x523   :  { %3189 = vmax.xlane.f32.xlu0 %v3188_v12  ;;  %v8337_v12 = vld [vmem:[#allocation103_spill] sm:$0xff] }
 0x527   :  { %1193 = vadd.xlane.f32.xlu0 %v1192_v52  ;;  %v8339_v52 = vld [vmem:[#allocation106_spill] sm:$0xff] }
 0x52f   :  { %v7323_v60 = vpop.eup %4922 }
 0x530   :  { %v1189_v45 = vsel %vm1176_vm11, %v7323_v60, 0.0 }
 0x531   :  { %1190 = vadd.xlane.f32.xlu1 %v1189_v45 }
 0x53d   :  { %1199 = vrot.lane.b32.xlu0 %v8312_v7, %s5085_s3 }
 0x541   :  { %3209 = vrot.lane.b32.xlu0 %v8313_v14, %s5096_s0 }
 0x542   :  { %1201 = vrot.lane.b32.xlu1 %v8313_v14, %s5085_s3 }
 0x545   :  { %3684 = vrot.lane.b32.xlu0 %v8313_v14, %s5097_s10 }
 0x546   :  { %2237 = vrot.lane.b32.xlu1 %v8313_v14, %s5098_s17 }
 0x549   :  { %3678 = vrot.lane.b32.xlu0 %v8314_v38, %s5099_s18 }
 0x54a   :  { %2235 = vrot.lane.b32.xlu1 %v8312_v7, %s5098_s17 }
 0x54d   :  { %3294 = vrot.lane.b32.xlu0 %v8315_v26, %s5099_s18  ;;  %v8341_v26 = vld [vmem:[#allocation31_spill] sm:$0xff] }
 0x54e   :  { %3207 = vrot.lane.b32.xlu1 %v8312_v7, %s5096_s0 }
 0x551   :  { %3298 = vrot.lane.b32.xlu0 %v8316_v10, %s5099_s18  ;;  %v8342_v10 = vld [vmem:[#allocation75_spill] sm:$0xff] }
 0x552   :  { %3682 = vrot.lane.b32.xlu1 %v8312_v7, %s5097_s10 }
 0x555   :  { %3302 = vrot.lane.b32.xlu0 %v8317_v19, %s5099_s18 }
 0x556   :  { %3680 = vrot.lane.b32.xlu1 %v8318_v35, %s5099_s18  ;;  %v8343_v35 = vld [vmem:[#allocation39_spill] sm:$0xff] }
 0x55a   :  { %3296 = vrot.lane.b32.xlu1 %v8319_v0, %s5099_s18  ;;  %v8344_v0 = vld [vmem:[#allocation77_spill] sm:$0xff] }
 0x55c   :  { %v2215_v40 = vpop.xlane.xlu1 %2214 }
 0x55d   :  { %v2219_v62 = vsub.f32 %v7017_v6, %v2215_v40  ;;  %v8346_v40 = vld [vmem:[#allocation79_spill] sm:$0xff] }
 0x55e   :  { %3300 = vrot.lane.b32.xlu1 %v8320_v11, %s5099_s18 }
 0x55f   :  { %v2221_v48 = vmul.f32 1.442695, %v2219_v62 }
 0x561   :  { %4924 = vpow2.f32 %v2221_v48 }
 0x562   :  { %3304 = vrot.lane.b32.xlu1 %v8321_v50, %s5099_s18  ;;  %v8345_v50 = vld [vmem:[#allocation107_spill] sm:$0xff] }
 0x56e   :  { %v7355_v41 = vpop.eup %4924 }
 0x56f   :  { %v2225_v2 = vsel %vm1176_vm11, %v7355_v41, 0.0 }
 0x574   :  { %v2218_v36 = vpop.xlane.xlu0 %2217 }
 0x575   :  { %v2220_v42 = vsub.f32 %v7095_v37, %v2218_v36  ;;  %v8347_v36 = vld [vmem:[#allocation109_spill] sm:$0xff] }
 0x577   :  { %v2223_v31 = vmul.f32 1.442695, %v2220_v42  ;;  %v8348_v42 = vld [vmem:[#allocation35_spill] sm:$0xff] }
 0x579   :  { %4926 = vpow2.f32 %v2223_v31 }
 0x586   :  { %v7359_v59 = vpop.eup %4926  ;;  %2226 = vadd.xlane.f32.xlu1 %v2225_v2  ;;  %v8349_v2 = vld [vmem:[#allocation33_spill] sm:$0xff] }
 0x587   :  { %v2228_v20 = vsel %vm1176_vm11, %v7359_v59, 0.0 }
 0x588   :  { %2229 = vadd.xlane.f32.xlu0 %v2228_v20  ;;  %v8350_v20 = vld [vmem:[#allocation43_spill] sm:$0xff] }
 0x5a4   :  { %v3187_v6 = vpop.xlane.xlu1 %3186 }
 0x5a5   :  { %v3191_v4 = vsub.f32 %v7301_v5, %v3187_v6  ;;  %v8322_v5 = vld [vmem:[#allocation29_spill] sm:$0xff] }
 0x5a7   :  { %v3193_v29 = vmul.f32 1.442695, %v3191_v4  ;;  %v8351_v4 = vld [vmem:[#allocation55_spill] sm:$0xff] }
 0x5a9   :  { %4928 = vpow2.f32 %v3193_v29  ;;  %v8352_v29 = vld [vmem:[#allocation82_spill] sm:$0xff] }
 0x5ac   :  { %v3190_v37 = vpop.xlane.xlu0 %3189 }
 0x5ad   :  { %v3192_v58 = vsub.f32 %v3184_v30, %v3190_v37 }
 0x5af   :  { %v3195_v57 = vmul.f32 1.442695, %v3192_v58 }
 0x5b0   :  { %v1194_v1 = vpop.xlane.xlu0 %1193 }
 0x5b1   :  { %4930 = vpow2.f32 %v3195_v57  ;;  %v8353_v57 = vld [vmem:[#allocation111_spill] sm:$0xff] }
 0x5b2   :  { %4932 = vrcp.f32 %v1194_v1  ;;  %v8354_v1 = vld [vmem:[#allocation84_spill] sm:$0xff] }
 0x5b4   :  { %v1200_v15 = vpop.permute.xlu0 %1199 }
 0x5b6   :  { %v7364_v61 = vpop.eup %4928 }
 0x5b7   :  { %v3197_v27 = vsel %vm1176_vm11, %v7364_v61, 0.0 }
 0x5b8   :  { %3198 = vadd.xlane.f32.xlu1 %v3197_v27  ;;  %v7380_v39 = vpop.permute.xlu0 %3209 }
 0x5ba   :  { %v1191_v23 = vpop.xlane.xlu1 %1190 }
 0x5bb   :  { %4934 = vrcp.f32 %v1191_v23 }
 0x5bc   :  { %v7419_v38 = vpop.permute.xlu0 %3684 }
 0x5be   :  { %v7368_v21 = vpop.eup %4930  ;;  %v1202_v34 = vpop.permute.xlu1 %1201 }
 0x5bf   :  { %4793 = vmatprep.subr.mxu1 %v1202_v34  ;;  %v3200_v22 = vsel %vm1176_vm11, %v7368_v21, 0.0  ;;  %v4933_v51 = vpop.eup %4932 }
 0x5c0   :  { %3201 = vadd.xlane.f32.xlu0 %v3200_v22  ;;  %4794 = vmatpush3.msra.mxu1 %v1202_v34  ;;  %v1198_v32 = vmul.f32 %v4933_v51, %v7319_v43  ;;  %v8338_v43 = vld [vmem:[#allocation28_spill] sm:$0xff]  ;;  %v7431_v11 = vpop.permute.xlu0 %3678  ;;  %v8355_v34 = vld [vmem:[#allocation114_spill] sm:$0xff] }
 0x5c1   :  { %4795 = vmatprep.subr.mxu1 %v1200_v15  ;;  %v8356_v22 = vld [vmem:[#allocation36_spill] sm:$0xff]  ;;  %v8359_v51 = vld [vmem:[#allocation58_spill] sm:$0xff] }
 0x5c2   :  { %4796 = vmatpush3.msra.mxu1 %v1200_v15  ;;  %v2238_v33 = vpop.permute.xlu1 %2237  ;;  %v8357_v15 = vld [vmem:[#allocation42_spill] sm:$0xff] }
 0x5c3   :  { %4807 = vmatprep.subr.mxu1 %v2238_v33 }
 0x5c4   :  { %v7439_v48 = vpop.permute.xlu0 %3294 }
 0x5c6   :  { %v2236_v24 = vpop.permute.xlu1 %2235 }
 0x5c8   :  { %v4935_v47 = vpop.eup %4934  ;;  %v7451_v6 = vpop.permute.xlu0 %3298 }
 0x5c9   :  { %3328 = vrot.lane.b32.xlu1 %v8322_v5, %s5099_s18  ;;  %v1197_v25 = vmul.f32 %v4935_v47, %v7323_v60  ;;  %v8340_v60 = vld [vmem:[#allocation56_spill] sm:$0xff]  ;;  %v8360_v47 = vld [vmem:[#allocation87_spill] sm:$0xff] }
 0x5ca   :  { %v3208_v30 = vpop.permute.xlu1 %3207 }
 0x5cb   :  { %4797 = vmatprep.mubr.msk.f32.mxu1 %vm1176_vm11, %v1197_v25  ;;  %v8361_v25 = vld [vmem:[#allocation118_spill] sm:$0xff] }
 0x5cc   :  { %4798 = vmatmul.mubr.msk.f32.vlgmr.msra.gmra.mxu1 %vm1176_vm11, %v1198_v32  ;;  %v7459_v58 = vpop.permute.xlu0 %3302  ;;  %v8362_v32 = vld [vmem:[#allocation89_spill] sm:$0xff] }
 0x5cd   :  { %4808 = vmatpush3.msra.mxu1 %v2238_v33  ;;  %3332 = vrot.lane.b32.xlu1 %v8323_v63, %s5099_s18  ;;  %v8358_v33 = vld [vmem:[#allocation59_spill] sm:$0xff] }
 0x5ce   :  { %4809 = vmatprep.subr.mxu1 %v2236_v24  ;;  %v7417_v45 = vpop.permute.xlu1 %3682 }
 0x5cf   :  { %4810 = vmatpush3.msra.mxu1 %v2236_v24 }
 0x5d0   :  { %4821 = vmatprep.subr.mxu1 %v7380_v39 }
 0x5d1   :  { %3308 = vrot.lane.b32.xlu1 %v8324_v46, %s5099_s18 }
 0x5d2   :  { %v7425_v19 = vpop.permute.xlu1 %3680 }
 0x5d5   :  { %3336 = vrot.lane.b32.xlu1 %v8325_v55, %s5099_s18  ;;  %v8363_v55 = vld [vmem:[#allocation120_spill] sm:$0xff] }
 0x5d6   :  { %3326 = vrot.lane.b32.xlu0 %v8326_v53, %s5099_s18  ;;  %v7437_v62 = vpop.permute.xlu1 %3296  ;;  %v8364_v53 = vld [vmem:[#allocation44_spill] sm:$0xff] }
 0x5d9   :  { %3488 = vrot.lane.b32.xlu1 %v8327_v13, %s5099_s18  ;;  %v8365_v13 = vld [vmem:[#allocation64_spill] sm:$0xff] }
 0x5da   :  { %3330 = vrot.lane.b32.xlu0 %v8328_v54, %s5099_s18  ;;  %v7445_v31 = vpop.permute.xlu1 %3300  ;;  %v8368_v54 = vld [vmem:[#allocation91_spill] sm:$0xff] }
 0x5dd   :  { %3492 = vrot.lane.b32.xlu1 %v8329_v3, %s5099_s18  ;;  %v8369_v3 = vld [vmem:[#allocation130_spill] sm:$0xff] }
 0x5de   :  { %3306 = vrot.lane.b32.xlu0 %v8330_v8, %s5099_s18  ;;  %v7457_v37 = vpop.permute.xlu1 %3304  ;;  %v8371_v8 = vld [vmem:[#allocation138_spill] sm:$0xff] }
 0x5e1   :  { %3312 = vrot.lane.b32.xlu1 %v8331_v44, %s5099_s18  ;;  %v8372_v44 = vld [vmem:[#allocation68_spill] sm:$0xff] }
 0x5e2   :  { %3334 = vrot.lane.b32.xlu0 %v8332_v16, %s5099_s18  ;;  %v8373_v16 = vld [vmem:[#allocation140_spill] sm:$0xff] }
 0x5e5   :  { %3340 = vrot.lane.b32.xlu1 %v8333_v49, %s5099_s18  ;;  %v8374_v49 = vld [vmem:[#allocation101_spill] sm:$0xff] }
 0x5e6   :  { %3486 = vrot.lane.b32.xlu0 %v8334_v9, %s5099_s18  ;;  %v8375_v9 = vld [vmem:[#allocation145_spill] sm:$0xff] }
 0x5e9   :  { %3496 = vrot.lane.b32.xlu1 %v8335_v28, %s5099_s18  ;;  %v8376_v28 = vld [vmem:[#allocation104_spill] sm:$0xff] }
 0x5ea   :  { %3490 = vrot.lane.b32.xlu0 %v8336_v17, %s5099_s18  ;;  %v8377_v17 = vld [vmem:[#allocation113_spill] sm:$0xff] }
 0x5ed   :  { %3520 = vrot.lane.b32.xlu1 %v8337_v12, %s5099_s18  ;;  %v8378_v12 = vld [vmem:[#allocation116_spill] sm:$0xff] }
 0x5ee   :  { %3310 = vrot.lane.b32.xlu0 %v8338_v43, %s5099_s18 }
 0x5f1   :  { %3524 = vrot.lane.b32.xlu1 %v8339_v52, %s5099_s18  ;;  %v8379_v52 = vld [vmem:[#allocation123_spill] sm:$0xff] }
 0x5f2   :  { %3338 = vrot.lane.b32.xlu0 %v8340_v60, %s5099_s18 }
 0x5f5   :  { %3316 = vrot.lane.b32.xlu1 %v8341_v26, %s5099_s18 }
 0x5f6   :  { %3494 = vrot.lane.b32.xlu0 %v8342_v10, %s5099_s18 }
 0x5f9   :  { %3344 = vrot.lane.b32.xlu1 %v8343_v35, %s5099_s18 }
 0x5fa   :  { %3518 = vrot.lane.b32.xlu0 %v8344_v0, %s5099_s18 }
 0x5fd   :  { %3500 = vrot.lane.b32.xlu1 %v8345_v50, %s5099_s18 }
 0x5fe   :  { %3522 = vrot.lane.b32.xlu0 %v8346_v40, %s5099_s18 }
 0x601   :  { %3528 = vrot.lane.b32.xlu1 %v8347_v36, %s5099_s18 }
 0x602   :  { %3314 = vrot.lane.b32.xlu0 %v8348_v42, %s5099_s18 }
 0x605   :  { %3320 = vrot.lane.b32.xlu1 %v8349_v2, %s5099_s18 }
 0x606   :  { %3342 = vrot.lane.b32.xlu0 %v8350_v20, %s5099_s18 }
 0x609   :  { %3348 = vrot.lane.b32.xlu1 %v8351_v4, %s5099_s18 }
 0x60a   :  { %3498 = vrot.lane.b32.xlu0 %v8352_v29, %s5099_s18 }
 0x60d   :  { %3504 = vrot.lane.b32.xlu1 %v8353_v57, %s5099_s18 }
 0x60e   :  { %3526 = vrot.lane.b32.xlu0 %v8354_v1, %s5099_s18 }
 0x60f   :  { %v2227_v27 = vpop.xlane.xlu1 %2226 }
 0x610   :  { %4936 = vrcp.f32 %v2227_v27  ;;  %v3402_v27 = vsel %vm461_vm2, %v7459_v58, 0.0  ;;  %v3396_v58 = vsel %vm461_vm2, %v7451_v6, 0.0  ;;  %v3405_v6 = vsel %vm461_vm2, %v7457_v37, 0.0 }
 0x611   :  { %v2230_v23 = vpop.xlane.xlu0 %2229  ;;  %3532 = vrot.lane.b32.xlu1 %v8355_v34, %s5099_s18 }
 0x612   :  { %4938 = vrcp.f32 %v2230_v23  ;;  %3318 = vrot.lane.b32.xlu0 %v8356_v22, %s5099_s18 }
 0x615   :  { %3324 = vrot.lane.b32.xlu1 %v8357_v15, %s5099_s18 }
 0x616   :  { %3346 = vrot.lane.b32.xlu0 %v8358_v33, %s5099_s18 }
 0x619   :  { %3352 = vrot.lane.b32.xlu1 %v8359_v51, %s5099_s18  ;;  %v3399_v51 = vsel %vm461_vm2, %v7445_v31, 0.0 }
 0x61a   :  { %3502 = vrot.lane.b32.xlu0 %v8360_v47, %s5099_s18 }
 0x61d   :  { %v4937_v5 = vpop.eup %4936  ;;  %3508 = vrot.lane.b32.xlu1 %v8361_v25, %s5099_s18 }
 0x61e   :  { %3530 = vrot.lane.b32.xlu0 %v8362_v32, %s5099_s18  ;;  %v2233_v24 = vmul.f32 %v4937_v5, %v7355_v41  ;;  %v8366_v41 = vld [vmem:[#allocation62_spill] sm:$0xff] }
 0x61f   :  { %v4939_v63 = vpop.eup %4938 }
 0x620   :  { %4811 = vmatprep.mubr.msk.f32.mxu1 %vm1176_vm11, %v2233_v24  ;;  %v2234_v46 = vmul.f32 %v4939_v63, %v7359_v59  ;;  %v8367_v59 = vld [vmem:[#allocation127_spill] sm:$0xff] }
 0x621   :  { %3536 = vrot.lane.b32.xlu1 %v8363_v55, %s5099_s18 }
 0x622   :  { %3322 = vrot.lane.b32.xlu0 %v8364_v53, %s5099_s18  ;;  %4812 = vmatmul.mubr.msk.f32.vlgmr.msra.gmra.mxu1 %vm1176_vm11, %v2234_v46 }
 0x623   :  { %4822 = vmatpush3.msra.mxu1 %v7380_v39  ;;  %v8370_v39 = vld [vmem:[#allocation93_spill] sm:$0xff] }
 0x624   :  { %4823 = vmatprep.subr.mxu1 %v3208_v30 }
 0x625   :  { %4824 = vmatpush3.msra.mxu1 %v3208_v30  ;;  %3356 = vrot.lane.b32.xlu1 %v8365_v13, %s5099_s18 }
 0x626   :  { %4828 = vmatprep.subr.msk.mxu1 %vm461_vm2, %v7419_v38  ;;  %3350 = vrot.lane.b32.xlu0 %v8366_v41, %s5099_s18 }
 0x629   :  { %3512 = vrot.lane.b32.xlu1 %v8367_v59, %s5099_s18 }
 0x62a   :  { %3506 = vrot.lane.b32.xlu0 %v8368_v54, %s5099_s18 }
 0x62d   :  { %3540 = vrot.lane.b32.xlu1 %v8369_v3, %s5099_s18 }
 0x62e   :  { %3534 = vrot.lane.b32.xlu0 %v8370_v39, %s5099_s18 }
 0x631   :  { %3516 = vrot.lane.b32.xlu1 %v8371_v8, %s5099_s18 }
 0x632   :  { %3354 = vrot.lane.b32.xlu0 %v8372_v44, %s5099_s18 }
 0x635   :  { %3544 = vrot.lane.b32.xlu1 %v8373_v16, %s5099_s18 }
 0x636   :  { %3510 = vrot.lane.b32.xlu0 %v8374_v49, %s5099_s18 }
 0x639   :  { %3548 = vrot.lane.b32.xlu1 %v8375_v9, %s5099_s18 }
 0x63a   :  { %3538 = vrot.lane.b32.xlu0 %v8376_v28, %s5099_s18 }
 0x63e   :  { %3514 = vrot.lane.b32.xlu0 %v8377_v17, %s5099_s18 }
 0x641   :  { %v3199_v30 = vpop.xlane.xlu1 %3198 }
 0x642   :  { %4940 = vrcp.f32 %v3199_v30  ;;  %3542 = vrot.lane.b32.xlu0 %v8378_v12, %s5099_s18 }
 0x645   :  { %v3329_v43 = vpop.permute.xlu1 %3328 }
 0x646   :  { %3546 = vrot.lane.b32.xlu0 %v8379_v52, %s5099_s18  ;;  %v3441_v24 = vsel %vm461_vm2, %v3329_v43, 0.0 }
 0x649   :  { %v3202_v60 = vpop.xlane.xlu0 %3201  ;;  %v3333_v26 = vpop.permute.xlu1 %3332 }
 0x64a   :  { %4942 = vrcp.f32 %v3202_v60  ;;  %v3447_v55 = vsel %vm461_vm2, %v3333_v26, 0.0 }
 0x64d   :  { %v3327_v10 = vpop.permute.xlu0 %3326  ;;  %v7522_v35 = vpop.permute.xlu1 %3308 }
 0x64e   :  { %v3411_v41 = vsel %vm461_vm2, %v7522_v35, 0.0 }
 0x64f   :  { %v4941_v0 = vpop.eup %4940 }
 0x650   :  { %v3205_v50 = vmul.f32 %v4941_v0, %v7364_v61  ;;  %v3393_v61 = vsel %vm461_vm2, %v7437_v62, 0.0  ;;  %v3390_v62 = vsel %vm461_vm2, %v7439_v48, 0.0 }
 0x651   :  { %v3331_v40 = vpop.permute.xlu0 %3330  ;;  %v7525_v36 = vpop.permute.xlu1 %3336 }
 0x652   :  { %4825 = vmatprep.mubr.msk.f32.mxu1 %vm1176_vm11, %v3205_v50  ;;  %v3444_v22 = vsel %vm461_vm2, %v3331_v40, 0.0  ;;  %v3453_v3 = vsel %vm461_vm2, %v7525_v36, 0.0 }
 0x655   :  { %v3307_v42 = vpop.permute.xlu0 %3306  ;;  %v7528_v2 = vpop.permute.xlu1 %3488 }
 0x656   :  { %v3408_v33 = vsel %vm461_vm2, %v3307_v42, 0.0  ;;  %v3585_v16 = vsel %vm461_vm2, %v7528_v2, 0.0 }
 0x657   :  { %v4943_v20 = vpop.eup %4942 }
 0x658   :  { %v3206_v4 = vmul.f32 %v4943_v20, %v7368_v21 }
 0x659   :  { %v3335_v29 = vpop.permute.xlu0 %3334  ;;  %v7531_v57 = vpop.permute.xlu1 %3492 }
 0x65a   :  { %4826 = vmatmul.mubr.msk.f32.vlgmr.msra.gmra.mxu1 %vm1176_vm11, %v3206_v4  ;;  %v3450_v5 = vsel %vm461_vm2, %v3335_v29, 0.0  ;;  %v3591_v17 = vsel %vm461_vm2, %v7531_v57, 0.0 }
 0x65b   :  { %4829 = vmatpush3.xpose.msk.msra.mxu1 %vm461_vm2, %v7419_v38  ;;  %4832 = vmatprep.mubr.msk.f32.mxu1 %vm461_vm2, %v7431_v11  ;;  %v8380_v38 = vmov 0.0  }
 0x65c   :  { %4830 = vmatprep.subr.msk.mxu1 %vm461_vm2, %v7417_v45 }
 0x65d   :  { %v3487_v1 = vpop.permute.xlu0 %3486  ;;  %3394 = vadd.xlane.f32.xlu1 %v3393_v61  ;;  %v7542_v21 = vpop.permute.xlu1 %3312 }
 0x65e   :  { %v3582_v32 = vsel %vm461_vm2, %v3487_v1, 0.0  ;;  %v3417_v43 = vsel %vm461_vm2, %v7542_v21, 0.0 }
 0x65f   :  { %4831 = vmatpush3.xpose.msk.msra.mxu1 %vm461_vm2, %v7417_v45  ;;  %v3438_v45 = vsel %vm461_vm2, %v3327_v10, 0.0 }
 0x660   :  { %4850 = vmatprep.subr.bf16.mxu1 %v8380_v38 }
 0x661   :  { %v3491_v23 = vpop.permute.xlu0 %3490  ;;  %3403 = vadd.xlane.f32.xlu1 %v3402_v27  ;;  %v7551_v11 = vpop.permute.xlu1 %3340 }
 0x662   :  { %4833 = vmatmul.mubr.msk.f32.vlgmr.msra.gmra.mxu1 %vm461_vm2, %v7425_v19  ;;  %v3588_v31 = vsel %vm461_vm2, %v3491_v23, 0.0  ;;  %v3459_v10 = vsel %vm461_vm2, %v7551_v11, 0.0 }
 0x663   :  { %4854 = vmatprep.mubr.msk.bf16.mxu1 %vm5089_vm0, %v8380_v38 }
 0x665   :  { %3391 = vadd.xlane.f32.xlu0 %v3390_v62  ;;  %v3311_v34 = vpop.permute.xlu0 %3310  ;;  %3439 = vadd.xlane.f32.xlu1 %v3438_v45  ;;  %v3497_v15 = vpop.permute.xlu1 %3496 }
 0x666   :  { %v3414_v37 = vsel %vm461_vm2, %v3311_v34, 0.0  ;;  %v3597_v40 = vsel %vm461_vm2, %v3497_v15, 0.0 }
 0x669   :  { %3397 = vadd.xlane.f32.xlu0 %v3396_v58  ;;  %v3339_v19 = vpop.permute.xlu0 %3338  ;;  %3445 = vadd.xlane.f32.xlu1 %v3444_v22  ;;  %v3521_v47 = vpop.permute.xlu1 %3520 }
 0x66a   :  { %v3456_v54 = vsel %vm461_vm2, %v3339_v19, 0.0  ;;  %v3633_v2 = vsel %vm461_vm2, %v3521_v47, 0.0 }
 0x66d   :  { %v3495_v48 = vpop.permute.xlu0 %3494  ;;  %3409 = vadd.xlane.f32.xlu1 %v3408_v33  ;;  %3400 = vadd.xlane.f32.xlu0 %v3399_v51  ;;  %v3525_v63 = vpop.permute.xlu1 %3524 }
 0x66e   :  { %v3594_v44 = vsel %vm461_vm2, %v3495_v48, 0.0  ;;  %v3639_v57 = vsel %vm461_vm2, %v3525_v63, 0.0 }
 0x671   :  { %v3519_v25 = vpop.permute.xlu0 %3518  ;;  %3451 = vadd.xlane.f32.xlu1 %v3450_v5  ;;  %3406 = vadd.xlane.f32.xlu0 %v3405_v6  ;;  %v3317_v13 = vpop.permute.xlu1 %3316 }
 0x672   :  { %v3630_v28 = vsel %vm461_vm2, %v3519_v25, 0.0  ;;  %v3423_v21 = vsel %vm461_vm2, %v3317_v13, 0.0 }
 0x675   :  { %v3523_v46 = vpop.permute.xlu0 %3522  ;;  %3583 = vadd.xlane.f32.xlu1 %v3582_v32  ;;  %3442 = vadd.xlane.f32.xlu0 %v3441_v24  ;;  %v3345_v39 = vpop.permute.xlu1 %3344 }
 0x676   :  { %v3636_v12 = vsel %vm461_vm2, %v3523_v46, 0.0  ;;  %v3465_v11 = vsel %vm461_vm2, %v3345_v39, 0.0 }
 0x679   :  { %v3315_v53 = vpop.permute.xlu0 %3314  ;;  %3589 = vadd.xlane.f32.xlu1 %v3588_v31  ;;  %3448 = vadd.xlane.f32.xlu0 %v3447_v55  ;;  %v3501_v9 = vpop.permute.xlu1 %3500 }
 0x67a   :  { %v3420_v26 = vsel %vm461_vm2, %v3315_v53, 0.0  ;;  %v3603_v58 = vsel %vm461_vm2, %v3501_v9, 0.0 }
 0x67d   :  { %v3343_v59 = vpop.permute.xlu0 %3342  ;;  %3415 = vadd.xlane.f32.xlu1 %v3414_v37  ;;  %3412 = vadd.xlane.f32.xlu0 %v3411_v41  ;;  %v3529_v52 = vpop.permute.xlu1 %3528 }
 0x67e   :  { %v3462_v50 = vsel %vm461_vm2, %v3343_v59, 0.0  ;;  %v3645_v19 = vsel %vm461_vm2, %v3529_v52, 0.0 }
 0x681   :  { %v3499_v8 = vpop.permute.xlu0 %3498  ;;  %3457 = vadd.xlane.f32.xlu1 %v3456_v54  ;;  %3454 = vadd.xlane.f32.xlu0 %v3453_v3  ;;  %v3321_v0 = vpop.permute.xlu1 %3320 }
 0x682   :  { %v3600_v42 = vsel %vm461_vm2, %v3499_v8, 0.0  ;;  %v3429_v48 = vsel %vm461_vm2, %v3321_v0, 0.0 }
 0x685   :  { %v3527_v49 = vpop.permute.xlu0 %3526  ;;  %3595 = vadd.xlane.f32.xlu1 %v3594_v44  ;;  %3586 = vadd.xlane.f32.xlu0 %v3585_v16  ;;  %v3349_v20 = vpop.permute.xlu1 %3348 }
 0x686   :  { %v3642_v29 = vsel %vm461_vm2, %v3527_v49, 0.0  ;;  %v3471_v25 = vsel %vm461_vm2, %v3349_v20, 0.0 }
 0x689   :  { %v3319_v30 = vpop.permute.xlu0 %3318  ;;  %3631 = vadd.xlane.f32.xlu1 %v3630_v28  ;;  %3592 = vadd.xlane.f32.xlu0 %v3591_v17  ;;  %v3505_v61 = vpop.permute.xlu1 %3504 }
 0x68a   :  { %v3426_v1 = vsel %vm461_vm2, %v3319_v30, 0.0  ;;  %v3609_v63 = vsel %vm461_vm2, %v3505_v61, 0.0 }
 0x68c   :  { %v7624_v0 = vpop.f32.mrf.mxu1 }
 0x68d   :  { %v3347_v60 = vpop.permute.xlu0 %3346  ;;  %3637 = vadd.xlane.f32.xlu1 %v3636_v12  ;;  %3418 = vadd.xlane.f32.xlu0 %v3417_v43  ;;  %v3533_v62 = vpop.permute.xlu1 %3532 }
 0x68e   :  { %v3468_v23 = vsel %vm461_vm2, %v3347_v60, 0.0  ;;  %v3651_v55 = vsel %vm461_vm2, %v3533_v62, 0.0 }
 0x691   :  { %v3503_v35 = vpop.permute.xlu0 %3502  ;;  %3421 = vadd.xlane.f32.xlu1 %v3420_v26  ;;  %3460 = vadd.xlane.f32.xlu0 %v3459_v10  ;;  %v3325_v22 = vpop.permute.xlu1 %3324 }
 0x692   :  { %v3606_v34 = vsel %vm461_vm2, %v3503_v35, 0.0  ;;  %v3435_v41 = vsel %vm461_vm2, %v3325_v22, 0.0 }
 0x695   :  { %v3531_v36 = vpop.permute.xlu0 %3530  ;;  %3463 = vadd.xlane.f32.xlu1 %v3462_v50  ;;  %3598 = vadd.xlane.f32.xlu0 %v3597_v40  ;;  %v3353_v47 = vpop.permute.xlu1 %3352 }
 0x696   :  { %v3648_v15 = vsel %vm461_vm2, %v3531_v36, 0.0  ;;  %v3477_v54 = vsel %vm461_vm2, %v3353_v47, 0.0  ;;  %v7627_v40 = vpop.f32.mrf.mxu1 }
 0x699   :  { %3601 = vadd.xlane.f32.xlu1 %v3600_v42  ;;  %3634 = vadd.xlane.f32.xlu0 %v3633_v2  ;;  %v3323_v4 = vpop.permute.xlu0 %3322  ;;  %v3509_v32 = vpop.permute.xlu1 %3508 }
 0x69a   :  { %v3432_v51 = vsel %vm461_vm2, %v3323_v4, 0.0  ;;  %v3615_v8 = vsel %vm461_vm2, %v3509_v32, 0.0 }
 0x69d   :  { %3643 = vadd.xlane.f32.xlu1 %v3642_v29  ;;  %3640 = vadd.xlane.f32.xlu0 %v3639_v57  ;;  %v3351_v27 = vpop.permute.xlu0 %3350  ;;  %v3537_v53 = vpop.permute.xlu1 %3536 }
 0x69e   :  { %v3474_v6 = vsel %vm461_vm2, %v3351_v27, 0.0  ;;  %v3657_v9 = vsel %vm461_vm2, %v3537_v53, 0.0 }
 0x6a1   :  { %3427 = vadd.xlane.f32.xlu1 %v3426_v1  ;;  %3424 = vadd.xlane.f32.xlu0 %v3423_v21  ;;  %v3507_v45 = vpop.permute.xlu0 %3506  ;;  %v3357_v59 = vpop.permute.xlu1 %3356 }
 0x6a2   :  { %v3612_v24 = vsel %vm461_vm2, %v3507_v45, 0.0  ;;  %v3483_v30 = vsel %vm461_vm2, %v3357_v59, 0.0 }
 0x6a5   :  { %3469 = vadd.xlane.f32.xlu1 %v3468_v23  ;;  %3466 = vadd.xlane.f32.xlu0 %v3465_v11  ;;  %v3535_v33 = vpop.permute.xlu0 %3534  ;;  %v3513_v16 = vpop.permute.xlu1 %3512 }
 0x6a6   :  { %v3654_v31 = vsel %vm461_vm2, %v3535_v33, 0.0  ;;  %v3621_v52 = vsel %vm461_vm2, %v3513_v16, 0.0 }
 0x6a9   :  { %3607 = vadd.xlane.f32.xlu1 %v3606_v34  ;;  %3604 = vadd.xlane.f32.xlu0 %v3603_v58  ;;  %v3355_v5 = vpop.permute.xlu0 %3354  ;;  %v3541_v17 = vpop.permute.xlu1 %3540 }
 0x6aa   :  { %v3480_v37 = vsel %vm461_vm2, %v3355_v5, 0.0  ;;  %v3663_v10 = vsel %vm461_vm2, %v3541_v17, 0.0 }
 0x6ad   :  { %3649 = vadd.xlane.f32.xlu1 %v3648_v15  ;;  %3646 = vadd.xlane.f32.xlu0 %v3645_v19  ;;  %v3511_v46 = vpop.permute.xlu0 %3510  ;;  %v3517_v26 = vpop.permute.xlu1 %3516 }
 0x6ae   :  { %v3618_v3 = vsel %vm461_vm2, %v3511_v46, 0.0  ;;  %v3627_v50 = vsel %vm461_vm2, %v3517_v26, 0.0 }
 0x6b1   :  { %3433 = vadd.xlane.f32.xlu1 %v3432_v51  ;;  %3430 = vadd.xlane.f32.xlu0 %v3429_v48  ;;  %v3539_v13 = vpop.permute.xlu0 %3538  ;;  %v3545_v35 = vpop.permute.xlu1 %3544 }
 0x6b2   :  { %v3660_v44 = vsel %vm461_vm2, %v3539_v13, 0.0  ;;  %v3669_v36 = vsel %vm461_vm2, %v3545_v35, 0.0 }
 0x6b5   :  { %3475 = vadd.xlane.f32.xlu1 %v3474_v6  ;;  %3472 = vadd.xlane.f32.xlu0 %v3471_v25  ;;  %v3515_v39 = vpop.permute.xlu0 %3514  ;;  %v3549_v42 = vpop.permute.xlu1 %3548 }
 0x6b6   :  { %v3624_v28 = vsel %vm461_vm2, %v3515_v39, 0.0  ;;  %v3675_v20 = vsel %vm461_vm2, %v3549_v42, 0.0 }
 0x6b9   :  { %3613 = vadd.xlane.f32.xlu1 %v3612_v24  ;;  %3610 = vadd.xlane.f32.xlu0 %v3609_v63  ;;  %v3543_v49 = vpop.permute.xlu0 %3542 }
 0x6ba   :  { %v3666_v12 = vsel %vm461_vm2, %v3543_v49, 0.0 }
 0x6bd   :  { %3655 = vadd.xlane.f32.xlu1 %v3654_v31  ;;  %3652 = vadd.xlane.f32.xlu0 %v3651_v55  ;;  %v3547_v43 = vpop.permute.xlu0 %3546 }
 0x6be   :  { %v3672_v60 = vsel %vm461_vm2, %v3547_v43, 0.0 }
 0x6c1   :  { %3481 = vadd.xlane.f32.xlu1 %v3480_v37  ;;  %3436 = vadd.xlane.f32.xlu0 %v3435_v41 }
 0x6c5   :  { %3619 = vadd.xlane.f32.xlu1 %v3618_v3  ;;  %3478 = vadd.xlane.f32.xlu0 %v3477_v54 }
 0x6c9   :  { %3661 = vadd.xlane.f32.xlu1 %v3660_v44  ;;  %3616 = vadd.xlane.f32.xlu0 %v3615_v8 }
 0x6cd   :  { %3625 = vadd.xlane.f32.xlu1 %v3624_v28  ;;  %3658 = vadd.xlane.f32.xlu0 %v3657_v9 }
 0x6d1   :  { %3667 = vadd.xlane.f32.xlu1 %v3666_v12  ;;  %3484 = vadd.xlane.f32.xlu0 %v3483_v30 }
 0x6d5   :  { %3673 = vadd.xlane.f32.xlu1 %v3672_v60  ;;  %3622 = vadd.xlane.f32.xlu0 %v3621_v52 }
 0x6d9   :  { %3664 = vadd.xlane.f32.xlu0 %v3663_v10 }
 0x6dd   :  { %3628 = vadd.xlane.f32.xlu0 %v3627_v50 }
 0x6e1   :  { %3670 = vadd.xlane.f32.xlu0 %v3669_v36 }
 0x6e2   :  { %v7630_v2 = vpop.f32.mrf.mxu1 }
 0x6e4   :  { %v7633_v4 = vpop.f32.mrf.mxu1 }
 0x6e5   :  { %v4895_v29 = vpack.i.bf16 %v7630_v2, %v7633_v4  ;;  %3676 = vadd.xlane.f32.xlu0 %v3675_v20 }
 0x6e6   :  { %v3395_v57 = vpop.xlane.xlu1 %3394 }
 0x6e7   :  { %v3725_v27 = vrot.slane %v3395_v57, %v8196_v18 }
 0x6ea   :  { %v3404_v61 = vpop.xlane.xlu1 %3403 }
 0x6eb   :  { %v3739_v47 = vrot.slane %v3404_v61, %v8198_v56 }
 0x6ee   :  { %v3392_v1 = vpop.xlane.xlu0 %3391  ;;  %v3440_v21 = vpop.xlane.xlu1 %3439 }
 0x6ef   :  { %v3721_v23 = vrot.slane %v3392_v1, %v8198_v56  ;;  %v3793_v63 = vrot.slane %v3440_v21, %v8198_v56 }
 0x6f1   :  { %v3726_v11 = vsel %vm737_vm3, %v3725_v27, %v3721_v23 }
 0x6f2   :  { %v3398_v62 = vpop.xlane.xlu0 %3397  ;;  %v3446_v45 = vpop.xlane.xlu1 %3445 }
 0x6f3   :  { %v3730_v22 = vrot.slane %v3398_v62, %v8198_v56  ;;  %v3802_v13 = vrot.slane %v3446_v45, %v8198_v56 }
 0x6f6   :  { %v3401_v34 = vpop.xlane.xlu0 %3400  ;;  %v3410_v58 = vpop.xlane.xlu1 %3409 }
 0x6f7   :  { %v3734_v15 = vrot.slane %v3401_v34, %v8196_v18  ;;  %v3748_v39 = vrot.slane %v3410_v58, %v8198_v56 }
 0x6f9   :  { %v3735_v19 = vsel %vm737_vm3, %v3734_v15, %v3730_v22 }
 0x6fa   :  { %v3862_v33 = vsel %vm874_vm4, %v3735_v19, %v3726_v11  ;;  %v3407_v51 = vpop.xlane.xlu0 %3406  ;;  %v3452_v48 = vpop.xlane.xlu1 %3451 }
 0x6fb   :  { %v3743_v5 = vrot.slane %v3407_v51, %v8196_v18  ;;  %v3811_v28 = vrot.slane %v3452_v48, %v8198_v56 }
 0x6fd   :  { %v3744_v6 = vsel %vm737_vm3, %v3743_v5, %v3739_v47 }
 0x6fe   :  { %v3863_v25 = vsel %vm876_vm5, %v3744_v6, %v3862_v33  ;;  %v3443_v32 = vpop.xlane.xlu0 %3442  ;;  %v3584_v24 = vpop.xlane.xlu1 %3583 }
 0x6ff   :  { %v3797_v46 = vrot.slane %v3443_v32, %v8196_v18  ;;  %v3996_v60 = vrot.slane %v3584_v24, %v8198_v56 }
 0x701   :  { %v3798_v31 = vsel %vm737_vm3, %v3797_v46, %v3793_v63 }
 0x702   :  { %v3449_v55 = vpop.xlane.xlu0 %3448  ;;  %v3590_v53 = vpop.xlane.xlu1 %3589 }
 0x703   :  { %v3806_v37 = vrot.slane %v3449_v55, %v8196_v18  ;;  %v4005_v36 = vrot.slane %v3590_v53, %v8198_v56 }
 0x705   :  { %v3807_v41 = vsel %vm737_vm3, %v3806_v37, %v3802_v13 }
 0x706   :  { %v3869_v59 = vsel %vm874_vm4, %v3807_v41, %v3798_v31  ;;  %v3413_v54 = vpop.xlane.xlu0 %3412  ;;  %v3416_v3 = vpop.xlane.xlu1 %3415 }
 0x707   :  { %v3752_v8 = vrot.slane %v3413_v54, %v8196_v18  ;;  %v3757_v21 = vrot.slane %v3416_v3, %v8198_v56 }
 0x709   :  { %v3753_v44 = vsel %vm737_vm3, %v3752_v8, %v3748_v39 }
 0x70a   :  { %v3864_v16 = vsel %vm878_vm6, %v3753_v44, %v3863_v25  ;;  %v3455_v49 = vpop.xlane.xlu0 %3454  ;;  %v3458_v9 = vpop.xlane.xlu1 %3457 }
 0x70b   :  { %v3815_v17 = vrot.slane %v3455_v49, %v8196_v18  ;;  %v3820_v34 = vrot.slane %v3458_v9, %v8198_v56 }
 0x70d   :  { %v3816_v30 = vsel %vm737_vm3, %v3815_v17, %v3811_v28 }
 0x70e   :  { %v3870_v12 = vsel %vm876_vm5, %v3816_v30, %v3869_v59  ;;  %v3587_v43 = vpop.xlane.xlu0 %3586  ;;  %v3596_v52 = vpop.xlane.xlu1 %3595 }
 0x70f   :  { %v4000_v26 = vrot.slane %v3587_v43, %v8196_v18  ;;  %v4014_v47 = vrot.slane %v3596_v52, %v8198_v56 }
 0x711   :  { %v4001_v10 = vsel %vm737_vm3, %v4000_v26, %v3996_v60 }
 0x712   :  { %v3593_v35 = vpop.xlane.xlu0 %3592  ;;  %v3632_v50 = vpop.xlane.xlu1 %3631 }
 0x713   :  { %v4009_v42 = vrot.slane %v3593_v35, %v8196_v18  ;;  %v4068_v63 = vrot.slane %v3632_v50, %v8198_v56 }
 0x715   :  { %v4010_v20 = vsel %vm737_vm3, %v4009_v42, %v4005_v36 }
 0x716   :  { %v4137_v57 = vsel %vm874_vm4, %v4010_v20, %v4001_v10  ;;  %v3419_v61 = vpop.xlane.xlu0 %3418  ;;  %v3638_v1 = vpop.xlane.xlu1 %3637 }
 0x717   :  { %v3761_v27 = vrot.slane %v3419_v61, %v8196_v18  ;;  %v4077_v13 = vrot.slane %v3638_v1, %v8198_v56 }
 0x719   :  { %v3762_v23 = vsel %vm737_vm3, %v3761_v27, %v3757_v21 }
 0x71a   :  { %v7674_v11 = vsel %vm880_vm7, %v3762_v23, %v3864_v16  ;;  %v7676_v62 = vpop.f32.mrf.mxu1  ;;  %v3461_v45 = vpop.xlane.xlu0 %3460 }
 0x71b   :  { %v3824_v58 = vrot.slane %v3461_v45, %v8196_v18  ;;  %v3422_v22 = vpop.xlane.xlu1 %3421 }
 0x71c   :  { %v7680_v15 = vpop.f32.mrf.mxu1  ;;  %v3766_v27 = vrot.slane %v3422_v22, %v8198_v56 }
 0x71d   :  { %v3825_v19 = vsel %vm737_vm3, %v3824_v58, %v3820_v34  ;;  %v4900_v33 = vpack.i.bf16 %v7676_v62, %v7680_v15  ;;  %v4913_v62 = vld [vmem:[#allocation7] sm:$0xff]  }
 0x71e   :  { %v7686_v51 = vsel %vm878_vm6, %v3825_v19, %v3870_v12  ;;  %v3599_v48 = vpop.xlane.xlu0 %3598 }
 0x71f   :  { %v4018_v5 = vrot.slane %v3599_v48, %v8196_v18  ;;  %v3464_v6 = vpop.xlane.xlu1 %3463 }
 0x720   :  { %v3829_v34 = vrot.slane %v3464_v6, %v8198_v56 }
 0x721   :  { %v4019_v25 = vsel %vm737_vm3, %v4018_v5, %v4014_v47 }
 0x722   :  { %v7692_v32 = vsel %vm876_vm5, %v4019_v25, %v4137_v57  ;;  %v3635_v24 = vpop.xlane.xlu0 %3634 }
 0x723   :  { %v4072_v46 = vrot.slane %v3635_v24, %v8196_v18  ;;  %v3602_v31 = vpop.xlane.xlu1 %3601 }
 0x724   :  { %v4023_v58 = vrot.slane %v3602_v31, %v8198_v56 }
 0x725   :  { %v4073_v55 = vsel %vm737_vm3, %v4072_v46, %v4068_v63 }
 0x726   :  { %v3641_v53 = vpop.xlane.xlu0 %3640 }
 0x727   :  { %v4081_v37 = vrot.slane %v3641_v53, %v8196_v18  ;;  %v7699_v41 = vpop.xlane.xlu1 %3643 }
 0x728   :  { %v4086_v5 = vrot.slane %v7699_v41, %v8198_v56 }
 0x729   :  { %v4082_v59 = vsel %vm737_vm3, %v4081_v37, %v4077_v13 }
 0x72a   :  { %v7703_v54 = vsel %vm874_vm4, %v4082_v59, %v4073_v55  ;;  %v3425_v3 = vpop.xlane.xlu0 %3424 }
 0x72b   :  { %v3428_v39 = vpop.xlane.xlu1 %3427  ;;  %v3770_v61 = vrot.slane %v3425_v3, %v8196_v18 }
 0x72c   :  { %v3775_v22 = vrot.slane %v3428_v39, %v8198_v56 }
 0x72d   :  { %v3771_v19 = vsel %vm737_vm3, %v3770_v61, %v3766_v27 }
 0x72e   :  { %v3467_v8 = vpop.xlane.xlu0 %3466  ;;  %v3866_v31 = vsel %vm882_vm8, %v3771_v19, %v7674_v11 }
 0x72f   :  { %v7705_v44 = vpop.xlane.xlu1 %3469  ;;  %v3833_v23 = vrot.slane %v3467_v8, %v8196_v18 }
 0x730   :  { %v3838_v37 = vrot.slane %v7705_v44, %v8198_v56 }
 0x731   :  { %v3834_v24 = vsel %vm737_vm3, %v3833_v23, %v3829_v34 }
 0x732   :  { %v3605_v16 = vpop.xlane.xlu0 %3604  ;;  %v3872_v8 = vsel %vm880_vm7, %v3834_v24, %v7686_v51 }
 0x733   :  { %v3608_v49 = vpop.xlane.xlu1 %3607  ;;  %v4027_v45 = vrot.slane %v3605_v16, %v8196_v18 }
 0x734   :  { %v4032_v41 = vrot.slane %v3608_v49, %v8198_v56 }
 0x735   :  { %v4028_v63 = vsel %vm737_vm3, %v4027_v45, %v4023_v58 }
 0x736   :  { %v3647_v9 = vpop.xlane.xlu0 %3646  ;;  %v4139_v11 = vsel %vm878_vm6, %v4028_v63, %v7692_v32 }
 0x737   :  { %v7707_v28 = vpop.xlane.xlu1 %3649  ;;  %v4090_v55 = vrot.slane %v3647_v9, %v8196_v18 }
 0x738   :  { %v4095_v44 = vrot.slane %v7707_v28, %v8198_v56 }
 0x739   :  { %v4091_v51 = vsel %vm737_vm3, %v4090_v55, %v4086_v5 }
 0x73a   :  { %v3431_v17 = vpop.xlane.xlu0 %3430 }
 0x73b   :  { %v3434_v30 = vpop.xlane.xlu1 %3433  ;;  %v3779_v48 = vrot.slane %v3431_v17, %v8196_v18  ;;  %v4834_v17 = vpop.f32.mrf.mxu1 }
 0x73c   :  { %v3784_v53 = vrot.slane %v3434_v30, %v8198_v56 }
 0x73d   :  { %v3780_v59 = vsel %vm737_vm3, %v3779_v48, %v3775_v22  ;;  %v3952_v58 = vpop.f32.mrf.mxu1 }
 0x73e   :  { %v7709_v12 = vpop.xlane.xlu0 %3472 }
 0x73f   :  { %v7711_v43 = vpop.xlane.xlu1 %3475  ;;  %v3842_v49 = vrot.slane %v7709_v12, %v8196_v18 }
 0x740   :  { %v3847_v32 = vrot.slane %v7711_v43, %v8198_v56 }
 0x742   :  { %v3611_v52 = vpop.xlane.xlu0 %3610 }
 0x743   :  { %v3614_v60 = vpop.xlane.xlu1 %3613  ;;  %v4036_v6 = vrot.slane %v3611_v52, %v8196_v18 }
 0x744   :  { %v4041_v16 = vrot.slane %v3614_v60, %v8198_v56 }
 0x745   :  { %v4037_v30 = vsel %vm737_vm3, %v4036_v6, %v4032_v41  ;;  %v4145_v41 = vsel %vm876_vm5, %v4091_v51, %v7703_v54 }
 0x746   :  { %v7713_v26 = vpop.xlane.xlu0 %3652  ;;  %v4140_v23 = vsel %vm880_vm7, %v4037_v30, %v4139_v11 }
 0x747   :  { %v7715_v10 = vpop.xlane.xlu1 %3655 }
 0x748   :  { %v4104_v24 = vrot.slane %v7715_v10, %v8198_v56 }
 0x74a   :  { %v3437_v35 = vpop.xlane.xlu0 %3436 }
 0x74b   :  { %v7717_v50 = vpop.xlane.xlu1 %3481  ;;  %v3788_v25 = vrot.slane %v3437_v35, %v8196_v18  ;;  %v3867_v35 = vsel %vm884_vm9, %v3780_v59, %v3866_v31 }
 0x74c   :  { %v3856_v19 = vrot.slane %v7717_v50, %v8198_v56 }
 0x74d   :  { %v3789_v9 = vsel %vm737_vm3, %v3788_v25, %v3784_v53 }
 0x74e   :  { %v7719_v36 = vpop.xlane.xlu0 %3478  ;;  %v3868_v28 = vsel %vm886_vm10, %v3789_v9, %v3867_v35 }
 0x74f   :  { %v3620_v20 = vpop.xlane.xlu1 %3619  ;;  %v3851_v12 = vrot.slane %v7719_v36, %v8196_v18 }
 0x750   :  { %v4050_v52 = vrot.slane %v3620_v20, %v8198_v56 }
 0x751   :  { %v3852_v63 = vsel %vm737_vm3, %v3851_v12, %v3847_v32 }
 0x752   :  { %v3617_v42 = vpop.xlane.xlu0 %3616 }
 0x753   :  { %v7724_v1 = vpop.xlane.xlu1 %3661  ;;  %v4045_v13 = vrot.slane %v3617_v42, %v8196_v18  ;;  %v4099_v42 = vrot.slane %v7713_v26, %v8196_v18  ;;  %v3843_v26 = vsel %vm737_vm3, %v3842_v49, %v3838_v37 }
 0x754   :  { %v3873_v53 = vsel %vm882_vm8, %v3843_v26, %v3872_v8 }
 0x755   :  { %v4046_v60 = vsel %vm737_vm3, %v4045_v13, %v4041_v16  ;;  %v4100_v22 = vsel %vm737_vm3, %v4099_v42, %v4095_v44  ;;  %v3874_v59 = vsel %vm884_vm9, %v3852_v63, %v3873_v53 }
 0x756   :  { %v7721_v57 = vpop.xlane.xlu0 %3658  ;;  %v4141_v36 = vsel %vm882_vm8, %v4046_v60, %v4140_v23  ;;  %v4146_v11 = vsel %vm878_vm6, %v4100_v22, %v4145_v41 }
 0x757   :  { %v3626_v46 = vpop.xlane.xlu1 %3625  ;;  %v4108_v48 = vrot.slane %v7721_v57, %v8196_v18  ;;  %v4113_v57 = vrot.slane %v7724_v1, %v8198_v56  ;;  %v4968_v1 = vld [vmem:[%s7919_s1] sm:$0xff] }
 0x758   :  { %v4059_v45 = vrot.slane %v3626_v46, %v8198_v56 }
 0x759   :  { %v4109_v13 = vsel %vm737_vm3, %v4108_v48, %v4104_v24 }
 0x75a   :  { %v7726_v21 = vpop.xlane.xlu0 %3484  ;;  %v4147_v44 = vsel %vm880_vm7, %v4109_v13, %v4146_v11 }
 0x75b   :  { %v3668_v61 = vpop.xlane.xlu1 %3667  ;;  %v3860_v43 = vrot.slane %v7726_v21, %v8196_v18  ;;  %v3953_v21 = vadd.f32 %v3952_v58, %v3868_v28  ;;  %v4969_v28 = vld [vmem:[%s7919_s1 + $0x8] sm:$0xff]  ;;  %s5100_s1 = smov 40  }
 0x75c   :  { %v4122_v37 = vrot.slane %v3668_v61, %v8198_v56 }
 0x75d   :  { %v3861_v46 = vsel %vm737_vm3, %v3860_v43, %v3856_v19 }
 0x75e   :  { %v3623_v47 = vpop.xlane.xlu0 %3622  ;;  %v3875_v8 = vsel %vm886_vm10, %v3861_v46, %v3874_v59 }
 0x75f   :  { %v4054_v3 = vrot.slane %v3623_v47, %v8196_v18  ;;  %v3674_v10 = vpop.xlane.xlu1 %3673  ;;  %v3958_v32 = vadd.f32 %v4834_v17, %v3875_v8 }
 0x760   :  { %v4131_v54 = vrot.slane %v3674_v10, %v8198_v56 }
 0x761   :  { %v4055_v20 = vsel %vm737_vm3, %v4054_v3, %v4050_v52 }
 0x762   :  { %v3665_v39 = vpop.xlane.xlu0 %3664  ;;  %v4142_v47 = vsel %vm884_vm9, %v4055_v20, %v4141_v36 }
 0x763   :  { %v4117_v5 = vrot.slane %v3665_v39, %v8196_v18 }
 0x765   :  { %v4118_v3 = vsel %vm737_vm3, %v4117_v5, %v4113_v57 }
 0x766   :  { %v3629_v27 = vpop.xlane.xlu0 %3628  ;;  %v4148_v52 = vsel %vm882_vm8, %v4118_v3, %v4147_v44  ;;  %v4970_v3 = vld [vmem:[%s8020_s19] sm:$0xff] }
 0x767   :  { %v4063_v34 = vrot.slane %v3629_v27, %v8196_v18 }
 0x769   :  { %v4064_v25 = vsel %vm737_vm3, %v4063_v34, %v4059_v45 }
 0x76a   :  { %v3671_v50 = vpop.xlane.xlu0 %3670  ;;  %v4143_v6 = vsel %vm886_vm10, %v4064_v25, %v4142_v47 }
 0x76b   :  { %v4126_v31 = vrot.slane %v3671_v50, %v8196_v18  ;;  %v4153_v55 = vadd.f32 %v4143_v6, %v3953_v21 }
 0x76d   :  { %v4155_v39 = vadd.f32 %v4968_v1, %v4153_v55  ;;  %v4127_v16 = vsel %vm737_vm3, %v4126_v31, %v4122_v37 }
 0x76e   :  { %v3677_v9 = vpop.xlane.xlu0 %3676  ;;  %v4149_v51 = vsel %vm884_vm9, %v4127_v16, %v4148_v52 }
 0x76f   :  { %v4135_v49 = vrot.slane %v3677_v9, %v8196_v18  ;;  %v4157_v30 = vsel %vm1176_vm11, %v4155_v39, -inf  ;;  %v4971_v9 = vld [vmem:[%s8020_s19 + $0x8] sm:$0xff] }
 0x770   :  { %4158 = vmax.xlane.f32.xlu1 %v4157_v30 }
 0x771   :  { %v4136_v35 = vsel %vm737_vm3, %v4135_v49, %v4131_v54 }
 0x772   :  { %v4150_v60 = vsel %vm886_vm10, %v4136_v35, %v4149_v51 }
 0x773   :  { %v4154_v42 = vadd.f32 %v4150_v60, %v3958_v32 }
 0x775   :  { %v4156_v56 = vadd.f32 %v4969_v28, %v4154_v42 }
 0x777   :  { %v4160_v18 = vsel %vm1176_vm11, %v4156_v56, -inf }
 0x778   :  { %4161 = vmax.xlane.f32.xlu0 %v4160_v18  ;;  %v4914_v18 = vld [vmem:[#allocation8 + $0x8] sm:$0xff]  }
 0x779   :  { %4851 = vmatpush3.bf16.msra.mxu1 %v4914_v18 }
 0x77a   :  { %4852 = vmatprep.subr.bf16.mxu1 %v8380_v38 }
 0x7f9   :  { %v4159_v12 = vpop.xlane.xlu1 %4158 }
 0x7fa   :  { %v4163_v61 = vsub.f32 %v4155_v39, %v4159_v12  ;;  %v4915_v12 = vld [vmem:[#allocation8] sm:$0xff]  }
 0x7fb   :  { %4853 = vmatpush3.bf16.msra.mxu1 %v4915_v12 }
 0x7fc   :  { %v4165_v20 = vmul.f32 1.442695, %v4163_v61 }
 0x7fe   :  { %4944 = vpow2.f32 %v4165_v20 }
 0x801   :  { %v4162_v27 = vpop.xlane.xlu0 %4161 }
 0x802   :  { %v4164_v23 = vsub.f32 %v4156_v56, %v4162_v27 }
 0x804   :  { %v4167_v45 = vmul.f32 1.442695, %v4164_v23 }
 0x806   :  { %4946 = vpow2.f32 %v4167_v45 }
 0x80b   :  { %v4945_v17 = vpop.eup %4944 }
 0x80c   :  { %v4169_v43 = vsel %vm1176_vm11, %v4945_v17, 0.0 }
 0x80d   :  { %4170 = vadd.xlane.f32.xlu1 %v4169_v43 }
 0x813   :  { %v4947_v34 = vpop.eup %4946 }
 0x814   :  { %v4172_v58 = vsel %vm1176_vm11, %v4947_v34, 0.0 }
 0x815   :  { %4173 = vadd.xlane.f32.xlu0 %v4172_v58  ;;  %v4718_v58 = vld [vmem:[%s7926_s8] ss:$0 sm:$0xff] }
 0x81e   :  { %4181 = vrot.lane.b32.xlu1 %v8313_v14, %s5100_s1 }
 0x822   :  { %4896 = vrot.lane.b32.xlu1 %v4895_v29, %s5083_s27 }
 0x826   :  { %4901 = vrot.lane.b32.xlu1 %v4900_v33, %s5101_s22 }
 0x82b   :  { %4179 = vrot.lane.b32.xlu0 %v8312_v7, %s5100_s1  ;;  %v4912_v7 = vld [vmem:[#allocation7 + $0x8] sm:$0xff]  }
 0x896   :  { %v4171_v26 = vpop.xlane.xlu1 %4170 }
 0x897   :  { %4948 = vrcp.f32 %v4171_v26 }
 0x89a   :  { %v4182_v19 = vpop.permute.xlu1 %4181 }
 0x89b   :  { %4835 = vmatprep.subr.mxu0 %v4182_v19 }
 0x89c   :  { %4836 = vmatpush3.msra.mxu0 %v4182_v19 }
 0x89e   :  { %v4174_v36 = vpop.xlane.xlu0 %4173  ;;  %v4897_v5 = vpop.permute.xlu1 %4896 }
 0x89f   :  { %4950 = vrcp.f32 %v4174_v36  ;;  %v4899_v21 = vunpack.i.h.bf16 %v4897_v5  ;;  %v4898_v22 = vunpack.i.l.bf16 %v4897_v5 }
 0x8a1   :  { %v4291_v6 = vsel %vm461_vm2, %v7624_v0, %v4899_v21  ;;  %v4290_v57 = vsel %vm461_vm2, %v7627_v40, %v4898_v22  ;;  %v4714_v0 = vld [vmem:[%s7925_s7] ss:$0 sm:$0xff] }
 0x8a2   :  { %v4180_v14 = vpop.permute.xlu0 %4179  ;;  %v4902_v25 = vpop.permute.xlu1 %4901 }
 0x8a3   :  { %4837 = vmatprep.subr.mxu0 %v4180_v14  ;;  %v4904_v24 = vunpack.i.h.bf16 %v4902_v25  ;;  %v4903_v63 = vunpack.i.l.bf16 %v4902_v25 }
 0x8a4   :  { %v4949_v48 = vpop.eup %4948  ;;  %4838 = vmatpush3.msra.mxu0 %v4180_v14  ;;  %v4719_v14 = vld [vmem:[%s7927_s9] ss:$0 sm:$0xff] }
 0x8a5   :  { %v4177_v2 = vmul.f32 %v4949_v48, %v4945_v17  ;;  %4842 = vmatprep.subr.bf16.mxu0 %v8380_v38  ;;  %v4292_v55 = vsel %vm1176_vm11, %v4290_v57, %v4903_v63  ;;  %v4293_v53 = vsel %vm1176_vm11, %v4291_v6, %v4904_v24 }
 0x8a7   :  { %4839 = vmatprep.mubr.msk.f32.mxu0 %vm1176_vm11, %v4177_v2 }
 0x8ac   :  { %v4951_v4 = vpop.eup %4950 }
 0x8ad   :  { %v4178_v29 = vmul.f32 %v4951_v4, %v4947_v34 }
 0x8af   :  { %4840 = vmatmul.mubr.msk.f32.vlgmr.msra.gmra.mxu0 %vm1176_vm11, %v4178_v29 }
 0x8b0   :  { %4846 = vmatprep.mubr.msk.bf16.mxu0 %vm5089_vm0, %v8380_v38  ;;  %4843 = vmatpush3.bf16.msra.mxu0 %v4912_v7  ;;  %v4916_v7 = vld [vmem:[%s7930_s12 + $0x18] sm:$0xff]  }
 0x8b1   :  { %4844 = vmatprep.subr.bf16.mxu0 %v8380_v38 }
 0x8b4   :  { %4845 = vmatpush3.bf16.msra.mxu0 %v4913_v62  ;;  %v4917_v62 = vld [vmem:[%s7930_s12 + $0x10] sm:$0xff]  }
 0x8b5   :  { %4858 = vmatprep.subr.bf16.mxu0 %v8380_v38 }
 0x96f   :  { %v4841_v15 = vpop.f32.mrf.mxu0 }
 0x971   :  { %v4257_v33 = vpop.f32.mrf.mxu0 }
 0x972   :  { %v4905_v47 = vpack.i.bf16 %v4841_v15, %v4257_v33  ;;  %v4918_v15 = vld [vmem:[%s7930_s12 + $0x8] sm:$0xff]   ;;  %v4919_v33 = vld [vmem:[%s7930_s12] sm:$0xff]  }
 0x974   :  { %4906 = vrot.lane.b32.xlu0 %v4905_v47, %s5102_s23  ;;  %v4720_v47 = vld [vmem:[%s7929_s11] ss:$0 sm:$0xff] }
 0x9e6   :  { %v4907_v50 = vpop.permute.xlu0 %4906 }
 0x9e7   :  { %v4909_v46 = vunpack.i.h.bf16 %v4907_v50  ;;  %v4908_v31 = vunpack.i.l.bf16 %v4907_v50 }
 0x9e9   :  { %v4295_v13 = vsel %vm4294_vm12, %v4292_v55, %v4908_v31  ;;  %v4296_v37 = vsel %vm4294_vm12, %v4293_v53, %v4909_v46 }
 0x9ea   :  { %v4297_v10 = vpack.c.bf16 %v4296_v37, %v4295_v13 }
 0x9ec   :  { %4847 = vmatmul.mubr.msk.bf16.vlgmr.msra.gmra.mxu0 %vm138_vm1, %v4297_v10 }
 0x9ed   :  { %4866 = vmatprep.mubr.msk.bf16.mxu0 %vm5089_vm0, %v8380_v38  ;;  %4859 = vmatpush3.bf16.msra.mxu0 %v4916_v7 }
 0x9ee   :  { %4860 = vmatprep.subr.bf16.mxu0 %v8380_v38 }
 0x9f1   :  { %4861 = vmatpush3.bf16.msra.mxu0 %v4917_v62  ;;  %v4724_v62 = vld [vmem:[%s7931_s13] ss:$0 sm:$0xff] }
 0x9f2   :  { %4862 = vmatprep.subr.bf16.mxu0 %v8380_v38 }
 0x9f5   :  { %4863 = vmatpush3.bf16.msra.mxu0 %v4918_v15 }
 0x9f6   :  { %4864 = vmatprep.subr.bf16.mxu0 %v8380_v38 }
 0x9f9   :  { %4865 = vmatpush3.bf16.msra.mxu0 %v4919_v33 }
 0xaac   :  { %v4358_v41 = vpop.f32.mrf.mxu0 }
 0xaad   :  { %v4359_v40 = vadd.f32 %v4714_v0, %v4358_v41 }
 0xaae   :  { %v4848_v59 = vpop.f32.mrf.mxu0 }
 0xaaf   :  { %v4365_v1 = vadd.f32 %v4970_v3, %v4359_v40 }
 0xab0   :  { %v4361_v39 = vpop.f32.mrf.mxu0 }
 0xab1   :  { %v4362_v11 = vadd.f32 %v4714_v0, %v4361_v39  ;;  %v4367_v8 = vsel %vm138_vm1, %v4365_v1, 0.0 }
 0xab2   :  { %4368 = vadd.xlane.f32.xlu1 %v4367_v8  ;;  %v4849_v16 = vpop.f32.mrf.mxu0 }
 0xab3   :  { %v4366_v44 = vadd.f32 %v4971_v9, %v4362_v11 }
 0xab5   :  { %v4370_v54 = vsel %vm138_vm1, %v4366_v44, 0.0 }
 0xab6   :  { %4371 = vadd.xlane.f32.xlu0 %v4370_v54 }
 0xb3b   :  { %v4369_v49 = vpop.xlane.xlu1 %4368 }
 0xb3c   :  { %v4374_v30 = vmul.f32 0.03125, %v4369_v49 }
 0xb3e   :  { %v4376_v52 = vsub.f32 %v4365_v1, %v4374_v30 }
 0xb3f   :  { %v4372_v51 = vpop.xlane.xlu0 %4371 }
 0xb40   :  { %v4375_v35 = vmul.f32 0.03125, %v4372_v51  ;;  %v4378_v32 = vmul.f32 %v4376_v52, %v4376_v52 }
 0xb42   :  { %v4377_v60 = vsub.f32 %v4366_v44, %v4375_v35  ;;  %v4380_v42 = vsel %vm138_vm1, %v4378_v32, 0.0 }
 0xb43   :  { %4381 = vadd.xlane.f32.xlu0 %v4380_v42 }
 0xb44   :  { %v4379_v28 = vmul.f32 %v4377_v60, %v4377_v60 }
 0xb46   :  { %v4383_v56 = vsel %vm138_vm1, %v4379_v28, 0.0 }
 0xb47   :  { %4384 = vadd.xlane.f32.xlu1 %v4383_v56 }
 0xbcc   :  { %v4382_v61 = vpop.xlane.xlu0 %4381 }
 0xbcd   :  { %v4386_v20 = vmul.f32 0.03125, %v4382_v61 }
 0xbcf   :  { %v4388_v27 = vadd.f32 1e-12, %v4386_v20 }
 0xbd0   :  { %v4385_v23 = vpop.xlane.xlu1 %4384 }
 0xbd1   :  { %4952 = vrsqrt.f32 %v4388_v27  ;;  %v4387_v45 = vmul.f32 0.03125, %v4385_v23  ;;  %v5103_v27 = vmov -1.0  }
 0xbd3   :  { %v4389_v17 = vadd.f32 1e-12, %v4387_v45 }
 0xbd5   :  { %4954 = vrsqrt.f32 %v4389_v17 }
 0xbde   :  { %v4953_v43 = vpop.eup %4952 }
 0xbdf   :  { %v4392_v34 = vmul.f32 %v4953_v43, %v4376_v52 }
 0xbe1   :  { %v4401_v36 = vmul.f32 %v4718_v58, %v4392_v34 }
 0xbe2   :  { %v4955_v26 = vpop.eup %4954 }
 0xbe3   :  { %v4393_v19 = vmul.f32 %v4955_v26, %v4377_v60  ;;  %v7870_v2 = vadd.f32 %v4719_v14, %v4401_v36 }
 0xbe5   :  { %v4402_v48 = vmul.f32 %v4718_v58, %v4393_v19 }
 0xbe7   :  { %v7872_v4 = vadd.f32 %v4719_v14, %v4402_v48 }
 0xbe9   :  { %v4412_v29 = vpack.c.bf16 %v7872_v4, %v7870_v2 }
 0xbeb   :  { %4855 = vmatmul.mubr.msk.bf16.vlgmr.msra.gmra.mxu1 %vm138_vm1, %v4412_v29 }
 0xcab   :  { %v4473_v5 = vpop.f32.mrf.mxu1 }
 0xcac   :  { %v4474_v25 = vadd.f32 %v4720_v47, %v4473_v5 }
 0xcad   :  { %v4856_v21 = vpop.f32.mrf.mxu1 }
 0xcae   :  { %v4482_v22 = vmul.f32 0.70710677, %v4474_v25  ;;  %v4480_v19 = vmul.f32 0.5, %v4474_v25 }
 0xcaf   :  { %v4476_v24 = vpop.f32.mrf.mxu1 }
 0xcb0   :  { %v4488_v63 = vand.u32 2147483647, %v4482_v22  ;;  %v4477_v50 = vadd.f32 %v4720_v47, %v4476_v24  ;;  %vm4484_vm13 = vcmp.ge.f32.partialorder %v4482_v22, 0.0 }
 0xcb1   :  { %v4857_v6 = vpop.f32.mrf.mxu1  ;;  %v4486_v23 = vsel %vm4484_vm13, 1.0, %v5103_v27 }
 0xcb2   :  { %v4490_v57 = vmul.f32 0.3275911, %v4488_v63  ;;  %v4483_v46 = vmul.f32 0.70710677, %v4477_v50  ;;  %v4516_v13 = vsub.f32 0.0, %v4488_v63  ;;  %v4481_v36 = vmul.f32 0.5, %v4477_v50 }
 0xcb4   :  { %v4492_v31 = vadd.f32 1.0, %v4490_v57  ;;  %v4489_v55 = vand.u32 2147483647, %v4483_v46  ;;  %v4518_v37 = vmul.f32 %v4516_v13, %v4488_v63  ;;  %vm4485_vm14 = vcmp.ge.f32.partialorder %v4483_v46, 0.0 }
 0xcb5   :  { %v4487_v34 = vsel %vm4485_vm14, 1.0, %v5103_v27 }
 0xcb6   :  { %4956 = vrcp.f32 %v4492_v31  ;;  %v4491_v53 = vmul.f32 0.3275911, %v4489_v55  ;;  %v4517_v10 = vsub.f32 0.0, %v4489_v55  ;;  %v4520_v40 = vmul.f32 1.442695, %v4518_v37 }
 0xcb8   :  { %v4493_v38 = vadd.f32 1.0, %v4491_v53  ;;  %v4519_v59 = vmul.f32 %v4517_v10, %v4489_v55 }
 0xcba   :  { %4958 = vrcp.f32 %v4493_v38  ;;  %v4522_v8 = vmul.f32 1.442695, %v4519_v59 }
 0xcbb   :  { %4960 = vpow2.f32 %v4520_v40 }
 0xcbc   :  { %4962 = vpow2.f32 %v4522_v8 }
 0xcc3   :  { %v4957_v0 = vpop.eup %4956 }
 0xcc4   :  { %v4498_v41 = vmul.f32 1.0614054, %v4957_v0 }
 0xcc6   :  { %v4500_v3 = vadd.f32 -1.4531521, %v4498_v41 }
 0xcc7   :  { %v4959_v1 = vpop.eup %4958 }
 0xcc8   :  { %v4502_v39 = vmul.f32 %v4957_v0, %v4500_v3  ;;  %v4499_v11 = vmul.f32 1.0614054, %v4959_v1  ;;  %v4961_v28 = vpop.eup %4960 }
 0xcc9   :  { %v4963_v20 = vpop.eup %4962 }
 0xcca   :  { %v4504_v16 = vadd.f32 1.4214138, %v4502_v39  ;;  %v4501_v9 = vadd.f32 -1.4531521, %v4499_v11  ;;  %v4731_v11 = vld [vmem:[%s7933_s15] ss:$0 sm:$0xff] }
 0xccc   :  { %v4506_v44 = vmul.f32 %v4957_v0, %v4504_v16  ;;  %v4503_v54 = vmul.f32 %v4959_v1, %v4501_v9 }
 0xcce   :  { %v4508_v49 = vadd.f32 -0.28449672, %v4506_v44  ;;  %v4505_v30 = vadd.f32 1.4214138, %v4503_v54 }
 0xcd0   :  { %v4510_v52 = vmul.f32 %v4957_v0, %v4508_v49  ;;  %v4507_v51 = vmul.f32 %v4959_v1, %v4505_v30 }
 0xcd2   :  { %v4512_v35 = vadd.f32 0.2548296, %v4510_v52  ;;  %v4509_v32 = vadd.f32 -0.28449672, %v4507_v51 }
 0xcd4   :  { %v4514_v60 = vmul.f32 %v4957_v0, %v4512_v35  ;;  %v4511_v42 = vmul.f32 %v4959_v1, %v4509_v32 }
 0xcd6   :  { %v4524_v56 = vmul.f32 %v4961_v28, %v4514_v60  ;;  %v4513_v18 = vadd.f32 0.2548296, %v4511_v42 }
 0xcd8   :  { %v4526_v12 = vsub.f32 1.0, %v4524_v56  ;;  %v4515_v61 = vmul.f32 %v4959_v1, %v4513_v18  ;;  %v4730_v1 = vld [vmem:[%s7932_s14] ss:$0 sm:$0xff] }
 0xcda   :  { %v4528_v45 = vmul.f32 %v4526_v12, %v4486_v23  ;;  %v4525_v17 = vmul.f32 %v4963_v20, %v4515_v61 }
 0xcdc   :  { %v4527_v43 = vsub.f32 1.0, %v4525_v17  ;;  %v4530_v58 = vadd.f32 1.0, %v4528_v45 }
 0xcde   :  { %v4529_v26 = vmul.f32 %v4527_v43, %v4487_v34  ;;  %v4532_v48 = vmul.f32 %v4530_v58, %v4480_v19 }
 0xce0   :  { %v4531_v14 = vadd.f32 1.0, %v4529_v26 }
 0xce2   :  { %v4533_v29 = vmul.f32 %v4531_v14, %v4481_v36 }
 0xce4   :  { %v4534_v7 = vpack.c.bf16 %v4533_v29, %v4532_v48 }
 0xce6   :  { %4867 = vmatmul.mubr.msk.bf16.vlgmr.msra.gmra.mxu0 %vm4574_vm15, %v4534_v7 }
 0xda6   :  { %v4612_v15 = vpop.f32.mrf.mxu0 }
 0xda7   :  { %v4613_v33 = vadd.f32 %v4724_v62, %v4612_v15 }
 0xda8   :  { %v4868_v47 = vpop.f32.mrf.mxu0 }
 0xda9   :  { %v4619_v5 = vadd.f32 %v4613_v33, %v7870_v2 }
 0xdaa   :  { %v4615_v21 = vpop.f32.mrf.mxu0 }
 0xdab   :  { %v4616_v22 = vadd.f32 %v4724_v62, %v4615_v21  ;;  %v4621_v25 = vsel %vm138_vm1, %v4619_v5, 0.0 }
 0xdac   :  { %4622 = vadd.xlane.f32.xlu0 %v4621_v25  ;;  %v4869_v24 = vpop.f32.mrf.mxu0 }
 0xdad   :  { %v4620_v63 = vadd.f32 %v4616_v22, %v7872_v4 }
 0xdaf   :  { %v4624_v50 = vsel %vm138_vm1, %v4620_v63, 0.0 }
 0xdb0   :  { %4625 = vadd.xlane.f32.xlu1 %v4624_v50 }
 0xe35   :  { %v4623_v6 = vpop.xlane.xlu0 %4622 }
 0xe36   :  { %v4627_v57 = vmul.f32 0.03125, %v4623_v6 }
 0xe38   :  { %v4629_v46 = vsub.f32 %v4619_v5, %v4627_v57 }
 0xe39   :  { %v4626_v31 = vpop.xlane.xlu1 %4625 }
 0xe3a   :  { %v4628_v55 = vmul.f32 0.03125, %v4626_v31  ;;  %v4631_v53 = vmul.f32 %v4629_v46, %v4629_v46 }
 0xe3c   :  { %v4630_v38 = vsub.f32 %v4620_v63, %v4628_v55  ;;  %v4633_v2 = vsel %vm138_vm1, %v4631_v53, 0.0 }
 0xe3d   :  { %4634 = vadd.xlane.f32.xlu0 %v4633_v2 }
 0xe3e   :  { %v4632_v13 = vmul.f32 %v4630_v38, %v4630_v38 }
 0xe40   :  { %v4636_v37 = vsel %vm138_vm1, %v4632_v13, 0.0 }
 0xe41   :  { %4637 = vadd.xlane.f32.xlu1 %v4636_v37 }
 0xec6   :  { %v4635_v10 = vpop.xlane.xlu0 %4634 }
 0xec7   :  { %v4639_v0 = vmul.f32 0.03125, %v4635_v10 }
 0xec9   :  { %v4641_v4 = vadd.f32 1e-12, %v4639_v0 }
 0xeca   :  { %v4638_v41 = vpop.xlane.xlu1 %4637 }
 0xecb   :  { %4964 = vrsqrt.f32 %v4641_v4  ;;  %v4640_v40 = vmul.f32 0.03125, %v4638_v41 }
 0xecd   :  { %v4642_v59 = vadd.f32 1e-12, %v4640_v40 }
 0xecf   :  { %4966 = vrsqrt.f32 %v4642_v59 }
 0xed8   :  { %v4965_v3 = vpop.eup %4964 }
 0xed9   :  { %v4645_v39 = vmul.f32 %v4965_v3, %v4629_v46 }
 0xedb   :  { %v4654_v8 = vmul.f32 %v4730_v1, %v4645_v39 }
 0xedc   :  { %v4967_v16 = vpop.eup %4966 }
 0xedd   :  { %v4646_v9 = vmul.f32 %v4967_v16, %v4630_v38  ;;  %v4663_v44 = vadd.f32 %v4731_v11, %v4654_v8 }
 0xedf   :  { %v4655_v54 = vmul.f32 %v4730_v1, %v4646_v9  ;;  %4665 = vst.msk [vmem:[#allocation10] sm:$0xff] %vm138_vm1, %v4663_v44 }
 0xee1   :  { %v4664_v49 = vadd.f32 %v4731_v11, %v4655_v54 }
 0xee3   :  { %4666 = vst.msk [vmem:[#allocation10 + $0x8] sm:$0xff] %vm138_vm1, %v4664_v49 }
 0xee4   :  { %5063 = shalt.err (!%p5060_p10)
}
 0xee5   :  { %4678 = dma.vmem_to_hbm [thread:$0]  %s4673_s5, 256, %s7934_s16, [#allocation4], %s5082_s26, %s5082_s26, %s5083_s27  }
 0xee6   :  { %5078 = dma.done.wait [#allocation4], 256  }
 0xee7   :  { %5079 = vsyncadd [#allocation4], 4294967040 }
 0xee8   :  { %4682 = vsyncpa [#allocation3], 1 }
 0xee9   :  { %4683 = vsyncpa [#allocation6], 1 }
 0xeea   :  { %4684 = vsyncpa [#allocation9], 1 }
 0xeeb   :  { %4685 = vsyncpa [#allocation4], 1 }

</bundles_post_ra>
